<compile_context>
chip_gen: v7x
topology: tpu7x:2x2x1
jax: 0.10.0
libtpu: 0.0.40
codegen_flags: <defaults>
</compile_context>

<pallas_src>
import functools

import jax
import jax.numpy as jnp
from jax.experimental import pallas as pl
from jax.experimental.pallas import tpu as pltpu

# ---- small, module-consistent config ----
H = 32        # MultiStagePointNetEncoder h_dim
L = 4         # num_layers
C_OUT = 32    # pointcloud_encoder_cfg.out_channels
S_HID = 64    # state_mlp_size[0]   (module default state_mlp_size=(64, 64))
S_OUT = 64    # state_mlp_size[-1]  -> total output dim = C_OUT + S_OUT

# Activation of MultiStagePointNetEncoder: LeakyReLU(negative_slope=0.0) == ReLU.
# TODO(synk): if the deployed iDP3 config uses torch's default LeakyReLU slope
# (0.01), set NEG_SLOPE = 0.01 (kernel and reference both honor it).
NEG_SLOPE = 0.0


def _act(v):
    if NEG_SLOPE == 0.0:
        return jnp.maximum(v, 0.0)
    return jnp.where(v >= 0.0, v, NEG_SLOPE * v)


def _make_kernel(G, N):
    """Kernel processing G point clouds per grid step, channels-first (C, G*N)."""

    def mxu(w_bf16, y_f32):
        # bf16 operands, f32 MXU accumulate.
        return jnp.dot(w_bf16, y_f32.astype(jnp.bfloat16),
                       preferred_element_type=jnp.float32)

    def kernel(pts_ref,                      # (G, 3, N) f32, channels-first
               w_in_ref, b_in_ref,           # (H, 3) f32, (H, 1) f32
               w_l_ref, b_l_ref,             # (L, H, H) bf16, (L, H, 1) f32
               w_glo_ref, w_ghi_ref, b_g_ref,  # (L, H, H) bf16 x2, (L, H, 1) f32
               w_out_ref, b_out_ref,         # (L, C_OUT, H) bf16, (C_OUT, 1) f32
               out_ref):                     # (1, C_OUT, G) f32
        # Assemble the point slab (3, G*N); per-cloud tiles are 128-lane aligned.
        x = jnp.concatenate([pts_ref[g] for g in range(G)], axis=1)   # (3, M)
        w_in = w_in_ref[...]                                          # (H, 3)

        # conv_in: K=3 contraction done on the VPU (3 broadcast FMAs), f32.
        y = _act(w_in[:, 0:1] * x[0:1, :]
                 + w_in[:, 1:2] * x[1:2, :]
                 + w_in[:, 2:3] * x[2:3, :]
                 + b_in_ref[...])                                     # (H, M)

        pn = None                                                     # (C_OUT, M)
        for i in range(L):                                            # static unroll
            # layers[i]: (H,H) @ (H,M) slab matmul.
            y = _act(mxu(w_l_ref[i], y) + b_l_ref[i])                 # (H, M)

            # Per-cloud global max over the point (lane) axis -> (H, G).
            glob = jnp.concatenate(
                [jnp.max(y[:, g * N:(g + 1) * N], axis=1, keepdims=True)
                 for g in range(G)], axis=1)                          # (H, G)

            # global_layers[i] via split weights (block-matmul identity):
            #   act(W[:, :H] @ y + W[:, H:] @ glob (bcast per cloud) + b)
            t = mxu(w_glo_ref[i], y) + b_g_ref[i]                     # (H, M)
            z = mxu(w_ghi_ref[i], glob)                               # (H, G)
            y = jnp.concatenate(
                [_act(t[:, g * N:(g + 1) * N] + z[:, g:g + 1])
                 for g in range(G)], axis=1)                          # (H, M)

            # conv_out block for this stage, accumulated (no feature concat).
            c = mxu(w_out_ref[i], y)                                  # (C_OUT, M)
            pn = c if pn is None else pn + c

        # Per-cloud global max-pool of conv_out output; the conv_out bias is a
        # per-channel constant, so max(x + b) == max(x) + b.
        pn_g = jnp.concatenate(
            [jnp.max(pn[:, g * N:(g + 1) * N], axis=1, keepdims=True)
             for g in range(G)], axis=1)                              # (C_OUT, G)
        out_ref[0] = pn_g + b_out_ref[...]

    return kernel


def pointnet_pallas(points, pn_params, *, group=4):
    """points: (B, N, 3) f32 (already downsampled) -> (B, C_OUT) f32."""
    w_in, b_in, w_l, b_l, w_g, b_g, w_out, b_out = pn_params
    B, N, _ = points.shape
    G = max(1, min(group, B))
    Bp = ((B + G - 1) // G) * G

    # Channels-first points for the kernel; pad batch to a multiple of G.
    pts_cf = jnp.transpose(points, (0, 2, 1))                         # (B, 3, N)
    if Bp != B:
        pts_cf = jnp.pad(pts_cf, ((0, Bp - B), (0, 0), (0, 0)))

    bf = jnp.bfloat16
    w_l_bf = w_l.astype(bf)                                           # (L, H, H)
    w_glo_bf = w_g[:, :, :H].astype(bf)                               # (L, H, H)
    w_ghi_bf = w_g[:, :, H:].astype(bf)                               # (L, H, H)
    w_out_bf = jnp.transpose(
        w_out.reshape(C_OUT, L, H), (1, 0, 2)).astype(bf)             # (L, C_OUT, H)
    b_in_c = b_in.reshape(H, 1)
    b_l_c = b_l.reshape(L, H, 1)
    b_g_c = b_g.reshape(L, H, 1)
    b_out_c = b_out.reshape(C_OUT, 1)

    def full(shape):
        return pl.BlockSpec(shape, lambda b, _s=len(shape): (0,) * _s)

    out = pl.pallas_call(
        _make_kernel(G, N),
        out_shape=jax.ShapeDtypeStruct((Bp // G, C_OUT, G), jnp.float32),
        grid_spec=pltpu.PrefetchScalarGridSpec(
            num_scalar_prefetch=0,
            grid=(Bp // G,),
            in_specs=[
                pl.BlockSpec((G, 3, N), lambda b: (b, 0, 0)),         # points
                full((H, 3)), full((H, 1)),                           # conv_in
                full((L, H, H)), full((L, H, 1)),                     # layers[i]
                full((L, H, H)), full((L, H, H)), full((L, H, 1)),    # global_layers[i]
                full((L, C_OUT, H)), full((C_OUT, 1)),                # conv_out
            ],
            out_specs=pl.BlockSpec((1, C_OUT, G), lambda b: (b, 0, 0))),
        compiler_params=pltpu.CompilerParams(
            dimension_semantics=("parallel",)),
    )(pts_cf, w_in, b_in_c, w_l_bf, b_l_c, w_glo_bf, w_ghi_bf, b_g_c,
      w_out_bf, b_out_c)

    pn = jnp.transpose(out, (0, 2, 1)).reshape(Bp, C_OUT)
    return pn[:B]


def uniform_downsample(points, num_points):
    # TODO(synk): original point_process.uniform_sampling_torch samples random
    # indices; here we use deterministic evenly-strided indices (same shapes).
    n = points.shape[1]
    idx = jnp.linspace(0, n - 1, num_points).astype(jnp.int32)
    return points[:, idx, :]


def idp3_forward(points_raw, state, params, *, num_points=128, group=4):
    """points_raw: (B, N_raw, 3), state: (B, S) -> (B, C_OUT + S_OUT)."""
    (w_in, b_in, w_l, b_l, w_g, b_g, w_out, b_out,
     w_s1, b_s1, w_s2, b_s2) = params
    pts = uniform_downsample(points_raw, num_points)                  # (B, N, 3)
    pn_feat = pointnet_pallas(
        pts, (w_in, b_in, w_l, b_l, w_g, b_g, w_out, b_out), group=group)
    # state MLP (Linear -> ReLU -> Linear) as plain XLA batched GEMMs; two
    # 1-row matmuls per grid step inside the kernel would be pure MXU latency.
    h = jnp.maximum(jnp.dot(state, w_s1.T) + b_s1, 0.0)
    s_feat = jnp.dot(h, w_s2.T) + b_s2
    return jnp.concatenate([pn_feat, s_feat], axis=-1)


def reference_forward(points, state, params, *, mimic_kernel_bf16=False):
    """Pure-JAX reference of the module math (channels-last, unsplit weights).

    mimic_kernel_bf16=True casts the MXU matmul operands to bf16 exactly like
    the kernel does (conv_in stays f32, matching the kernel's VPU path).
    """
    (w_in, b_in, w_l, b_l, w_g, b_g, w_out, b_out,
     w_s1, b_s1, w_s2, b_s2) = params
    hp = jax.lax.Precision.HIGHEST

    def mm(a, w):   # a (B,N,Cin) x w (Cout,Cin) -> (B,N,Cout)
        if mimic_kernel_bf16:
            return jnp.einsum('bnc,kc->bnk', a.astype(jnp.bfloat16),
                              w.astype(jnp.bfloat16),
                              preferred_element_type=jnp.float32)
        return jnp.einsum('bnc,kc->bnk', a, w, precision=hp)

    y = _act(jnp.einsum('bnc,kc->bnk', points, w_in, precision=hp) + b_in)
    feats = []
    for i in range(L):
        y = _act(mm(y, w_l[i]) + b_l[i])
        y_glob = jnp.max(y, axis=1, keepdims=True)
        y_cat = jnp.concatenate([y, jnp.broadcast_to(y_glob, y.shape)], axis=-1)
        y = _act(mm(y_cat, w_g[i]) + b_g[i])
        feats.append(y)
    feat = jnp.concatenate(feats, axis=-1)
    pn = mm(feat, w_out) + b_out
    pn_feat = jnp.max(pn, axis=1)
    h = jnp.maximum(jnp.dot(state, w_s1.T, precision=hp) + b_s1, 0.0)
    s_feat = jnp.dot(h, w_s2.T, precision=hp) + b_s2
    return jnp.concatenate([pn_feat, s_feat], axis=-1)


if __name__ == "__main__":
    key = jax.random.PRNGKey(0)
    B = 8              # batch of point clouds
    N_RAW = 512        # raw point cloud size
    NUM_POINTS = 128   # pointcloud_encoder_cfg.num_points
    S = 8              # agent_pos dim
    GROUP = 4          # clouds per grid step -> grid=(2,) parallel steps

    ks = jax.random.split(key, 16)
    points_raw = jax.random.normal(ks[0], (B, N_RAW, 3), jnp.float32)
    state = jax.random.normal(ks[1], (B, S), jnp.float32)

    def init(k, shape, fan_in):
        lim = 1.0 / jnp.sqrt(jnp.float32(fan_in))
        return jax.random.uniform(k, shape, jnp.float32, -lim, lim)

    # PyTorch-native orientations: Conv1d/Linear weights are (C_out, C_in).
    params = [
        init(ks[2], (H, 3), 3),              init(ks[3], (H,), 3),
        init(ks[4], (L, H, H), H),           init(ks[5], (L, H), H),
        init(ks[6], (L, H, 2 * H), 2 * H),   init(ks[7], (L, H), 2 * H),
        init(ks[8], (C_OUT, L * H), L * H),  init(ks[9], (C_OUT,), L * H),
        init(ks[10], (S_HID, S), S),         init(ks[11], (S_HID,), S),
        init(ks[12], (S_OUT, S_HID), S_HID), init(ks[13], (S_OUT,), S_HID),
    ]

    fwd = jax.jit(functools.partial(idp3_forward,
                                    num_points=NUM_POINTS, group=GROUP))
    out = jax.block_until_ready(fwd(points_raw, state, params))

    assert out.shape == (B, C_OUT + S_OUT), out.shape
    assert bool(jnp.all(jnp.isfinite(out)))

    pts = uniform_downsample(points_raw, NUM_POINTS)
    ref_bf16 = reference_forward(pts, state, params, mimic_kernel_bf16=True)
    ref_f32 = reference_forward(pts, state, params, mimic_kernel_bf16=False)
    err_bf = float(jnp.max(jnp.abs(out - ref_bf16)))
    err_f32 = float(jnp.max(jnp.abs(out - ref_f32)))
    # Tight check vs a reference with identical (bf16-MXU) precision choices.
    assert bool(jnp.allclose(out, ref_bf16, rtol=1e-2, atol=1e-2)), err_bf
    # Loose sanity check vs full-f32 module math (bf16 matmul operands in use).
    assert bool(jnp.allclose(out, ref_f32, rtol=5e-2, atol=5e-2)), err_f32

    print("KERNEL_OK")
</pallas_src>

<mosaic_0001>
module attributes {stable_mosaic.version = 11 : i64} {
  func.func @kernel(%arg0: i32, %arg1: memref<4x3x128xf32, #tpu.memory_space<vmem>>, %arg2: memref<32x3xf32, #tpu.memory_space<vmem>>, %arg3: memref<32x1xf32, #tpu.memory_space<vmem>>, %arg4: memref<4x32x32xbf16, #tpu.memory_space<vmem>>, %arg5: memref<4x32x1xf32, #tpu.memory_space<vmem>>, %arg6: memref<4x32x32xbf16, #tpu.memory_space<vmem>>, %arg7: memref<4x32x32xbf16, #tpu.memory_space<vmem>>, %arg8: memref<4x32x1xf32, #tpu.memory_space<vmem>>, %arg9: memref<4x32x32xbf16, #tpu.memory_space<vmem>>, %arg10: memref<32x1xf32, #tpu.memory_space<vmem>>, %arg11: memref<1x32x4xf32, #tpu.memory_space<vmem>>) attributes {dimension_semantics = [#tpu.dimension_semantics<parallel>], iteration_bounds = array<i64: 2>, scalar_prefetch = 0 : i64, scratch_operands = 0 : i64, tpu.core_type = #tpu.core_type<tc>, window_params = [{transform_indices = @transform_0, window_bounds = array<i64: 4, 3, 128>}, {pipeline_mode = #tpu.pipeline_mode<synchronous>, transform_indices = @transform_1, window_bounds = array<i64: 32, 3>}, {pipeline_mode = #tpu.pipeline_mode<synchronous>, transform_indices = @transform_2, window_bounds = array<i64: 32, 1>}, {pipeline_mode = #tpu.pipeline_mode<synchronous>, transform_indices = @transform_3, window_bounds = array<i64: 4, 32, 32>}, {pipeline_mode = #tpu.pipeline_mode<synchronous>, transform_indices = @transform_4, window_bounds = array<i64: 4, 32, 1>}, {pipeline_mode = #tpu.pipeline_mode<synchronous>, transform_indices = @transform_5, window_bounds = array<i64: 4, 32, 32>}, {pipeline_mode = #tpu.pipeline_mode<synchronous>, transform_indices = @transform_6, window_bounds = array<i64: 4, 32, 32>}, {pipeline_mode = #tpu.pipeline_mode<synchronous>, transform_indices = @transform_7, window_bounds = array<i64: 4, 32, 1>}, {pipeline_mode = #tpu.pipeline_mode<synchronous>, transform_indices = @transform_8, window_bounds = array<i64: 4, 32, 32>}, {pipeline_mode = #tpu.pipeline_mode<synchronous>, transform_indices = @transform_9, window_bounds = array<i64: 32, 1>}, {transform_indices = @transform_10, window_bounds = array<i64: 1, 32, 4>}]} {
    %c0 = arith.constant 0 : index
    %c0_0 = arith.constant 0 : index
    %c0_1 = arith.constant 0 : index
    %0 = vector.load %arg1[%c0, %c0_0, %c0_1] : memref<4x3x128xf32, #tpu.memory_space<vmem>>, vector<1x3x128xf32>
    %1 = vector.shape_cast %0 : vector<1x3x128xf32> to vector<3x128xf32>
    %c1 = arith.constant 1 : index
    %c0_2 = arith.constant 0 : index
    %c0_3 = arith.constant 0 : index
    %2 = vector.load %arg1[%c1, %c0_2, %c0_3] : memref<4x3x128xf32, #tpu.memory_space<vmem>>, vector<1x3x128xf32>
    %3 = vector.shape_cast %2 : vector<1x3x128xf32> to vector<3x128xf32>
    %c2 = arith.constant 2 : index
    %c0_4 = arith.constant 0 : index
    %c0_5 = arith.constant 0 : index
    %4 = vector.load %arg1[%c2, %c0_4, %c0_5] : memref<4x3x128xf32, #tpu.memory_space<vmem>>, vector<1x3x128xf32>
    %5 = vector.shape_cast %4 : vector<1x3x128xf32> to vector<3x128xf32>
    %c3 = arith.constant 3 : index
    %c0_6 = arith.constant 0 : index
    %c0_7 = arith.constant 0 : index
    %6 = vector.load %arg1[%c3, %c0_6, %c0_7] : memref<4x3x128xf32, #tpu.memory_space<vmem>>, vector<1x3x128xf32>
    %7 = vector.shape_cast %6 : vector<1x3x128xf32> to vector<3x128xf32>
    %8 = tpu.concatenate %1, %3, %5, %7 in 1 : vector<3x128xf32>, vector<3x128xf32>, vector<3x128xf32>, vector<3x128xf32> -> vector<3x512xf32>
    %c0_8 = arith.constant 0 : index
    %c0_9 = arith.constant 0 : index
    %9 = vector.load %arg2[%c0_8, %c0_9] : memref<32x3xf32, #tpu.memory_space<vmem>>, vector<32x3xf32>
    %10 = vector.extract_strided_slice %9 {offsets = [0, 0], sizes = [32, 1], strides = [1, 1]} : vector<32x3xf32> to vector<32x1xf32>
    %11 = vector.extract_strided_slice %8 {offsets = [0, 0], sizes = [1, 512], strides = [1, 1]} : vector<3x512xf32> to vector<1x512xf32>
    %12 = vector.broadcast %10 : vector<32x1xf32> to vector<32x512xf32>
    %13 = vector.broadcast %11 : vector<1x512xf32> to vector<32x512xf32>
    %14 = arith.mulf %12, %13 : vector<32x512xf32>
    %15 = vector.extract_strided_slice %9 {offsets = [0, 1], sizes = [32, 1], strides = [1, 1]} : vector<32x3xf32> to vector<32x1xf32>
    %16 = vector.extract_strided_slice %8 {offsets = [1, 0], sizes = [1, 512], strides = [1, 1]} : vector<3x512xf32> to vector<1x512xf32>
    %17 = vector.broadcast %15 : vector<32x1xf32> to vector<32x512xf32>
    %18 = vector.broadcast %16 : vector<1x512xf32> to vector<32x512xf32>
    %19 = arith.mulf %17, %18 : vector<32x512xf32>
    %20 = arith.addf %14, %19 : vector<32x512xf32>
    %21 = vector.extract_strided_slice %9 {offsets = [0, 2], sizes = [32, 1], strides = [1, 1]} : vector<32x3xf32> to vector<32x1xf32>
    %22 = vector.extract_strided_slice %8 {offsets = [2, 0], sizes = [1, 512], strides = [1, 1]} : vector<3x512xf32> to vector<1x512xf32>
    %23 = vector.broadcast %21 : vector<32x1xf32> to vector<32x512xf32>
    %24 = vector.broadcast %22 : vector<1x512xf32> to vector<32x512xf32>
    %25 = arith.mulf %23, %24 : vector<32x512xf32>
    %26 = arith.addf %20, %25 : vector<32x512xf32>
    %c0_10 = arith.constant 0 : index
    %c0_11 = arith.constant 0 : index
    %27 = vector.load %arg3[%c0_10, %c0_11] : memref<32x1xf32, #tpu.memory_space<vmem>>, vector<32x1xf32>
    %28 = vector.broadcast %27 : vector<32x1xf32> to vector<32x512xf32>
    %29 = arith.addf %26, %28 : vector<32x512xf32>
    %cst = arith.constant 0.000000e+00 : f32
    %30 = vector.broadcast %cst : f32 to vector<32x512xf32>
    %31 = arith.maximumf %29, %30 : vector<32x512xf32>
    %c0_12 = arith.constant 0 : index
    %c0_13 = arith.constant 0 : index
    %c0_14 = arith.constant 0 : index
    %32 = vector.load %arg4[%c0_12, %c0_13, %c0_14] : memref<4x32x32xbf16, #tpu.memory_space<vmem>>, vector<1x32x32xbf16>
    %33 = vector.shape_cast %32 : vector<1x32x32xbf16> to vector<32x32xbf16>
    %34 = arith.truncf %31 : vector<32x512xf32> to vector<32x512xbf16>
    %cst_15 = arith.constant dense<0.000000e+00> : vector<32x512xf32>
    %35 = tpu.matmul %33, %34, %cst_15 {dimension_numbers = #tpu.dot_dimension_numbers<[1], [0], [0], [1], [0, 0, 1, 1], [], []>} : vector<32x32xbf16>, vector<32x512xbf16>, vector<32x512xf32> -> vector<32x512xf32>
    %c0_16 = arith.constant 0 : index
    %c0_17 = arith.constant 0 : index
    %c0_18 = arith.constant 0 : index
    %36 = vector.load %arg5[%c0_16, %c0_17, %c0_18] : memref<4x32x1xf32, #tpu.memory_space<vmem>>, vector<1x32x1xf32>
    %37 = vector.shape_cast %36 : vector<1x32x1xf32> to vector<32x1xf32>
    %38 = vector.broadcast %37 : vector<32x1xf32> to vector<32x512xf32>
    %39 = arith.addf %35, %38 : vector<32x512xf32>
    %cst_19 = arith.constant 0.000000e+00 : f32
    %40 = vector.broadcast %cst_19 : f32 to vector<32x512xf32>
    %41 = arith.maximumf %39, %40 : vector<32x512xf32>
    %42 = vector.extract_strided_slice %41 {offsets = [0, 0], sizes = [32, 128], strides = [1, 1]} : vector<32x512xf32> to vector<32x128xf32>
    %cst_20 = arith.constant dense<0xFF800000> : vector<32xf32>
    %43 = vector.multi_reduction <maximumf>, %42, %cst_20 [1] : vector<32x128xf32> to vector<32xf32>
    %44 = vector.shape_cast %43 : vector<32xf32> to vector<32x1xf32>
    %45 = vector.extract_strided_slice %41 {offsets = [0, 128], sizes = [32, 128], strides = [1, 1]} : vector<32x512xf32> to vector<32x128xf32>
    %cst_21 = arith.constant dense<0xFF800000> : vector<32xf32>
    %46 = vector.multi_reduction <maximumf>, %45, %cst_21 [1] : vector<32x128xf32> to vector<32xf32>
    %47 = vector.shape_cast %46 : vector<32xf32> to vector<32x1xf32>
    %48 = vector.extract_strided_slice %41 {offsets = [0, 256], sizes = [32, 128], strides = [1, 1]} : vector<32x512xf32> to vector<32x128xf32>
    %cst_22 = arith.constant dense<0xFF800000> : vector<32xf32>
    %49 = vector.multi_reduction <maximumf>, %48, %cst_22 [1] : vector<32x128xf32> to vector<32xf32>
    %50 = vector.shape_cast %49 : vector<32xf32> to vector<32x1xf32>
    %51 = vector.extract_strided_slice %41 {offsets = [0, 384], sizes = [32, 128], strides = [1, 1]} : vector<32x512xf32> to vector<32x128xf32>
    %cst_23 = arith.constant dense<0xFF800000> : vector<32xf32>
    %52 = vector.multi_reduction <maximumf>, %51, %cst_23 [1] : vector<32x128xf32> to vector<32xf32>
    %53 = vector.shape_cast %52 : vector<32xf32> to vector<32x1xf32>
    %54 = tpu.concatenate %44, %47, %50, %53 in 1 : vector<32x1xf32>, vector<32x1xf32>, vector<32x1xf32>, vector<32x1xf32> -> vector<32x4xf32>
    %c0_24 = arith.constant 0 : index
    %c0_25 = arith.constant 0 : index
    %c0_26 = arith.constant 0 : index
    %55 = vector.load %arg6[%c0_24, %c0_25, %c0_26] : memref<4x32x32xbf16, #tpu.memory_space<vmem>>, vector<1x32x32xbf16>
    %56 = vector.shape_cast %55 : vector<1x32x32xbf16> to vector<32x32xbf16>
    %57 = arith.truncf %41 : vector<32x512xf32> to vector<32x512xbf16>
    %cst_27 = arith.constant dense<0.000000e+00> : vector<32x512xf32>
    %58 = tpu.matmul %56, %57, %cst_27 {dimension_numbers = #tpu.dot_dimension_numbers<[1], [0], [0], [1], [0, 0, 1, 1], [], []>} : vector<32x32xbf16>, vector<32x512xbf16>, vector<32x512xf32> -> vector<32x512xf32>
    %c0_28 = arith.constant 0 : index
    %c0_29 = arith.constant 0 : index
    %c0_30 = arith.constant 0 : index
    %59 = vector.load %arg8[%c0_28, %c0_29, %c0_30] : memref<4x32x1xf32, #tpu.memory_space<vmem>>, vector<1x32x1xf32>
    %60 = vector.shape_cast %59 : vector<1x32x1xf32> to vector<32x1xf32>
    %61 = vector.broadcast %60 : vector<32x1xf32> to vector<32x512xf32>
    %62 = arith.addf %58, %61 : vector<32x512xf32>
    %c0_31 = arith.constant 0 : index
    %c0_32 = arith.constant 0 : index
    %c0_33 = arith.constant 0 : index
    %63 = vector.load %arg7[%c0_31, %c0_32, %c0_33] : memref<4x32x32xbf16, #tpu.memory_space<vmem>>, vector<1x32x32xbf16>
    %64 = vector.shape_cast %63 : vector<1x32x32xbf16> to vector<32x32xbf16>
    %65 = arith.truncf %54 : vector<32x4xf32> to vector<32x4xbf16>
    %cst_34 = arith.constant dense<0.000000e+00> : vector<32x4xf32>
    %66 = tpu.matmul %64, %65, %cst_34 {dimension_numbers = #tpu.dot_dimension_numbers<[1], [0], [0], [1], [0, 0, 1, 1], [], []>} : vector<32x32xbf16>, vector<32x4xbf16>, vector<32x4xf32> -> vector<32x4xf32>
    %67 = vector.extract_strided_slice %62 {offsets = [0, 0], sizes = [32, 128], strides = [1, 1]} : vector<32x512xf32> to vector<32x128xf32>
    %68 = vector.extract_strided_slice %66 {offsets = [0, 0], sizes = [32, 1], strides = [1, 1]} : vector<32x4xf32> to vector<32x1xf32>
    %69 = vector.broadcast %68 : vector<32x1xf32> to vector<32x128xf32>
    %70 = arith.addf %67, %69 : vector<32x128xf32>
    %cst_35 = arith.constant 0.000000e+00 : f32
    %71 = vector.broadcast %cst_35 : f32 to vector<32x128xf32>
    %72 = arith.maximumf %70, %71 : vector<32x128xf32>
    %73 = vector.extract_strided_slice %62 {offsets = [0, 128], sizes = [32, 128], strides = [1, 1]} : vector<32x512xf32> to vector<32x128xf32>
    %74 = vector.extract_strided_slice %66 {offsets = [0, 1], sizes = [32, 1], strides = [1, 1]} : vector<32x4xf32> to vector<32x1xf32>
    %75 = vector.broadcast %74 : vector<32x1xf32> to vector<32x128xf32>
    %76 = arith.addf %73, %75 : vector<32x128xf32>
    %cst_36 = arith.constant 0.000000e+00 : f32
    %77 = vector.broadcast %cst_36 : f32 to vector<32x128xf32>
    %78 = arith.maximumf %76, %77 : vector<32x128xf32>
    %79 = vector.extract_strided_slice %62 {offsets = [0, 256], sizes = [32, 128], strides = [1, 1]} : vector<32x512xf32> to vector<32x128xf32>
    %80 = vector.extract_strided_slice %66 {offsets = [0, 2], sizes = [32, 1], strides = [1, 1]} : vector<32x4xf32> to vector<32x1xf32>
    %81 = vector.broadcast %80 : vector<32x1xf32> to vector<32x128xf32>
    %82 = arith.addf %79, %81 : vector<32x128xf32>
    %cst_37 = arith.constant 0.000000e+00 : f32
    %83 = vector.broadcast %cst_37 : f32 to vector<32x128xf32>
    %84 = arith.maximumf %82, %83 : vector<32x128xf32>
    %85 = vector.extract_strided_slice %62 {offsets = [0, 384], sizes = [32, 128], strides = [1, 1]} : vector<32x512xf32> to vector<32x128xf32>
    %86 = vector.extract_strided_slice %66 {offsets = [0, 3], sizes = [32, 1], strides = [1, 1]} : vector<32x4xf32> to vector<32x1xf32>
    %87 = vector.broadcast %86 : vector<32x1xf32> to vector<32x128xf32>
    %88 = arith.addf %85, %87 : vector<32x128xf32>
    %cst_38 = arith.constant 0.000000e+00 : f32
    %89 = vector.broadcast %cst_38 : f32 to vector<32x128xf32>
    %90 = arith.maximumf %88, %89 : vector<32x128xf32>
    %91 = tpu.concatenate %72, %78, %84, %90 in 1 : vector<32x128xf32>, vector<32x128xf32>, vector<32x128xf32>, vector<32x128xf32> -> vector<32x512xf32>
    %c0_39 = arith.constant 0 : index
    %c0_40 = arith.constant 0 : index
    %c0_41 = arith.constant 0 : index
    %92 = vector.load %arg9[%c0_39, %c0_40, %c0_41] : memref<4x32x32xbf16, #tpu.memory_space<vmem>>, vector<1x32x32xbf16>
    %93 = vector.shape_cast %92 : vector<1x32x32xbf16> to vector<32x32xbf16>
    %94 = arith.truncf %91 : vector<32x512xf32> to vector<32x512xbf16>
    %cst_42 = arith.constant dense<0.000000e+00> : vector<32x512xf32>
    %95 = tpu.matmul %93, %94, %cst_42 {dimension_numbers = #tpu.dot_dimension_numbers<[1], [0], [0], [1], [0, 0, 1, 1], [], []>} : vector<32x32xbf16>, vector<32x512xbf16>, vector<32x512xf32> -> vector<32x512xf32>
    %c1_43 = arith.constant 1 : index
    %c0_44 = arith.constant 0 : index
    %c0_45 = arith.constant 0 : index
    %96 = vector.load %arg4[%c1_43, %c0_44, %c0_45] : memref<4x32x32xbf16, #tpu.memory_space<vmem>>, vector<1x32x32xbf16>
    %97 = vector.shape_cast %96 : vector<1x32x32xbf16> to vector<32x32xbf16>
    %98 = arith.truncf %91 : vector<32x512xf32> to vector<32x512xbf16>
    %cst_46 = arith.constant dense<0.000000e+00> : vector<32x512xf32>
    %99 = tpu.matmul %97, %98, %cst_46 {dimension_numbers = #tpu.dot_dimension_numbers<[1], [0], [0], [1], [0, 0, 1, 1], [], []>} : vector<32x32xbf16>, vector<32x512xbf16>, vector<32x512xf32> -> vector<32x512xf32>
    %c1_47 = arith.constant 1 : index
    %c0_48 = arith.constant 0 : index
    %c0_49 = arith.constant 0 : index
    %100 = vector.load %arg5[%c1_47, %c0_48, %c0_49] : memref<4x32x1xf32, #tpu.memory_space<vmem>>, vector<1x32x1xf32>
    %101 = vector.shape_cast %100 : vector<1x32x1xf32> to vector<32x1xf32>
    %102 = vector.broadcast %101 : vector<32x1xf32> to vector<32x512xf32>
    %103 = arith.addf %99, %102 : vector<32x512xf32>
    %cst_50 = arith.constant 0.000000e+00 : f32
    %104 = vector.broadcast %cst_50 : f32 to vector<32x512xf32>
    %105 = arith.maximumf %103, %104 : vector<32x512xf32>
    %106 = vector.extract_strided_slice %105 {offsets = [0, 0], sizes = [32, 128], strides = [1, 1]} : vector<32x512xf32> to vector<32x128xf32>
    %cst_51 = arith.constant dense<0xFF800000> : vector<32xf32>
    %107 = vector.multi_reduction <maximumf>, %106, %cst_51 [1] : vector<32x128xf32> to vector<32xf32>
    %108 = vector.shape_cast %107 : vector<32xf32> to vector<32x1xf32>
    %109 = vector.extract_strided_slice %105 {offsets = [0, 128], sizes = [32, 128], strides = [1, 1]} : vector<32x512xf32> to vector<32x128xf32>
    %cst_52 = arith.constant dense<0xFF800000> : vector<32xf32>
    %110 = vector.multi_reduction <maximumf>, %109, %cst_52 [1] : vector<32x128xf32> to vector<32xf32>
    %111 = vector.shape_cast %110 : vector<32xf32> to vector<32x1xf32>
    %112 = vector.extract_strided_slice %105 {offsets = [0, 256], sizes = [32, 128], strides = [1, 1]} : vector<32x512xf32> to vector<32x128xf32>
    %cst_53 = arith.constant dense<0xFF800000> : vector<32xf32>
    %113 = vector.multi_reduction <maximumf>, %112, %cst_53 [1] : vector<32x128xf32> to vector<32xf32>
    %114 = vector.shape_cast %113 : vector<32xf32> to vector<32x1xf32>
    %115 = vector.extract_strided_slice %105 {offsets = [0, 384], sizes = [32, 128], strides = [1, 1]} : vector<32x512xf32> to vector<32x128xf32>
    %cst_54 = arith.constant dense<0xFF800000> : vector<32xf32>
    %116 = vector.multi_reduction <maximumf>, %115, %cst_54 [1] : vector<32x128xf32> to vector<32xf32>
    %117 = vector.shape_cast %116 : vector<32xf32> to vector<32x1xf32>
    %118 = tpu.concatenate %108, %111, %114, %117 in 1 : vector<32x1xf32>, vector<32x1xf32>, vector<32x1xf32>, vector<32x1xf32> -> vector<32x4xf32>
    %c1_55 = arith.constant 1 : index
    %c0_56 = arith.constant 0 : index
    %c0_57 = arith.constant 0 : index
    %119 = vector.load %arg6[%c1_55, %c0_56, %c0_57] : memref<4x32x32xbf16, #tpu.memory_space<vmem>>, vector<1x32x32xbf16>
    %120 = vector.shape_cast %119 : vector<1x32x32xbf16> to vector<32x32xbf16>
    %121 = arith.truncf %105 : vector<32x512xf32> to vector<32x512xbf16>
    %cst_58 = arith.constant dense<0.000000e+00> : vector<32x512xf32>
    %122 = tpu.matmul %120, %121, %cst_58 {dimension_numbers = #tpu.dot_dimension_numbers<[1], [0], [0], [1], [0, 0, 1, 1], [], []>} : vector<32x32xbf16>, vector<32x512xbf16>, vector<32x512xf32> -> vector<32x512xf32>
    %c1_59 = arith.constant 1 : index
    %c0_60 = arith.constant 0 : index
    %c0_61 = arith.constant 0 : index
    %123 = vector.load %arg8[%c1_59, %c0_60, %c0_61] : memref<4x32x1xf32, #tpu.memory_space<vmem>>, vector<1x32x1xf32>
    %124 = vector.shape_cast %123 : vector<1x32x1xf32> to vector<32x1xf32>
    %125 = vector.broadcast %124 : vector<32x1xf32> to vector<32x512xf32>
    %126 = arith.addf %122, %125 : vector<32x512xf32>
    %c1_62 = arith.constant 1 : index
    %c0_63 = arith.constant 0 : index
    %c0_64 = arith.constant 0 : index
    %127 = vector.load %arg7[%c1_62, %c0_63, %c0_64] : memref<4x32x32xbf16, #tpu.memory_space<vmem>>, vector<1x32x32xbf16>
    %128 = vector.shape_cast %127 : vector<1x32x32xbf16> to vector<32x32xbf16>
    %129 = arith.truncf %118 : vector<32x4xf32> to vector<32x4xbf16>
    %cst_65 = arith.constant dense<0.000000e+00> : vector<32x4xf32>
    %130 = tpu.matmul %128, %129, %cst_65 {dimension_numbers = #tpu.dot_dimension_numbers<[1], [0], [0], [1], [0, 0, 1, 1], [], []>} : vector<32x32xbf16>, vector<32x4xbf16>, vector<32x4xf32> -> vector<32x4xf32>
    %131 = vector.extract_strided_slice %126 {offsets = [0, 0], sizes = [32, 128], strides = [1, 1]} : vector<32x512xf32> to vector<32x128xf32>
    %132 = vector.extract_strided_slice %130 {offsets = [0, 0], sizes = [32, 1], strides = [1, 1]} : vector<32x4xf32> to vector<32x1xf32>
    %133 = vector.broadcast %132 : vector<32x1xf32> to vector<32x128xf32>
    %134 = arith.addf %131, %133 : vector<32x128xf32>
    %cst_66 = arith.constant 0.000000e+00 : f32
    %135 = vector.broadcast %cst_66 : f32 to vector<32x128xf32>
    %136 = arith.maximumf %134, %135 : vector<32x128xf32>
    %137 = vector.extract_strided_slice %126 {offsets = [0, 128], sizes = [32, 128], strides = [1, 1]} : vector<32x512xf32> to vector<32x128xf32>
    %138 = vector.extract_strided_slice %130 {offsets = [0, 1], sizes = [32, 1], strides = [1, 1]} : vector<32x4xf32> to vector<32x1xf32>
    %139 = vector.broadcast %138 : vector<32x1xf32> to vector<32x128xf32>
    %140 = arith.addf %137, %139 : vector<32x128xf32>
    %cst_67 = arith.constant 0.000000e+00 : f32
    %141 = vector.broadcast %cst_67 : f32 to vector<32x128xf32>
    %142 = arith.maximumf %140, %141 : vector<32x128xf32>
    %143 = vector.extract_strided_slice %126 {offsets = [0, 256], sizes = [32, 128], strides = [1, 1]} : vector<32x512xf32> to vector<32x128xf32>
    %144 = vector.extract_strided_slice %130 {offsets = [0, 2], sizes = [32, 1], strides = [1, 1]} : vector<32x4xf32> to vector<32x1xf32>
    %145 = vector.broadcast %144 : vector<32x1xf32> to vector<32x128xf32>
    %146 = arith.addf %143, %145 : vector<32x128xf32>
    %cst_68 = arith.constant 0.000000e+00 : f32
    %147 = vector.broadcast %cst_68 : f32 to vector<32x128xf32>
    %148 = arith.maximumf %146, %147 : vector<32x128xf32>
    %149 = vector.extract_strided_slice %126 {offsets = [0, 384], sizes = [32, 128], strides = [1, 1]} : vector<32x512xf32> to vector<32x128xf32>
    %150 = vector.extract_strided_slice %130 {offsets = [0, 3], sizes = [32, 1], strides = [1, 1]} : vector<32x4xf32> to vector<32x1xf32>
    %151 = vector.broadcast %150 : vector<32x1xf32> to vector<32x128xf32>
    %152 = arith.addf %149, %151 : vector<32x128xf32>
    %cst_69 = arith.constant 0.000000e+00 : f32
    %153 = vector.broadcast %cst_69 : f32 to vector<32x128xf32>
    %154 = arith.maximumf %152, %153 : vector<32x128xf32>
    %155 = tpu.concatenate %136, %142, %148, %154 in 1 : vector<32x128xf32>, vector<32x128xf32>, vector<32x128xf32>, vector<32x128xf32> -> vector<32x512xf32>
    %c1_70 = arith.constant 1 : index
    %c0_71 = arith.constant 0 : index
    %c0_72 = arith.constant 0 : index
    %156 = vector.load %arg9[%c1_70, %c0_71, %c0_72] : memref<4x32x32xbf16, #tpu.memory_space<vmem>>, vector<1x32x32xbf16>
    %157 = vector.shape_cast %156 : vector<1x32x32xbf16> to vector<32x32xbf16>
    %158 = arith.truncf %155 : vector<32x512xf32> to vector<32x512xbf16>
    %cst_73 = arith.constant dense<0.000000e+00> : vector<32x512xf32>
    %159 = tpu.matmul %157, %158, %cst_73 {dimension_numbers = #tpu.dot_dimension_numbers<[1], [0], [0], [1], [0, 0, 1, 1], [], []>} : vector<32x32xbf16>, vector<32x512xbf16>, vector<32x512xf32> -> vector<32x512xf32>
    %160 = arith.addf %95, %159 : vector<32x512xf32>
    %c2_74 = arith.constant 2 : index
    %c0_75 = arith.constant 0 : index
    %c0_76 = arith.constant 0 : index
    %161 = vector.load %arg4[%c2_74, %c0_75, %c0_76] : memref<4x32x32xbf16, #tpu.memory_space<vmem>>, vector<1x32x32xbf16>
    %162 = vector.shape_cast %161 : vector<1x32x32xbf16> to vector<32x32xbf16>
    %163 = arith.truncf %155 : vector<32x512xf32> to vector<32x512xbf16>
    %cst_77 = arith.constant dense<0.000000e+00> : vector<32x512xf32>
    %164 = tpu.matmul %162, %163, %cst_77 {dimension_numbers = #tpu.dot_dimension_numbers<[1], [0], [0], [1], [0, 0, 1, 1], [], []>} : vector<32x32xbf16>, vector<32x512xbf16>, vector<32x512xf32> -> vector<32x512xf32>
    %c2_78 = arith.constant 2 : index
    %c0_79 = arith.constant 0 : index
    %c0_80 = arith.constant 0 : index
    %165 = vector.load %arg5[%c2_78, %c0_79, %c0_80] : memref<4x32x1xf32, #tpu.memory_space<vmem>>, vector<1x32x1xf32>
    %166 = vector.shape_cast %165 : vector<1x32x1xf32> to vector<32x1xf32>
    %167 = vector.broadcast %166 : vector<32x1xf32> to vector<32x512xf32>
    %168 = arith.addf %164, %167 : vector<32x512xf32>
    %cst_81 = arith.constant 0.000000e+00 : f32
    %169 = vector.broadcast %cst_81 : f32 to vector<32x512xf32>
    %170 = arith.maximumf %168, %169 : vector<32x512xf32>
    %171 = vector.extract_strided_slice %170 {offsets = [0, 0], sizes = [32, 128], strides = [1, 1]} : vector<32x512xf32> to vector<32x128xf32>
    %cst_82 = arith.constant dense<0xFF800000> : vector<32xf32>
    %172 = vector.multi_reduction <maximumf>, %171, %cst_82 [1] : vector<32x128xf32> to vector<32xf32>
    %173 = vector.shape_cast %172 : vector<32xf32> to vector<32x1xf32>
    %174 = vector.extract_strided_slice %170 {offsets = [0, 128], sizes = [32, 128], strides = [1, 1]} : vector<32x512xf32> to vector<32x128xf32>
    %cst_83 = arith.constant dense<0xFF800000> : vector<32xf32>
    %175 = vector.multi_reduction <maximumf>, %174, %cst_83 [1] : vector<32x128xf32> to vector<32xf32>
    %176 = vector.shape_cast %175 : vector<32xf32> to vector<32x1xf32>
    %177 = vector.extract_strided_slice %170 {offsets = [0, 256], sizes = [32, 128], strides = [1, 1]} : vector<32x512xf32> to vector<32x128xf32>
    %cst_84 = arith.constant dense<0xFF800000> : vector<32xf32>
    %178 = vector.multi_reduction <maximumf>, %177, %cst_84 [1] : vector<32x128xf32> to vector<32xf32>
    %179 = vector.shape_cast %178 : vector<32xf32> to vector<32x1xf32>
    %180 = vector.extract_strided_slice %170 {offsets = [0, 384], sizes = [32, 128], strides = [1, 1]} : vector<32x512xf32> to vector<32x128xf32>
    %cst_85 = arith.constant dense<0xFF800000> : vector<32xf32>
    %181 = vector.multi_reduction <maximumf>, %180, %cst_85 [1] : vector<32x128xf32> to vector<32xf32>
    %182 = vector.shape_cast %181 : vector<32xf32> to vector<32x1xf32>
    %183 = tpu.concatenate %173, %176, %179, %182 in 1 : vector<32x1xf32>, vector<32x1xf32>, vector<32x1xf32>, vector<32x1xf32> -> vector<32x4xf32>
    %c2_86 = arith.constant 2 : index
    %c0_87 = arith.constant 0 : index
    %c0_88 = arith.constant 0 : index
    %184 = vector.load %arg6[%c2_86, %c0_87, %c0_88] : memref<4x32x32xbf16, #tpu.memory_space<vmem>>, vector<1x32x32xbf16>
    %185 = vector.shape_cast %184 : vector<1x32x32xbf16> to vector<32x32xbf16>
    %186 = arith.truncf %170 : vector<32x512xf32> to vector<32x512xbf16>
    %cst_89 = arith.constant dense<0.000000e+00> : vector<32x512xf32>
    %187 = tpu.matmul %185, %186, %cst_89 {dimension_numbers = #tpu.dot_dimension_numbers<[1], [0], [0], [1], [0, 0, 1, 1], [], []>} : vector<32x32xbf16>, vector<32x512xbf16>, vector<32x512xf32> -> vector<32x512xf32>
    %c2_90 = arith.constant 2 : index
    %c0_91 = arith.constant 0 : index
    %c0_92 = arith.constant 0 : index
    %188 = vector.load %arg8[%c2_90, %c0_91, %c0_92] : memref<4x32x1xf32, #tpu.memory_space<vmem>>, vector<1x32x1xf32>
    %189 = vector.shape_cast %188 : vector<1x32x1xf32> to vector<32x1xf32>
    %190 = vector.broadcast %189 : vector<32x1xf32> to vector<32x512xf32>
    %191 = arith.addf %187, %190 : vector<32x512xf32>
    %c2_93 = arith.constant 2 : index
    %c0_94 = arith.constant 0 : index
    %c0_95 = arith.constant 0 : index
    %192 = vector.load %arg7[%c2_93, %c0_94, %c0_95] : memref<4x32x32xbf16, #tpu.memory_space<vmem>>, vector<1x32x32xbf16>
    %193 = vector.shape_cast %192 : vector<1x32x32xbf16> to vector<32x32xbf16>
    %194 = arith.truncf %183 : vector<32x4xf32> to vector<32x4xbf16>
    %cst_96 = arith.constant dense<0.000000e+00> : vector<32x4xf32>
    %195 = tpu.matmul %193, %194, %cst_96 {dimension_numbers = #tpu.dot_dimension_numbers<[1], [0], [0], [1], [0, 0, 1, 1], [], []>} : vector<32x32xbf16>, vector<32x4xbf16>, vector<32x4xf32> -> vector<32x4xf32>
    %196 = vector.extract_strided_slice %191 {offsets = [0, 0], sizes = [32, 128], strides = [1, 1]} : vector<32x512xf32> to vector<32x128xf32>
    %197 = vector.extract_strided_slice %195 {offsets = [0, 0], sizes = [32, 1], strides = [1, 1]} : vector<32x4xf32> to vector<32x1xf32>
    %198 = vector.broadcast %197 : vector<32x1xf32> to vector<32x128xf32>
    %199 = arith.addf %196, %198 : vector<32x128xf32>
    %cst_97 = arith.constant 0.000000e+00 : f32
    %200 = vector.broadcast %cst_97 : f32 to vector<32x128xf32>
    %201 = arith.maximumf %199, %200 : vector<32x128xf32>
    %202 = vector.extract_strided_slice %191 {offsets = [0, 128], sizes = [32, 128], strides = [1, 1]} : vector<32x512xf32> to vector<32x128xf32>
    %203 = vector.extract_strided_slice %195 {offsets = [0, 1], sizes = [32, 1], strides = [1, 1]} : vector<32x4xf32> to vector<32x1xf32>
    %204 = vector.broadcast %203 : vector<32x1xf32> to vector<32x128xf32>
    %205 = arith.addf %202, %204 : vector<32x128xf32>
    %cst_98 = arith.constant 0.000000e+00 : f32
    %206 = vector.broadcast %cst_98 : f32 to vector<32x128xf32>
    %207 = arith.maximumf %205, %206 : vector<32x128xf32>
    %208 = vector.extract_strided_slice %191 {offsets = [0, 256], sizes = [32, 128], strides = [1, 1]} : vector<32x512xf32> to vector<32x128xf32>
    %209 = vector.extract_strided_slice %195 {offsets = [0, 2], sizes = [32, 1], strides = [1, 1]} : vector<32x4xf32> to vector<32x1xf32>
    %210 = vector.broadcast %209 : vector<32x1xf32> to vector<32x128xf32>
    %211 = arith.addf %208, %210 : vector<32x128xf32>
    %cst_99 = arith.constant 0.000000e+00 : f32
    %212 = vector.broadcast %cst_99 : f32 to vector<32x128xf32>
    %213 = arith.maximumf %211, %212 : vector<32x128xf32>
    %214 = vector.extract_strided_slice %191 {offsets = [0, 384], sizes = [32, 128], strides = [1, 1]} : vector<32x512xf32> to vector<32x128xf32>
    %215 = vector.extract_strided_slice %195 {offsets = [0, 3], sizes = [32, 1], strides = [1, 1]} : vector<32x4xf32> to vector<32x1xf32>
    %216 = vector.broadcast %215 : vector<32x1xf32> to vector<32x128xf32>
    %217 = arith.addf %214, %216 : vector<32x128xf32>
    %cst_100 = arith.constant 0.000000e+00 : f32
    %218 = vector.broadcast %cst_100 : f32 to vector<32x128xf32>
    %219 = arith.maximumf %217, %218 : vector<32x128xf32>
    %220 = tpu.concatenate %201, %207, %213, %219 in 1 : vector<32x128xf32>, vector<32x128xf32>, vector<32x128xf32>, vector<32x128xf32> -> vector<32x512xf32>
    %c2_101 = arith.constant 2 : index
    %c0_102 = arith.constant 0 : index
    %c0_103 = arith.constant 0 : index
    %221 = vector.load %arg9[%c2_101, %c0_102, %c0_103] : memref<4x32x32xbf16, #tpu.memory_space<vmem>>, vector<1x32x32xbf16>
    %222 = vector.shape_cast %221 : vector<1x32x32xbf16> to vector<32x32xbf16>
    %223 = arith.truncf %220 : vector<32x512xf32> to vector<32x512xbf16>
    %cst_104 = arith.constant dense<0.000000e+00> : vector<32x512xf32>
    %224 = tpu.matmul %222, %223, %cst_104 {dimension_numbers = #tpu.dot_dimension_numbers<[1], [0], [0], [1], [0, 0, 1, 1], [], []>} : vector<32x32xbf16>, vector<32x512xbf16>, vector<32x512xf32> -> vector<32x512xf32>
    %225 = arith.addf %160, %224 : vector<32x512xf32>
    %c3_105 = arith.constant 3 : index
    %c0_106 = arith.constant 0 : index
    %c0_107 = arith.constant 0 : index
    %226 = vector.load %arg4[%c3_105, %c0_106, %c0_107] : memref<4x32x32xbf16, #tpu.memory_space<vmem>>, vector<1x32x32xbf16>
    %227 = vector.shape_cast %226 : vector<1x32x32xbf16> to vector<32x32xbf16>
    %228 = arith.truncf %220 : vector<32x512xf32> to vector<32x512xbf16>
    %cst_108 = arith.constant dense<0.000000e+00> : vector<32x512xf32>
    %229 = tpu.matmul %227, %228, %cst_108 {dimension_numbers = #tpu.dot_dimension_numbers<[1], [0], [0], [1], [0, 0, 1, 1], [], []>} : vector<32x32xbf16>, vector<32x512xbf16>, vector<32x512xf32> -> vector<32x512xf32>
    %c3_109 = arith.constant 3 : index
    %c0_110 = arith.constant 0 : index
    %c0_111 = arith.constant 0 : index
    %230 = vector.load %arg5[%c3_109, %c0_110, %c0_111] : memref<4x32x1xf32, #tpu.memory_space<vmem>>, vector<1x32x1xf32>
    %231 = vector.shape_cast %230 : vector<1x32x1xf32> to vector<32x1xf32>
    %232 = vector.broadcast %231 : vector<32x1xf32> to vector<32x512xf32>
    %233 = arith.addf %229, %232 : vector<32x512xf32>
    %cst_112 = arith.constant 0.000000e+00 : f32
    %234 = vector.broadcast %cst_112 : f32 to vector<32x512xf32>
    %235 = arith.maximumf %233, %234 : vector<32x512xf32>
    %236 = vector.extract_strided_slice %235 {offsets = [0, 0], sizes = [32, 128], strides = [1, 1]} : vector<32x512xf32> to vector<32x128xf32>
    %cst_113 = arith.constant dense<0xFF800000> : vector<32xf32>
    %237 = vector.multi_reduction <maximumf>, %236, %cst_113 [1] : vector<32x128xf32> to vector<32xf32>
    %238 = vector.shape_cast %237 : vector<32xf32> to vector<32x1xf32>
    %239 = vector.extract_strided_slice %235 {offsets = [0, 128], sizes = [32, 128], strides = [1, 1]} : vector<32x512xf32> to vector<32x128xf32>
    %cst_114 = arith.constant dense<0xFF800000> : vector<32xf32>
    %240 = vector.multi_reduction <maximumf>, %239, %cst_114 [1] : vector<32x128xf32> to vector<32xf32>
    %241 = vector.shape_cast %240 : vector<32xf32> to vector<32x1xf32>
    %242 = vector.extract_strided_slice %235 {offsets = [0, 256], sizes = [32, 128], strides = [1, 1]} : vector<32x512xf32> to vector<32x128xf32>
    %cst_115 = arith.constant dense<0xFF800000> : vector<32xf32>
    %243 = vector.multi_reduction <maximumf>, %242, %cst_115 [1] : vector<32x128xf32> to vector<32xf32>
    %244 = vector.shape_cast %243 : vector<32xf32> to vector<32x1xf32>
    %245 = vector.extract_strided_slice %235 {offsets = [0, 384], sizes = [32, 128], strides = [1, 1]} : vector<32x512xf32> to vector<32x128xf32>
    %cst_116 = arith.constant dense<0xFF800000> : vector<32xf32>
    %246 = vector.multi_reduction <maximumf>, %245, %cst_116 [1] : vector<32x128xf32> to vector<32xf32>
    %247 = vector.shape_cast %246 : vector<32xf32> to vector<32x1xf32>
    %248 = tpu.concatenate %238, %241, %244, %247 in 1 : vector<32x1xf32>, vector<32x1xf32>, vector<32x1xf32>, vector<32x1xf32> -> vector<32x4xf32>
    %c3_117 = arith.constant 3 : index
    %c0_118 = arith.constant 0 : index
    %c0_119 = arith.constant 0 : index
    %249 = vector.load %arg6[%c3_117, %c0_118, %c0_119] : memref<4x32x32xbf16, #tpu.memory_space<vmem>>, vector<1x32x32xbf16>
    %250 = vector.shape_cast %249 : vector<1x32x32xbf16> to vector<32x32xbf16>
    %251 = arith.truncf %235 : vector<32x512xf32> to vector<32x512xbf16>
    %cst_120 = arith.constant dense<0.000000e+00> : vector<32x512xf32>
    %252 = tpu.matmul %250, %251, %cst_120 {dimension_numbers = #tpu.dot_dimension_numbers<[1], [0], [0], [1], [0, 0, 1, 1], [], []>} : vector<32x32xbf16>, vector<32x512xbf16>, vector<32x512xf32> -> vector<32x512xf32>
    %c3_121 = arith.constant 3 : index
    %c0_122 = arith.constant 0 : index
    %c0_123 = arith.constant 0 : index
    %253 = vector.load %arg8[%c3_121, %c0_122, %c0_123] : memref<4x32x1xf32, #tpu.memory_space<vmem>>, vector<1x32x1xf32>
    %254 = vector.shape_cast %253 : vector<1x32x1xf32> to vector<32x1xf32>
    %255 = vector.broadcast %254 : vector<32x1xf32> to vector<32x512xf32>
    %256 = arith.addf %252, %255 : vector<32x512xf32>
    %c3_124 = arith.constant 3 : index
    %c0_125 = arith.constant 0 : index
    %c0_126 = arith.constant 0 : index
    %257 = vector.load %arg7[%c3_124, %c0_125, %c0_126] : memref<4x32x32xbf16, #tpu.memory_space<vmem>>, vector<1x32x32xbf16>
    %258 = vector.shape_cast %257 : vector<1x32x32xbf16> to vector<32x32xbf16>
    %259 = arith.truncf %248 : vector<32x4xf32> to vector<32x4xbf16>
    %cst_127 = arith.constant dense<0.000000e+00> : vector<32x4xf32>
    %260 = tpu.matmul %258, %259, %cst_127 {dimension_numbers = #tpu.dot_dimension_numbers<[1], [0], [0], [1], [0, 0, 1, 1], [], []>} : vector<32x32xbf16>, vector<32x4xbf16>, vector<32x4xf32> -> vector<32x4xf32>
    %261 = vector.extract_strided_slice %256 {offsets = [0, 0], sizes = [32, 128], strides = [1, 1]} : vector<32x512xf32> to vector<32x128xf32>
    %262 = vector.extract_strided_slice %260 {offsets = [0, 0], sizes = [32, 1], strides = [1, 1]} : vector<32x4xf32> to vector<32x1xf32>
    %263 = vector.broadcast %262 : vector<32x1xf32> to vector<32x128xf32>
    %264 = arith.addf %261, %263 : vector<32x128xf32>
    %cst_128 = arith.constant 0.000000e+00 : f32
    %265 = vector.broadcast %cst_128 : f32 to vector<32x128xf32>
    %266 = arith.maximumf %264, %265 : vector<32x128xf32>
    %267 = vector.extract_strided_slice %256 {offsets = [0, 128], sizes = [32, 128], strides = [1, 1]} : vector<32x512xf32> to vector<32x128xf32>
    %268 = vector.extract_strided_slice %260 {offsets = [0, 1], sizes = [32, 1], strides = [1, 1]} : vector<32x4xf32> to vector<32x1xf32>
    %269 = vector.broadcast %268 : vector<32x1xf32> to vector<32x128xf32>
    %270 = arith.addf %267, %269 : vector<32x128xf32>
    %cst_129 = arith.constant 0.000000e+00 : f32
    %271 = vector.broadcast %cst_129 : f32 to vector<32x128xf32>
    %272 = arith.maximumf %270, %271 : vector<32x128xf32>
    %273 = vector.extract_strided_slice %256 {offsets = [0, 256], sizes = [32, 128], strides = [1, 1]} : vector<32x512xf32> to vector<32x128xf32>
    %274 = vector.extract_strided_slice %260 {offsets = [0, 2], sizes = [32, 1], strides = [1, 1]} : vector<32x4xf32> to vector<32x1xf32>
    %275 = vector.broadcast %274 : vector<32x1xf32> to vector<32x128xf32>
    %276 = arith.addf %273, %275 : vector<32x128xf32>
    %cst_130 = arith.constant 0.000000e+00 : f32
    %277 = vector.broadcast %cst_130 : f32 to vector<32x128xf32>
    %278 = arith.maximumf %276, %277 : vector<32x128xf32>
    %279 = vector.extract_strided_slice %256 {offsets = [0, 384], sizes = [32, 128], strides = [1, 1]} : vector<32x512xf32> to vector<32x128xf32>
    %280 = vector.extract_strided_slice %260 {offsets = [0, 3], sizes = [32, 1], strides = [1, 1]} : vector<32x4xf32> to vector<32x1xf32>
    %281 = vector.broadcast %280 : vector<32x1xf32> to vector<32x128xf32>
    %282 = arith.addf %279, %281 : vector<32x128xf32>
    %cst_131 = arith.constant 0.000000e+00 : f32
    %283 = vector.broadcast %cst_131 : f32 to vector<32x128xf32>
    %284 = arith.maximumf %282, %283 : vector<32x128xf32>
    %285 = tpu.concatenate %266, %272, %278, %284 in 1 : vector<32x128xf32>, vector<32x128xf32>, vector<32x128xf32>, vector<32x128xf32> -> vector<32x512xf32>
    %c3_132 = arith.constant 3 : index
    %c0_133 = arith.constant 0 : index
    %c0_134 = arith.constant 0 : index
    %286 = vector.load %arg9[%c3_132, %c0_133, %c0_134] : memref<4x32x32xbf16, #tpu.memory_space<vmem>>, vector<1x32x32xbf16>
    %287 = vector.shape_cast %286 : vector<1x32x32xbf16> to vector<32x32xbf16>
    %288 = arith.truncf %285 : vector<32x512xf32> to vector<32x512xbf16>
    %cst_135 = arith.constant dense<0.000000e+00> : vector<32x512xf32>
    %289 = tpu.matmul %287, %288, %cst_135 {dimension_numbers = #tpu.dot_dimension_numbers<[1], [0], [0], [1], [0, 0, 1, 1], [], []>} : vector<32x32xbf16>, vector<32x512xbf16>, vector<32x512xf32> -> vector<32x512xf32>
    %290 = arith.addf %225, %289 : vector<32x512xf32>
    %291 = vector.extract_strided_slice %290 {offsets = [0, 0], sizes = [32, 128], strides = [1, 1]} : vector<32x512xf32> to vector<32x128xf32>
    %cst_136 = arith.constant dense<0xFF800000> : vector<32xf32>
    %292 = vector.multi_reduction <maximumf>, %291, %cst_136 [1] : vector<32x128xf32> to vector<32xf32>
    %293 = vector.shape_cast %292 : vector<32xf32> to vector<32x1xf32>
    %294 = vector.extract_strided_slice %290 {offsets = [0, 128], sizes = [32, 128], strides = [1, 1]} : vector<32x512xf32> to vector<32x128xf32>
    %cst_137 = arith.constant dense<0xFF800000> : vector<32xf32>
    %295 = vector.multi_reduction <maximumf>, %294, %cst_137 [1] : vector<32x128xf32> to vector<32xf32>
    %296 = vector.shape_cast %295 : vector<32xf32> to vector<32x1xf32>
    %297 = vector.extract_strided_slice %290 {offsets = [0, 256], sizes = [32, 128], strides = [1, 1]} : vector<32x512xf32> to vector<32x128xf32>
    %cst_138 = arith.constant dense<0xFF800000> : vector<32xf32>
    %298 = vector.multi_reduction <maximumf>, %297, %cst_138 [1] : vector<32x128xf32> to vector<32xf32>
    %299 = vector.shape_cast %298 : vector<32xf32> to vector<32x1xf32>
    %300 = vector.extract_strided_slice %290 {offsets = [0, 384], sizes = [32, 128], strides = [1, 1]} : vector<32x512xf32> to vector<32x128xf32>
    %cst_139 = arith.constant dense<0xFF800000> : vector<32xf32>
    %301 = vector.multi_reduction <maximumf>, %300, %cst_139 [1] : vector<32x128xf32> to vector<32xf32>
    %302 = vector.shape_cast %301 : vector<32xf32> to vector<32x1xf32>
    %303 = tpu.concatenate %293, %296, %299, %302 in 1 : vector<32x1xf32>, vector<32x1xf32>, vector<32x1xf32>, vector<32x1xf32> -> vector<32x4xf32>
    %c0_140 = arith.constant 0 : index
    %c0_141 = arith.constant 0 : index
    %304 = vector.load %arg10[%c0_140, %c0_141] : memref<32x1xf32, #tpu.memory_space<vmem>>, vector<32x1xf32>
    %305 = vector.broadcast %304 : vector<32x1xf32> to vector<32x4xf32>
    %306 = arith.addf %303, %305 : vector<32x4xf32>
    %c0_142 = arith.constant 0 : index
    %c0_143 = arith.constant 0 : index
    %c0_144 = arith.constant 0 : index
    %307 = vector.load %arg11[%c0_142, %c0_143, %c0_144] : memref<1x32x4xf32, #tpu.memory_space<vmem>>, vector<1x32x4xf32>
    %308 = vector.shape_cast %307 : vector<1x32x4xf32> to vector<32x4xf32>
    %309 = vector.shape_cast %306 : vector<32x4xf32> to vector<1x32x4xf32>
    tpu.vector_store %arg11[%c0_142, %c0_143, %c0_144], %309 {strides = array<i32>} : memref<1x32x4xf32, #tpu.memory_space<vmem>>, vector<1x32x4xf32>,
    return
  }
  func.func @transform_0(%arg0: i32) -> (i32, i32, i32) {
    %c0_i32 = arith.constant 0 : i32
    %c0_i32_0 = arith.constant 0 : i32
    %c0_i32_1 = arith.constant 0 : i32
    return %arg0, %c0_i32, %c0_i32_0 : i32, i32, i32
  }
  func.func @transform_1(%arg0: i32) -> (i32, i32) {
    %c0_i32 = arith.constant 0 : i32
    %c0_i32_0 = arith.constant 0 : i32
    %c0_i32_1 = arith.constant 0 : i32
    return %c0_i32, %c0_i32_0 : i32, i32
  }
  func.func @transform_2(%arg0: i32) -> (i32, i32) {
    %c0_i32 = arith.constant 0 : i32
    %c0_i32_0 = arith.constant 0 : i32
    %c0_i32_1 = arith.constant 0 : i32
    return %c0_i32, %c0_i32_0 : i32, i32
  }
  func.func @transform_3(%arg0: i32) -> (i32, i32, i32) {
    %c0_i32 = arith.constant 0 : i32
    %c0_i32_0 = arith.constant 0 : i32
    %c0_i32_1 = arith.constant 0 : i32
    %c0_i32_2 = arith.constant 0 : i32
    return %c0_i32, %c0_i32_0, %c0_i32_1 : i32, i32, i32
  }
  func.func @transform_4(%arg0: i32) -> (i32, i32, i32) {
    %c0_i32 = arith.constant 0 : i32
    %c0_i32_0 = arith.constant 0 : i32
    %c0_i32_1 = arith.constant 0 : i32
    %c0_i32_2 = arith.constant 0 : i32
    return %c0_i32, %c0_i32_0, %c0_i32_1 : i32, i32, i32
  }
  func.func @transform_5(%arg0: i32) -> (i32, i32, i32) {
    %c0_i32 = arith.constant 0 : i32
    %c0_i32_0 = arith.constant 0 : i32
    %c0_i32_1 = arith.constant 0 : i32
    %c0_i32_2 = arith.constant 0 : i32
    return %c0_i32, %c0_i32_0, %c0_i32_1 : i32, i32, i32
  }
  func.func @transform_6(%arg0: i32) -> (i32, i32, i32) {
    %c0_i32 = arith.constant 0 : i32
    %c0_i32_0 = arith.constant 0 : i32
    %c0_i32_1 = arith.constant 0 : i32
    %c0_i32_2 = arith.constant 0 : i32
    return %c0_i32, %c0_i32_0, %c0_i32_1 : i32, i32, i32
  }
  func.func @transform_7(%arg0: i32) -> (i32, i32, i32) {
    %c0_i32 = arith.constant 0 : i32
    %c0_i32_0 = arith.constant 0 : i32
    %c0_i32_1 = arith.constant 0 : i32
    %c0_i32_2 = arith.constant 0 : i32
    return %c0_i32, %c0_i32_0, %c0_i32_1 : i32, i32, i32
  }
  func.func @transform_8(%arg0: i32) -> (i32, i32, i32) {
    %c0_i32 = arith.constant 0 : i32
    %c0_i32_0 = arith.constant 0 : i32
    %c0_i32_1 = arith.constant 0 : i32
    %c0_i32_2 = arith.constant 0 : i32
    return %c0_i32, %c0_i32_0, %c0_i32_1 : i32, i32, i32
  }
  func.func @transform_9(%arg0: i32) -> (i32, i32) {
    %c0_i32 = arith.constant 0 : i32
    %c0_i32_0 = arith.constant 0 : i32
    %c0_i32_1 = arith.constant 0 : i32
    return %c0_i32, %c0_i32_0 : i32, i32
  }
  func.func @transform_10(%arg0: i32) -> (i32, i32, i32) {
    %c0_i32 = arith.constant 0 : i32
    %c0_i32_0 = arith.constant 0 : i32
    %c0_i32_1 = arith.constant 0 : i32
    return %arg0, %c0_i32, %c0_i32_0 : i32, i32, i32
  }
}

</mosaic_0001>

<bundles_post_ra>
// kernel: idp3_forward.1
= control target key start
LH: loop header
LB: loop body
LE: loop exit
PB: predicated region body
PF: predicated region fallthrough
CT: control target
= control target key end

     0   :  { %s3948_s13 = smov 0   ;;  %s4802_s0 = inlined_call_operand.vmem [shape: f32[8,3,128], index: 0, kind: input, shape index: {}]   ;;  %s4803_s1 = inlined_call_operand.vmem [shape: f32[32,3], index: 1, kind: input, shape index: {}]   ;;  %s4804_s2 = inlined_call_operand.vmem [shape: f32[32,1], index: 2, kind: input, shape index: {}]   ;;  %s4805_s3 = inlined_call_operand.vmem [shape: bf16[4,32,32], index: 3, kind: input, shape index: {}]   ;;  %s4806_s4 = inlined_call_operand.vmem [shape: f32[4,32,1], index: 4, kind: input, shape index: {}]   ;;  %s4807_s5 = inlined_call_operand.vmem [shape: bf16[4,32,32], index: 5, kind: input, shape index: {}]   ;;  %s4808_s6 = inlined_call_operand.vmem [shape: bf16[4,32,32], index: 6, kind: input, shape index: {}]   ;;  %s4809_s7 = inlined_call_operand.vmem [shape: f32[4,32,1], index: 7, kind: input, shape index: {}]   ;;  %s4810_s8 = inlined_call_operand.vmem [shape: bf16[4,32,32], index: 8, kind: input, shape index: {}]   ;;  %s4811_s9 = inlined_call_operand.vmem [shape: f32[32,1], index: 9, kind: input, shape index: {}]   ;;  %s4812_s10 = inlined_call_operand.vmem [shape: f32[2,32,4], index: 10, kind: output, shape index: {}]  }
   0x1 LB: > { %s3954_s14 = sadd.s32 4294967295, %s3887_s13   ;;  %p3500_p0 = scmp.ge.s32.totalorder %s3887_s13, 1  ;;  %s3887_s13 = sphi %s3948_s13, %s20_s13  }
   0x2   : > { %p313_p1 = scmp.lt.s32.totalorder %s3887_s13, 3 }
   0x4   : > { %p314_p2 = pnand %p3500_p0, %p313_p1 }
   0x5   : > { %v370_v0 = vld [vmem:[%s4803_s1] sm:$0xff] (!%p314_p2)  ;;  %v3889_v1 = vmov (!%p314_p2), 2   ;;  %v3890_v2 = vmov (!%p314_p2), 1   ;;  %v372_v3 = vld [vmem:[%s4803_s1 + $0x10] sm:$0xff] (!%p314_p2)  ;;  %v371_v4 = vld [vmem:[%s4803_s1 + $0x8] sm:$0xff] (!%p314_p2)  ;;  %v3891_v5 = vmov (!%p314_p2), 0   ;;  %v394_v15 = vlaneseq (!%p314_p2) }
   0x6   : > { %317 = sbr.rel (%p314_p2) target bundleno = 3841 (0xf01), region = 60  ;;  %3780 = vset.pattern.permute.xlu0 (!%p314_p2), %v3889_v1  ;;  %3779 = vset.pattern.permute.xlu1 (!%p314_p2), %v3890_v2  ;;  %v373_v6 = vld [vmem:[%s4803_s1 + $0x18] sm:$0xff] (!%p314_p2)  ;;  %v555_v7 = vld [vmem:[%s4804_s2 + $0x8] sm:$0xff] (!%p314_p2)  ;;  %v622_v8 = vld [vmem:[%s4806_s4] sm:$0xff] (!%p314_p2)  ;;  %s3501_s21 = sshll.u32 (!%p314_p2), %s3954_s14, 2  ;;  %vm656_vm0 = vcmask (!%p314_p2), 261120  }
   0x7   : > { %491 = vperm.xlu0 (!%p314_p2), %3780, %v370_v0   ;;  %427 = vperm.xlu1 (!%p314_p2), %3779, %v370_v0   ;;  %v624_v9 = vld [vmem:[%s4806_s4 + $0x10] sm:$0xff] (!%p314_p2)  ;;  %v554_v10 = vld [vmem:[%s4804_s2] sm:$0xff] (!%p314_p2)  ;;  %v557_v12 = vld [vmem:[%s4804_s2 + $0x18] sm:$0xff] (!%p314_p2)  ;;  %p352_p3 = scmp.lt.s32.totalorder (!%p314_p2), %s3501_s21, 7  ;;  %v395_v18 = vshrl.u32 (!%p314_p2), %v394_v15, 7  ;;  %vm817_vm1 = vcmask (!%p314_p2), 7168  }
   0x8   : > { %695 = vmatprep.mubr.bf16.mxu0 (!%p314_p2), %v3891_v5  ;;  %748 = vmatprep.mubr.bf16.mxu1 (!%p314_p2), %v3891_v5  ;;  %v556_v11 = vld [vmem:[%s4804_s2 + $0x10] sm:$0xff] (!%p314_p2)  ;;  %v623_v13 = vld [vmem:[%s4806_s4 + $0x8] sm:$0xff] (!%p314_p2)  ;;  %v625_v14 = vld [vmem:[%s4806_s4 + $0x18] sm:$0xff] (!%p314_p2)  ;;  %vm822_vm2 = vcmask (!%p314_p2), 15360   ;;  %vm827_vm3 = vcmask (!%p314_p2), 23552   ;;  %p357_p4 = scmp.lt.s32.totalorder (!%p314_p2), %s3954_s14, 1 }
   0x9   : > { %v444_v21 = vsub.s32 (!%p314_p2), 1, %v395_v18  ;;  %v396_v23 = vsub.s32 (!%p314_p2), 0, %v395_v18  ;;  %v508_v26 = vsub.s32 (!%p314_p2), 2, %v395_v18  ;;  %vm3436_vm4 = vcmask (!%p314_p2), 31744  }
   0xb   : > { %499 = vperm.xlu0 (!%p314_p2), %3780, %v372_v3   ;;  %431 = vperm.xlu1 (!%p314_p2), %3779, %v371_v4  }
   0xd   : > { %s4814_s21 = smov (!%p352_p3, %s3501_s21), 7  ;;  %s4816_s14 = smov (!%p357_p4, %s3954_s14), 1 }
   0xe   : > { %s3502_s22 = sshll.u32 %s4814_s21, 2  ;;  %s3670_s28 = sshll.u32 %s4816_s14, 5 }
   0xf   : > { %3784 = vset.pattern.permute.xlu0 %v3891_v5  ;;  %3781 = vset.pattern.permute.xlu1 %v3889_v1  ;;  %s355_s25 = scalar_lea.vmem %s4802_s0, %s3502_s22  ;;  %s361_s11 = scalar_lea.vmem %s4812_s10, %s3670_s28 }
  0x10   : > { %376 = vperm.xlu0 %3784, %v370_v0   ;;  %495 = vperm.xlu1 %3781, %v371_v4   ;;  %v363_v22 = vld [vmem:[%s355_s25] sm:$0x7]  ;;  %v3506_v24 = vld [vmem:[%s355_s25 + $0x8] sm:$0x7]  ;;  %v3505_v25 = vld [vmem:[%s355_s25 + $0x4] sm:$0x7] }
  0x11   : > { %v3507_v27 = vld [vmem:[%s355_s25 + $0xc] sm:$0x7]  ;;  %v4008_v30 = vrot.slane %v363_v22, %v444_v21  ;;  %v4010_v31 = vrot.slane %v3506_v24, %v444_v21  ;;  %v4012_v32 = vrot.slane %v3505_v25, %v396_v23  ;;  %v4014_v33 = vrot.slane %v3505_v25, %v444_v21 }
  0x12   : > { %v4016_v34 = vrot.slane %v3507_v27, %v444_v21  ;;  %v4018_v35 = vrot.slane %v363_v22, %v508_v26  ;;  %v4020_v36 = vrot.slane %v3505_v25, %v508_v26  ;;  %v4022_v37 = vrot.slane %v3506_v24, %v508_v26 }
  0x13   : > { %v4024_v39 = vrot.slane %v3507_v27, %v396_v23  ;;  %v4027_v41 = vrot.slane %v3507_v27, %v508_v26  ;;  %v4029_v42 = vrot.slane %v363_v22, %v396_v23  ;;  %v4031_v43 = vrot.slane %v3506_v24, %v396_v23 }
  0x14   : > { %381 = vperm.xlu0 %3784, %v371_v4   ;;  %3782 = vset.pattern.permute.xlu1 %v3891_v5 }
  0x15   : > { %386 = vperm.xlu1 %3782, %v372_v3  }
  0x18   : > { %391 = vperm.xlu0 %3784, %v373_v6  }
  0x19   : > { %3783 = vset.pattern.permute.xlu1 %v3890_v2 }
  0x1a   : > { %435 = vperm.xlu1 %3783, %v372_v3  }
  0x1c   : > { %565 = vperm.xlu0 %3784, %v555_v7  }
  0x1e   : > { %439 = vperm.xlu1 %3783, %v373_v6  }
  0x20   : > { %628 = vperm.xlu0 %3784, %v622_v8  }
  0x22   : > { %3785 = vset.pattern.permute.xlu1 %v3889_v1 }
  0x23   : > { %503 = vperm.xlu1 %3785, %v373_v6  }
  0x24   : > { %638 = vperm.xlu0 %3784, %v624_v9  }
  0x27   : > { %3786 = vset.pattern.permute.xlu1 %v3891_v5 }
  0x28   : > { %560 = vperm.xlu1 %3786, %v554_v10  }
  0x2c   : > { %570 = vperm.xlu1 %3786, %v556_v11  }
  0x30   : > { %575 = vperm.xlu1 %3786, %v557_v12  }
  0x34   : > { %633 = vperm.xlu1 %3786, %v623_v13  }
  0x38   : > { %643 = vperm.xlu1 %3786, %v625_v14  }
  0x86   : > { %v428_v16 = vpop.permute.xlu1 %427  ;;  %v492_v17 = vpop.permute.xlu0 %491 }
  0x87   : > { %v458_v40 = vmul.f32 %v4008_v30, %v428_v16  ;;  %v460_v45 = vmul.f32 %v4010_v31, %v428_v16  ;;  %v459_v47 = vmul.f32 %v4014_v33, %v428_v16  ;;  %v523_v48 = vmul.f32 %v4020_v36, %v492_v17 }
  0x88   : > { %v461_v49 = vmul.f32 %v4016_v34, %v428_v16  ;;  %v525_v50 = vmul.f32 %v4027_v41, %v492_v17  ;;  %v522_v51 = vmul.f32 %v4018_v35, %v492_v17  ;;  %v524_v52 = vmul.f32 %v4022_v37, %v492_v17 }
  0x8a   : > { %v432_v19 = vpop.permute.xlu1 %431  ;;  %v500_v20 = vpop.permute.xlu0 %499 }
  0x8b   : > { %v462_v53 = vmul.f32 %v4008_v30, %v432_v19  ;;  %v464_v54 = vmul.f32 %v4010_v31, %v432_v19  ;;  %v4046_v57 = vmul.f32 %v4018_v35, %v500_v20  ;;  %v463_v3 = vmul.f32 %v4014_v33, %v432_v19 }
  0x8c   : > { %v531_v6 = vmul.f32 %v4020_v36, %v500_v20  ;;  %v4056_v7 = vmul.f32 %v4022_v37, %v500_v20  ;;  %v533_v8 = vmul.f32 %v4027_v41, %v500_v20  ;;  %v465_v9 = vmul.f32 %v4016_v34, %v432_v19 }
  0x8f   : > { %v377_v28 = vpop.permute.xlu0 %376  ;;  %v496_v29 = vpop.permute.xlu1 %495 }
  0x90   : > { %v411_v46 = vmul.f32 %v4012_v32, %v377_v28  ;;  %v413_v56 = vmul.f32 %v4024_v39, %v377_v28  ;;  %v410_v62 = vmul.f32 %v4029_v42, %v377_v28  ;;  %v412_v63 = vmul.f32 %v4031_v43, %v377_v28 }
  0x91   : > { %v527_v11 = vmul.f32 %v4020_v36, %v496_v29  ;;  %v529_v13 = vmul.f32 %v4027_v41, %v496_v29  ;;  %v526_v16 = vmul.f32 %v4018_v35, %v496_v29  ;;  %v528_v24 = vmul.f32 %v4022_v37, %v496_v29 }
  0x92   : > { %v475_v4 = vadd.f32 %v459_v47, %v411_v46  ;;  %v477_v12 = vadd.f32 %v461_v49, %v413_v56  ;;  %v474_v22 = vadd.f32 %v458_v40, %v410_v62  ;;  %v476_v23 = vadd.f32 %v460_v45, %v412_v63 }
  0x93   : > { %v382_v38 = vpop.permute.xlu0 %381 }
  0x94   : > { %v387_v44 = vpop.permute.xlu1 %386  ;;  %v415_v55 = vmul.f32 %v4012_v32, %v382_v38  ;;  %v414_v58 = vmul.f32 %v4029_v42, %v382_v38  ;;  %v416_v59 = vmul.f32 %v4031_v43, %v382_v38  ;;  %v417_v61 = vmul.f32 %v4024_v39, %v382_v38 }
  0x95   : > { %v539_v21 = vadd.f32 %v523_v48, %v475_v4  ;;  %v418_v20 = vmul.f32 %v4029_v42, %v387_v44  ;;  %v419_v19 = vmul.f32 %v4012_v32, %v387_v44  ;;  %v420_v25 = vmul.f32 %v4031_v43, %v387_v44 }
  0x96   : > { %v479_v10 = vadd.f32 %v463_v3, %v415_v55  ;;  %v481_v14 = vadd.f32 %v465_v9, %v417_v61  ;;  %v478_v15 = vadd.f32 %v462_v53, %v414_v58  ;;  %v480_v17 = vadd.f32 %v464_v54, %v416_v59 }
  0x97   : > { %v392_v60 = vpop.permute.xlu0 %391  ;;  %v421_v26 = vmul.f32 %v4024_v39, %v387_v44  ;;  %v541_v47 = vadd.f32 %v525_v50, %v477_v12  ;;  %v538_v55 = vadd.f32 %v522_v51, %v474_v22  ;;  %v540_v9 = vadd.f32 %v524_v52, %v476_v23 }
  0x98   : > { %v543_v46 = vadd.f32 %v527_v11, %v479_v10  ;;  %v545_v45 = vadd.f32 %v529_v13, %v481_v14  ;;  %v542_v48 = vadd.f32 %v526_v16, %v478_v15  ;;  %v544_v29 = vadd.f32 %v528_v24, %v480_v17 }
  0x99   : > { %v436_v0 = vpop.permute.xlu1 %435  ;;  %v423_v49 = vmul.f32 %v4012_v32, %v392_v60  ;;  %v425_v62 = vmul.f32 %v4024_v39, %v392_v60  ;;  %v422_v4 = vmul.f32 %v4029_v42, %v392_v60  ;;  %v424_v32 = vmul.f32 %v4031_v43, %v392_v60 }
  0x9a   : > { %v467_v28 = vmul.f32 %v4014_v33, %v436_v0  ;;  %v469_v38 = vmul.f32 %v4016_v34, %v436_v0  ;;  %v466_v40 = vmul.f32 %v4008_v30, %v436_v0  ;;  %v468_v53 = vmul.f32 %v4010_v31, %v436_v0 }
  0x9b   : > { %v566_v27 = vpop.permute.xlu0 %565 }
  0x9c   : > { %v583_v54 = vadd.f32 %v566_v27, %v543_v46  ;;  %v585_v58 = vadd.f32 %v566_v27, %v545_v45  ;;  %v582_v59 = vadd.f32 %v566_v27, %v542_v48  ;;  %v584_v61 = vadd.f32 %v566_v27, %v544_v29 }
  0x9d   : > { %v440_v18 = vpop.permute.xlu1 %439  ;;  %v483_v63 = vadd.f32 %v467_v28, %v419_v19  ;;  %v485_v3 = vadd.f32 %v469_v38, %v421_v26  ;;  %v482_v0 = vadd.f32 %v466_v40, %v418_v20  ;;  %v484_v11 = vadd.f32 %v468_v53, %v420_v25 }
  0x9e   : > { %v471_v44 = vmul.f32 %v4014_v33, %v440_v18  ;;  %v473_v50 = vmul.f32 %v4016_v34, %v440_v18  ;;  %v470_v51 = vmul.f32 %v4008_v30, %v440_v18  ;;  %v472_v33 = vmul.f32 %v4010_v31, %v440_v18 }
  0x9f   : > { %v599_v10 = vmax.f32 %v583_v54, 0.0  ;;  %v601_v12 = vmax.f32 %v585_v58, 0.0  ;;  %v598_v13 = vmax.f32 %v582_v59, 0.0  ;;  %v600_v14 = vmax.f32 %v584_v61, 0.0 }
  0xa0   : > { %v487_v39 = vadd.f32 %v471_v44, %v423_v49  ;;  %v547_v16 = vadd.f32 %v531_v6, %v483_v63  ;;  %v489_v17 = vadd.f32 %v473_v50, %v425_v62  ;;  %v549_v42 = vadd.f32 %v533_v8, %v485_v3 }
  0xa1   : > { %v486_v23 = vadd.f32 %v470_v51, %v422_v4  ;;  %v546_v6 = vadd.f32 %v4046_v57, %v482_v0  ;;  %v488_v8 = vadd.f32 %v472_v33, %v424_v32  ;;  %v3849_v32 = vld [vmem:[%s4805_s3] sm:$0xff]   ;;  %v629_v0 = vpop.permute.xlu0 %628 }
  0xa2   : > { %v504_v56 = vpop.permute.xlu1 %503 }
  0xa3   : > { %v535_v34 = vmul.f32 %v4020_v36, %v504_v56  ;;  %v534_v30 = vmul.f32 %v4018_v35, %v504_v56  ;;  %v536_v31 = vmul.f32 %v4022_v37, %v504_v56  ;;  %v537_v18 = vmul.f32 %v4027_v41, %v504_v56 }
  0xa5   : > { %v551_v26 = vadd.f32 %v535_v34, %v487_v39  ;;  %v553_v40 = vadd.f32 %v537_v18, %v489_v17  ;;  %v550_v45 = vadd.f32 %v534_v30, %v486_v23  ;;  %v552_v48 = vadd.f32 %v536_v31, %v488_v8 }
  0xa7   : > { %v561_v15 = vpop.permute.xlu1 %560 }
  0xa8   : > { %v579_v22 = vadd.f32 %v561_v15, %v539_v21  ;;  %v581_v43 = vadd.f32 %v561_v15, %v541_v47  ;;  %v578_v52 = vadd.f32 %v561_v15, %v538_v55  ;;  %v580_v60 = vadd.f32 %v561_v15, %v540_v9  ;;  %v3850_v9 = vld [vmem:[%s4805_s3 + $0x8] sm:$0xff]  }
  0xa9   : > { %v548_v21 = vadd.f32 %v4056_v7, %v484_v11 }
  0xaa   : > { %v595_v24 = vmax.f32 %v579_v22, 0.0  ;;  %v597_v20 = vmax.f32 %v581_v43, 0.0  ;;  %v594_v19 = vmax.f32 %v578_v52, 0.0  ;;  %v596_v25 = vmax.f32 %v580_v60, 0.0 }
  0xab   : > { %v571_v36 = vpop.permute.xlu1 %570 }
  0xac   : > { %v615_v27 = vpack.c.bf16 %v599_v10, %v595_v24  ;;  %v617_v28 = vpack.c.bf16 %v601_v12, %v597_v20  ;;  %v614_v38 = vpack.c.bf16 %v598_v13, %v594_v19  ;;  %v616_v35 = vpack.c.bf16 %v600_v14, %v596_v25 }
  0xad   : > { %v587_v46 = vadd.f32 %v571_v36, %v547_v16  ;;  %v589_v37 = vadd.f32 %v571_v36, %v549_v42  ;;  %v586_v47 = vadd.f32 %v571_v36, %v546_v6  ;;  %v588_v41 = vadd.f32 %v571_v36, %v548_v21  ;;  %v639_v36 = vpop.permute.xlu0 %638 }
  0xae   : > { %663 = vmatprep.subr.bf16.mxu0 %v615_v27  ;;  %716 = vmatprep.subr.bf16.mxu1 %v617_v28 }
  0xaf   : > { %v576_v29 = vpop.permute.xlu1 %575  ;;  %664 = vmatpush1.bf16.msra.mxu0 %v614_v38  ;;  %717 = vmatpush1.bf16.msra.mxu1 %v616_v35  ;;  %v603_v54 = vmax.f32 %v587_v46, 0.0  ;;  %v605_v55 = vmax.f32 %v589_v37, 0.0  ;;  %v602_v44 = vmax.f32 %v586_v47, 0.0  ;;  %v604_v56 = vmax.f32 %v588_v41, 0.0 }
  0xb0   : > { %v591_v57 = vadd.f32 %v576_v29, %v551_v26  ;;  %v593_v49 = vadd.f32 %v576_v29, %v553_v40  ;;  %v590_v53 = vadd.f32 %v576_v29, %v550_v45  ;;  %v592_v7 = vadd.f32 %v576_v29, %v552_v48 }
  0xb2   : > { %v607_v58 = vmax.f32 %v591_v57, 0.0  ;;  %v609_v59 = vmax.f32 %v593_v49, 0.0  ;;  %v606_v61 = vmax.f32 %v590_v53, 0.0  ;;  %v608_v62 = vmax.f32 %v592_v7, 0.0 }
  0xb3   : > { %v634_v51 = vpop.permute.xlu1 %633 }
  0xb4   : > { %v619_v50 = vpack.c.bf16 %v607_v58, %v603_v54  ;;  %v621_v63 = vpack.c.bf16 %v609_v59, %v605_v55  ;;  %v618_v3 = vpack.c.bf16 %v606_v61, %v602_v44  ;;  %v620_v4 = vpack.c.bf16 %v608_v62, %v604_v56 }
  0xb6   : > { %665 = vmatprep.subr.bf16.mxu0 %v619_v50  ;;  %718 = vmatprep.subr.bf16.mxu1 %v621_v63 }
  0xb7   : > { %666 = vmatpush1.bf16.msra.mxu0 %v618_v3  ;;  %719 = vmatpush1.bf16.msra.mxu1 %v620_v4  ;;  %v644_v26 = vpop.permute.xlu1 %643 }
  0xba   : > { %3510 = vmatmul.mubr.msk.bf16.vlgmr.msra.gmra.mrb[0].mxu0 %vm656_vm0, %v3849_v32  ;;  %3512 = vmatmul.mubr.msk.bf16.vlgmr.msra.gmra.mrb[0].mxu1 %vm656_vm0, %v3849_v32 }
  0xbb   : > { %705 = vmatprep.mubr.bf16.mxu0 %v3891_v5  ;;  %758 = vmatprep.mubr.bf16.mxu1 %v3891_v5 }
  0xc2   : > { %3511 = vmatmul.mubr.msk.bf16.gmra.mrb[4].mxu0 %vm656_vm0, %v3850_v9  ;;  %3513 = vmatmul.mubr.msk.bf16.gmra.mrb[4].mxu1 %vm656_vm0, %v3850_v9  ;;  %v3851_v9 = vld [vmem:[%s4807_s5] sm:$0xff]  }
  0xc3   : > { %916 = vmatprep.mubr.bf16.mxu0 %v3891_v5  ;;  %969 = vmatprep.mubr.bf16.mxu1 %v3891_v5 }
 0x18d   : > { %v697_v33 = vpop.f32.mrb[0].mxu0  ;;  %v750_v10 = vpop.f32.mrb[0].mxu1 }
 0x18e   : > { %v698_v11 = vadd.f32 %v697_v33, %v629_v0  ;;  %v751_v12 = vadd.f32 %v750_v10, %v629_v0  ;;  %v699_v13 = vpop.f32.mrb[1].mxu0  ;;  %v752_v14 = vpop.f32.mrb[1].mxu1  ;;  %v847_v33 = vld [vmem:[%s4809_s7 + $0x18] sm:$0xff]  ;;  %v3853_v10 = vld [vmem:[%s4808_s6] sm:$0xff]  }
 0x18f   : > { %v700_v39 = vadd.f32 %v699_v13, %v629_v0  ;;  %v753_v34 = vadd.f32 %v752_v14, %v629_v0  ;;  %v701_v15 = vpop.f32.mrb[2].mxu0  ;;  %v754_v16 = vpop.f32.mrb[2].mxu1  ;;  %v3852_v0 = vld [vmem:[%s4807_s5 + $0x8] sm:$0xff]  }
 0x190   : > { %v769_v17 = vmax.f32 %v698_v11, 0.0  ;;  %v771_v42 = vmax.f32 %v751_v12, 0.0  ;;  %v702_v22 = vadd.f32 %v701_v15, %v634_v51  ;;  %v755_v43 = vadd.f32 %v754_v16, %v634_v51  ;;  %v703_v52 = vpop.f32.mrb[3].mxu0  ;;  %v756_v60 = vpop.f32.mrb[3].mxu1  ;;  %v845_v11 = vld [vmem:[%s4809_s7 + $0x8] sm:$0xff]  ;;  %v846_v12 = vld [vmem:[%s4809_s7 + $0x10] sm:$0xff] }
 0x191   : > { %v704_v30 = vadd.f32 %v703_v52, %v634_v51  ;;  %v757_v31 = vadd.f32 %v756_v60, %v634_v51  ;;  %v770_v24 = vmax.f32 %v700_v39, 0.0  ;;  %v772_v20 = vmax.f32 %v753_v34, 0.0  ;;  %v844_v51 = vld [vmem:[%s4809_s7] sm:$0xff] }
 0x192   : > { %v773_v18 = vmax.f32 %v702_v22, 0.0  ;;  %v775_v23 = vmax.f32 %v755_v43, 0.0  ;;  %801 = vmax.xlane.f32.xlu1 %v771_v42  ;;  %785 = vmax.xlane.f32.xlu0 %v769_v17 }
 0x193   : > { %v774_v19 = vmax.f32 %v704_v30, 0.0  ;;  %v776_v25 = vmax.f32 %v757_v31, 0.0 }
 0x194   : > { %v836_v6 = vpack.c.bf16 %v773_v18, %v769_v17  ;;  %v838_v8 = vpack.c.bf16 %v775_v23, %v771_v42 }
 0x195   : > { %v837_v21 = vpack.c.bf16 %v774_v19, %v770_v24  ;;  %v839_v27 = vpack.c.bf16 %v776_v25, %v772_v20  ;;  %v707_v28 = vpop.f32.mrb[4].mxu0  ;;  %v760_v38 = vpop.f32.mrb[4].mxu1 }
 0x196   : > { %v708_v35 = vadd.f32 %v707_v28, %v639_v36  ;;  %v761_v46 = vadd.f32 %v760_v38, %v639_v36  ;;  %v762_v37 = vpop.f32.mrb[5].mxu1  ;;  %809 = vmax.xlane.f32.xlu1 %v772_v20  ;;  %v709_v47 = vpop.f32.mrb[5].mxu0  ;;  %793 = vmax.xlane.f32.xlu0 %v770_v24 }
 0x197   : > { %v763_v41 = vadd.f32 %v762_v37, %v639_v36  ;;  %v710_v40 = vadd.f32 %v709_v47, %v639_v36  ;;  %v711_v45 = vpop.f32.mrb[6].mxu0  ;;  %v764_v48 = vpop.f32.mrb[6].mxu1  ;;  %884 = vmatprep.subr.bf16.mxu0 %v837_v21  ;;  %937 = vmatprep.subr.bf16.mxu1 %v839_v27  ;;  %v3854_v37 = vld [vmem:[%s4808_s6 + $0x8] sm:$0xff]  }
 0x198   : > { %v712_v29 = vadd.f32 %v711_v45, %v644_v26  ;;  %v765_v57 = vadd.f32 %v764_v48, %v644_v26  ;;  %v713_v49 = vpop.f32.mrb[7].mxu0  ;;  %v766_v53 = vpop.f32.mrb[7].mxu1  ;;  %885 = vmatpush1.bf16.msra.mxu0 %v836_v6  ;;  %938 = vmatpush1.bf16.msra.mxu1 %v838_v8  ;;  %v777_v55 = vmax.f32 %v708_v35, 0.0  ;;  %v779_v44 = vmax.f32 %v761_v46, 0.0 }
 0x199   : > { %v714_v7 = vadd.f32 %v713_v49, %v644_v26  ;;  %v767_v54 = vadd.f32 %v766_v53, %v644_v26  ;;  %v780_v59 = vmax.f32 %v763_v41, 0.0  ;;  %v778_v61 = vmax.f32 %v710_v40, 0.0 }
 0x19a   : > { %v781_v56 = vmax.f32 %v712_v29, 0.0  ;;  %v783_v58 = vmax.f32 %v765_v57, 0.0  ;;  %787 = vmax.xlane.f32.xlu1 %v773_v18  ;;  %803 = vmax.xlane.f32.xlu0 %v775_v23 }
 0x19b   : > { %v782_v62 = vmax.f32 %v714_v7, 0.0  ;;  %v784_v50 = vmax.f32 %v767_v54, 0.0 }
 0x19c   : > { %v840_v63 = vpack.c.bf16 %v781_v56, %v777_v55  ;;  %v842_v3 = vpack.c.bf16 %v783_v58, %v779_v44 }
 0x19d   : > { %v841_v4 = vpack.c.bf16 %v782_v62, %v778_v61  ;;  %v843_v32 = vpack.c.bf16 %v784_v50, %v780_v59 }
 0x19e   : > { %789 = vmax.xlane.f32.xlu1 %v777_v55  ;;  %795 = vmax.xlane.f32.xlu0 %v774_v19 }
 0x19f   : > { %886 = vmatprep.subr.bf16.mxu0 %v841_v4  ;;  %939 = vmatprep.subr.bf16.mxu1 %v843_v32  ;;  %v3528_v4 = vld [vmem:[%s4806_s4 + $0x20] sm:$0xff]  ;;  %v3529_v32 = vld [vmem:[%s4806_s4 + $0x28] sm:$0xff] }
 0x1a0   : > { %887 = vmatpush1.bf16.msra.mxu0 %v840_v63  ;;  %940 = vmatpush1.bf16.msra.mxu1 %v842_v3  ;;  %v3892_v3 = vmov 3  }
 0x1a2   : > { %805 = vmax.xlane.f32.xlu1 %v779_v44  ;;  %811 = vmax.xlane.f32.xlu0 %v776_v25 }
 0x1a3   : > { %3516 = vmatmul.mubr.msk.bf16.vlgmr.msra.gmra.mrb[8].mxu0 %vm656_vm0, %v3851_v9  ;;  %3518 = vmatmul.mubr.msk.bf16.vlgmr.msra.gmra.mrb[8].mxu1 %vm656_vm0, %v3851_v9  ;;  %v3531_v9 = vld [vmem:[%s4806_s4 + $0x38] sm:$0xff] }
 0x1a4   : > { %979 = vmatprep.mubr.bf16.mxu1 %v3891_v5  ;;  %926 = vmatprep.mubr.bf16.mxu0 %v3891_v5 }
 0x1a6   : > { %797 = vmax.xlane.f32.xlu1 %v778_v61  ;;  %791 = vmax.xlane.f32.xlu0 %v781_v56 }
 0x1aa   : > { %813 = vmax.xlane.f32.xlu1 %v780_v59  ;;  %807 = vmax.xlane.f32.xlu0 %v783_v58 }
 0x1ab   : > { %3517 = vmatmul.mubr.msk.bf16.gmra.mrb[12].mxu0 %vm656_vm0, %v3852_v0  ;;  %3519 = vmatmul.mubr.msk.bf16.gmra.mrb[12].mxu1 %vm656_vm0, %v3852_v0  ;;  %v3530_v0 = vld [vmem:[%s4806_s4 + $0x30] sm:$0xff] }
 0x1ac   : > { %1251 = vmatprep.mubr.bf16.mxu1 %v3891_v5  ;;  %3691 = vmatprep.mubr.msk.bf16.mxu0 %vm656_vm0, %v3853_v10 }
 0x1ae   : > { %799 = vmax.xlane.f32.xlu0 %v782_v62 }
 0x1b2   : > { %815 = vmax.xlane.f32.xlu0 %v784_v50 }
 0x1bb   : > { %850 = vperm.xlu1 %3786, %v844_v51  }
 0x1bf   : > { %865 = vperm.xlu1 %3786, %v847_v33  }
 0x1c3   : > { %3787 = vset.pattern.permute.xlu1 %v3890_v2 }
 0x1c8   : > { %855 = vperm.xlu0 %3784, %v845_v11  }
 0x1cc   : > { %860 = vperm.xlu0 %3784, %v846_v12  }
 0x21f   : > { %v802_v13 = vpop.xlane.xlu1 %801  ;;  %v786_v14 = vpop.xlane.xlu0 %785 }
 0x223   : > { %v810_v39 = vpop.xlane.xlu1 %809  ;;  %v794_v34 = vpop.xlane.xlu0 %793 }
 0x224   : > { %v818_v17 = vsel %vm817_vm1, %v786_v14, %v794_v34 }
 0x225   : > { %v823_v52 = vsel %vm822_vm2, %v818_v17, %v802_v13 }
 0x226   : > { %v828_v31 = vsel %vm827_vm3, %v823_v52, %v810_v39 }
 0x227   : > { %v788_v15 = vpop.xlane.xlu1 %787  ;;  %v804_v16 = vpop.xlane.xlu0 %803 }
 0x22b   : > { %v790_v42 = vpop.xlane.xlu1 %789  ;;  %v796_v22 = vpop.xlane.xlu0 %795 }
 0x22c   : > { %v819_v43 = vsel %vm817_vm1, %v788_v15, %v796_v22 }
 0x22d   : > { %v824_v60 = vsel %vm822_vm2, %v819_v43, %v804_v16 }
 0x22f   : > { %v812_v30 = vpop.xlane.xlu0 %811  ;;  %v806_v23 = vpop.xlane.xlu1 %805 }
 0x230   : > { %v829_v18 = vsel %vm827_vm3, %v824_v60, %v812_v30 }
 0x231   : > { %v994_v24 = vpack.c.bf16 %v829_v18, %v828_v31 }
 0x233   : > { %v792_v20 = vpop.xlane.xlu0 %791  ;;  %3687 = vmatprep.subr.bf16.mxu0 %v994_v24  ;;  %v798_v19 = vpop.xlane.xlu1 %797 }
 0x234   : > { %3688 = vmatpush3.bf16.msra.mxu0 %v994_v24  ;;  %v820_v26 = vsel %vm817_vm1, %v790_v42, %v798_v19 }
 0x235   : > { %v825_v21 = vsel %vm822_vm2, %v820_v26, %v806_v23 }
 0x237   : > { %v808_v25 = vpop.xlane.xlu0 %807  ;;  %v814_v8 = vpop.xlane.xlu1 %813 }
 0x238   : > { %v830_v38 = vsel %vm827_vm3, %v825_v21, %v814_v8 }
 0x23b   : > { %v800_v36 = vpop.xlane.xlu0 %799  ;;  %v851_v51 = vpop.permute.xlu1 %850 }
 0x23c   : > { %v821_v6 = vsel %vm817_vm1, %v792_v20, %v800_v36 }
 0x23d   : > { %v826_v27 = vsel %vm822_vm2, %v821_v6, %v808_v25 }
 0x23f   : > { %v816_v28 = vpop.xlane.xlu0 %815  ;;  %v4205_v10 = vpop.permute.xlu1 %865 }
 0x240   : > { %v831_v35 = vsel %vm827_vm3, %v826_v27, %v816_v28 }
 0x241   : > { %v995_v46 = vpack.c.bf16 %v831_v35, %v830_v38 }
 0x243   : > { %3689 = vmatprep.subr.bf16.mxu0 %v995_v46 }
 0x244   : > { %3690 = vmatpush3.bf16.msra.mxu0 %v995_v46 }
 0x247   : > { %3692 = vmatmul.mubr.msk.bf16.vlgmr.msra.gmra.mrb[16].mxu0 %vm656_vm0, %v3854_v37  ;;  %v856_v33 = vpop.permute.xlu0 %855 }
 0x248   : > { %1304 = vmatprep.mubr.bf16.mxu0 %v3891_v5 }
 0x24b   : > { %v4207_v11 = vpop.permute.xlu0 %860 }
 0x276   : > { %v4147_v47 = vpop.f32.mrb[8].mxu0  ;;  %v4149_v41 = vpop.f32.mrb[8].mxu1 }
 0x277   : > { %v4151_v40 = vpop.f32.mrb[9].mxu0  ;;  %v4153_v45 = vpop.f32.mrb[9].mxu1  ;;  %v972_v17 = vadd.f32 %v4149_v41, %v851_v51 }
 0x278   : > { %v4155_v48 = vpop.f32.mrb[10].mxu0  ;;  %v4157_v29 = vpop.f32.mrb[10].mxu1 }
 0x279   : > { %v4159_v57 = vpop.f32.mrb[11].mxu0  ;;  %v4161_v49 = vpop.f32.mrb[11].mxu1  ;;  %v976_v16 = vadd.f32 %v4157_v29, %v856_v33 }
 0x27e   : > { %v4163_v53 = vpop.f32.mrb[12].mxu0  ;;  %v4165_v7 = vpop.f32.mrb[12].mxu1 }
 0x27f   : > { %v4167_v54 = vpop.f32.mrb[13].mxu0  ;;  %v4169_v55 = vpop.f32.mrb[13].mxu1  ;;  %v929_v21 = vadd.f32 %v4163_v53, %v4207_v11  ;;  %v925_v53 = vadd.f32 %v4159_v57, %v856_v33 }
 0x280   : > { %v4171_v44 = vpop.f32.mrb[14].mxu0  ;;  %v4173_v56 = vpop.f32.mrb[14].mxu1  ;;  %v984_v52 = vadd.f32 %v4169_v55, %v4207_v11  ;;  %v931_v30 = vadd.f32 %v4167_v54, %v4207_v11 }
 0x281   : > { %v4175_v58 = vpop.f32.mrb[15].mxu0  ;;  %v4177_v59 = vpop.f32.mrb[15].mxu1  ;;  %v933_v46 = vadd.f32 %v4171_v44, %v4205_v10  ;;  %v919_v44 = vadd.f32 %v4147_v47, %v851_v51 }
 0x282   : > { %v988_v18 = vadd.f32 %v4177_v59, %v4205_v10  ;;  %v935_v20 = vadd.f32 %v4175_v58, %v4205_v10  ;;  %v921_v58 = vadd.f32 %v4151_v40, %v851_v51 }
 0x31a   : > { %v3693_v61 = vpop.f32.mrb[16].mxu0 }
 0x31b   : > { %1073 = vperm.xlu0 %3784, %v3693_v61   ;;  %1098 = vperm.xlu1 %3787, %v3693_v61   ;;  %v1046_v62 = vpop.f32.mrb[17].mxu0 }
 0x31c   : > { %v3694_v50 = vpop.f32.mrb[18].mxu0 }
 0x31d   : > { %v1049_v63 = vpop.f32.mrb[19].mxu0 }
 0x31f   : > { %3788 = vset.pattern.permute.xlu1 %v3892_v3  ;;  %1063 = vperm.xlu0 %3784, %v1046_v62  }
 0x320   : > { %1146 = vperm.xlu1 %3788, %v3693_v61  }
 0x323   : > { %3790 = vset.pattern.permute.xlu0 %v3892_v3 }
 0x324   : > { %3789 = vset.pattern.permute.xlu1 %v3890_v2  ;;  %1138 = vperm.xlu0 %3790, %v1046_v62  }
 0x325   : > { %1090 = vperm.xlu1 %3789, %v1046_v62  }
 0x328   : > { %3797 = vset.pattern.permute.xlu0 %v3889_v1 }
 0x329   : > { %3791 = vset.pattern.permute.xlu1 %v3889_v1  ;;  %1118 = vperm.xlu0 %3797, %v1049_v63  }
 0x32a   : > { %1114 = vperm.xlu1 %3791, %v1046_v62  }
 0x32d   : > { %3798 = vset.pattern.permute.xlu0 %v3892_v3 }
 0x32e   : > { %3792 = vset.pattern.permute.xlu1 %v3890_v2  ;;  %1150 = vperm.xlu0 %3798, %v3694_v50  }
 0x32f   : > { %1102 = vperm.xlu1 %3792, %v3694_v50  }
 0x332   : > { %3800 = vset.pattern.permute.xlu0 %v3891_v5 }
 0x333   : > { %3793 = vset.pattern.permute.xlu1 %v3891_v5  ;;  %1185 = vperm.xlu0 %3800, %v3528_v4  }
 0x334   : > { %1078 = vperm.xlu1 %3793, %v3694_v50  }
 0x337   : > { %1200 = vperm.xlu0 %3800, %v3531_v9  }
 0x338   : > { %3794 = vset.pattern.permute.xlu1 %v3890_v2 }
 0x339   : > { %1094 = vperm.xlu1 %3794, %v1049_v63  }
 0x33d   : > { %3795 = vset.pattern.permute.xlu1 %v3891_v5 }
 0x33e   : > { %1068 = vperm.xlu1 %3795, %v1049_v63  }
 0x342   : > { %3796 = vset.pattern.permute.xlu1 %v3892_v3 }
 0x343   : > { %1142 = vperm.xlu1 %3796, %v1049_v63  }
 0x347   : > { %3799 = vset.pattern.permute.xlu1 %v3889_v1 }
 0x348   : > { %1122 = vperm.xlu1 %3799, %v3693_v61  }
 0x34c   : > { %1126 = vperm.xlu1 %3799, %v3694_v50  }
 0x350   : > { %3801 = vset.pattern.permute.xlu1 %v3891_v5 }
 0x351   : > { %1190 = vperm.xlu1 %3801, %v3529_v32  }
 0x355   : > { %1195 = vperm.xlu1 %3801, %v3530_v0   ;;  %v923_v0 = vadd.f32 %v4155_v48, %v856_v33 }
 0x39a   : > { %v1074_v12 = vpop.permute.xlu0 %1073  ;;  %v1099_v13 = vpop.permute.xlu1 %1098 }
 0x39b   : > { %v1107_v19 = vadd.f32 %v1099_v13, %v931_v30  ;;  %v1083_v37 = vadd.f32 %v1074_v12, %v929_v21 }
 0x39d   : > { %v1111_v38 = vmax.f32 %v1107_v19, 0.0  ;;  %v1087_v59 = vmax.f32 %v1083_v37, 0.0 }
 0x39e   : > { %v1064_v14 = vpop.permute.xlu0 %1063 }
 0x39f   : > { %v1147_v39 = vpop.permute.xlu1 %1146  ;;  %v1081_v12 = vadd.f32 %v1064_v14, %v919_v44 }
 0x3a0   : > { %v1155_v23 = vadd.f32 %v1147_v39, %v984_v52 }
 0x3a1   : > { %v1085_v57 = vmax.f32 %v1081_v12, 0.0 }
 0x3a2   : > { %v1159_v27 = vmax.f32 %v1155_v23, 0.0 }
 0x3a3   : > { %v1139_v34 = vpop.permute.xlu0 %1138 }
 0x3a4   : > { %v1091_v15 = vpop.permute.xlu1 %1090 }
 0x3a5   : > { %v1105_v62 = vadd.f32 %v1091_v15, %v921_v58 }
 0x3a7   : > { %v1109_v32 = vmax.f32 %v1105_v62, 0.0 }
 0x3a8   : > { %v1119_v42 = vpop.permute.xlu0 %1118 }
 0x3a9   : > { %v1130_v22 = vadd.f32 %v1119_v42, %v976_v16  ;;  %v1115_v43 = vpop.permute.xlu1 %1114  ;;  %v974_v16 = vadd.f32 %v4153_v45, %v851_v51  ;;  %v3855_v45 = vld [vmem:[%s4805_s3 + $0x10] sm:$0xff]   ;;  %v986_v51 = vadd.f32 %v4173_v56, %v4205_v10 }
 0x3aa   : > { %v1129_v60 = vadd.f32 %v1115_v43, %v972_v17  ;;  %v978_v17 = vadd.f32 %v4161_v49, %v856_v33  ;;  %v982_v49 = vadd.f32 %v4165_v7, %v4207_v11  ;;  %v3856_v11 = vld [vmem:[%s4805_s3 + $0x18] sm:$0xff]  }
 0x3ab   : > { %v1134_v31 = vmax.f32 %v1130_v22, 0.0  ;;  %v1153_v42 = vadd.f32 %v1139_v34, %v974_v16 }
 0x3ac   : > { %v1133_v24 = vmax.f32 %v1129_v60, 0.0 }
 0x3ad   : > { %v1151_v25 = vpop.permute.xlu0 %1150  ;;  %v1157_v48 = vmax.f32 %v1153_v42, 0.0 }
 0x3ae   : > { %v4219_v36 = vpack.c.bf16 %v1134_v31, %v1133_v24  ;;  %v1156_v26 = vadd.f32 %v1151_v25, %v988_v18  ;;  %v1103_v6 = vpop.permute.xlu1 %1102 }
 0x3af   : > { %v1108_v8 = vadd.f32 %v1103_v6, %v935_v20 }
 0x3b0   : > { %v1160_v28 = vmax.f32 %v1156_v26, 0.0 }
 0x3b1   : > { %v1112_v35 = vmax.f32 %v1108_v8, 0.0 }
 0x3b2   : > { %v4225_v41 = vpack.c.bf16 %v1160_v28, %v1159_v27  ;;  %v1186_v56 = vpop.permute.xlu0 %1185 }
 0x3b3   : > { %v1079_v29 = vpop.permute.xlu1 %1078  ;;  %v4227_v54 = vpack.c.bf16 %v1112_v35, %v1111_v38 }
 0x3b4   : > { %v1084_v55 = vadd.f32 %v1079_v29, %v933_v46 }
 0x3b6   : > { %v1088_v61 = vmax.f32 %v1084_v55, 0.0  ;;  %v1201_v55 = vpop.permute.xlu0 %1200 }
 0x3b8   : > { %v4231_v50 = vpack.c.bf16 %v1088_v61, %v1087_v59  ;;  %v1095_v63 = vpop.permute.xlu1 %1094 }
 0x3b9   : > { %v1106_v4 = vadd.f32 %v1095_v63, %v925_v53 }
 0x3bb   : > { %v1110_v9 = vmax.f32 %v1106_v4, 0.0 }
 0x3bd   : > { %v1069_v13 = vpop.permute.xlu1 %1068  ;;  %v4235_v39 = vpack.c.bf16 %v1110_v9, %v1109_v32 }
 0x3be   : > { %v1082_v40 = vadd.f32 %v1069_v13, %v923_v0 }
 0x3bf   : > { %1219 = vmatprep.subr.bf16.mxu1 %v4235_v39 }
 0x3c0   : > { %v1086_v15 = vmax.f32 %v1082_v40, 0.0 }
 0x3c2   : > { %v4240_v22 = vpack.c.bf16 %v1086_v15, %v1085_v57  ;;  %v1143_v47 = vpop.permute.xlu1 %1142 }
 0x3c3   : > { %v1154_v43 = vadd.f32 %v1143_v47, %v978_v17 }
 0x3c4   : > { %1220 = vmatpush1.bf16.msra.mxu1 %v4240_v22 }
 0x3c5   : > { %v1158_v14 = vmax.f32 %v1154_v43, 0.0  ;;  %1221 = vmatprep.subr.bf16.mxu1 %v4227_v54 }
 0x3c7   : > { %v1123_v52 = vpop.permute.xlu1 %1122  ;;  %v4244_v60 = vpack.c.bf16 %v1158_v14, %v1157_v48 }
 0x3c8   : > { %1222 = vmatpush1.bf16.msra.mxu1 %v4231_v50  ;;  %v1131_v33 = vadd.f32 %v1123_v52, %v982_v49 }
 0x3c9   : > { %1272 = vmatprep.subr.bf16.mxu0 %v4244_v60 }
 0x3ca   : > { %1273 = vmatpush1.bf16.msra.mxu0 %v4219_v36  ;;  %v1135_v31 = vmax.f32 %v1131_v33, 0.0 }
 0x3cb   : > { %1274 = vmatprep.subr.bf16.mxu0 %v4225_v41  ;;  %v1127_v34 = vpop.permute.xlu1 %1126  ;;  %3534 = vmatmul.mubr.msk.bf16.vlgmr.msra.gmra.mrb[16].mxu1 %vm656_vm0, %v3855_v45 }
 0x3cc   : > { %v1132_v30 = vadd.f32 %v1127_v34, %v986_v51  ;;  %1261 = vmatprep.mubr.bf16.mxu1 %v3891_v5  ;;  %v3857_v34 = vld [vmem:[%s4807_s5 + $0x10] sm:$0xff]  }
 0x3ce   : > { %v1136_v7 = vmax.f32 %v1132_v30, 0.0 }
 0x3d0   : > { %v4262_v18 = vpack.c.bf16 %v1136_v7, %v1135_v31  ;;  %v1191_v23 = vpop.permute.xlu1 %1190 }
 0x3d2   : > { %1275 = vmatpush1.bf16.msra.mxu0 %v4262_v18 }
 0x3d3   : > { %3535 = vmatmul.mubr.msk.bf16.gmra.mrb[20].mxu1 %vm656_vm0, %v3856_v11 }
 0x3d4   : > { %1471 = vmatprep.mubr.bf16.mxu1 %v3891_v5  ;;  %v1196_v35 = vpop.permute.xlu1 %1195 }
 0x3d5   : > { %3536 = vmatmul.mubr.msk.bf16.vlgmr.msra.gmra.mrb[20].mxu0 %vm656_vm0, %v3855_v45 }
 0x3d6   : > { %1314 = vmatprep.mubr.bf16.mxu0 %v3891_v5 }
 0x3dd   : > { %3537 = vmatmul.mubr.msk.bf16.gmra.mrb[24].mxu0 %vm656_vm0, %v3856_v11 }
 0x3de   : > { %1524 = vmatprep.mubr.bf16.mxu0 %v3891_v5 }
 0x49e   : > { %v1253_v10 = vpop.f32.mrb[16].mxu1 }
 0x49f   : > { %v1255_v24 = vpop.f32.mrb[17].mxu1  ;;  %v1254_v20 = vadd.f32 %v1253_v10, %v1186_v56 }
 0x4a0   : > { %v1257_v19 = vpop.f32.mrb[18].mxu1  ;;  %v1256_v25 = vadd.f32 %v1255_v24, %v1186_v56 }
 0x4a1   : > { %v4271_v26 = vadd.f32 %v1257_v19, %v1191_v23  ;;  %v1259_v6 = vpop.f32.mrb[19].mxu1  ;;  %v1325_v8 = vmax.f32 %v1254_v20, 0.0 }
 0x4a2   : > { %v1260_v21 = vadd.f32 %v1259_v6, %v1191_v23  ;;  %v1326_v27 = vmax.f32 %v1256_v25, 0.0 }
 0x4a3   : > { %v1329_v28 = vmax.f32 %v4271_v26, 0.0  ;;  %1341 = vmax.xlane.f32.xlu1 %v1325_v8  ;;  %v3543_v26 = vld [vmem:[%s4809_s7 + $0x28] sm:$0xff] }
 0x4a4   : > { %v1330_v38 = vmax.f32 %v1260_v21, 0.0  ;;  %v3858_v21 = vld [vmem:[%s4807_s5 + $0x18] sm:$0xff]  }
 0x4a5   : > { %v1390_v46 = vpack.c.bf16 %v1329_v28, %v1325_v8 }
 0x4a6   : > { %v1391_v37 = vpack.c.bf16 %v1330_v38, %v1326_v27  ;;  %v1263_v29 = vpop.f32.mrb[20].mxu1 }
 0x4a7   : > { %v1265_v58 = vpop.f32.mrb[21].mxu1  ;;  %v1264_v59 = vadd.f32 %v1263_v29, %v1196_v35 }
 0x4a8   : > { %v1306_v61 = vpop.f32.mrb[20].mxu0  ;;  %v1267_v53 = vpop.f32.mrb[22].mxu1  ;;  %v4276_v62 = vadd.f32 %v1265_v58, %v1196_v35  ;;  %1439 = vmatprep.subr.bf16.mxu1 %v1391_v37 }
 0x4a9   : > { %v1307_v63 = vadd.f32 %v1306_v61, %v1186_v56  ;;  %v1268_v4 = vadd.f32 %v1267_v53, %v1201_v55  ;;  %v1333_v44 = vmax.f32 %v1264_v59, 0.0  ;;  %v1269_v32 = vpop.f32.mrb[23].mxu1  ;;  %v1308_v9 = vpop.f32.mrb[21].mxu0  ;;  %1440 = vmatpush1.bf16.msra.mxu1 %v1390_v46 }
 0x4aa   : > { %v1270_v0 = vadd.f32 %v1269_v32, %v1201_v55  ;;  %v1334_v12 = vmax.f32 %v4276_v62, 0.0  ;;  %v1309_v13 = vadd.f32 %v1308_v9, %v1186_v56  ;;  %v1310_v40 = vpop.f32.mrb[22].mxu0 }
 0x4ab   : > { %v1327_v16 = vmax.f32 %v1307_v63, 0.0  ;;  %v1337_v57 = vmax.f32 %v1268_v4, 0.0  ;;  %v1311_v15 = vadd.f32 %v1310_v40, %v1191_v23  ;;  %v1312_v17 = vpop.f32.mrb[23].mxu0 }
 0x4ac   : > { %v1338_v42 = vmax.f32 %v1270_v0, 0.0  ;;  %v1313_v47 = vadd.f32 %v1312_v17, %v1191_v23  ;;  %v1328_v52 = vmax.f32 %v1309_v13, 0.0 }
 0x4ad   : > { %v1394_v43 = vpack.c.bf16 %v1337_v57, %v1333_v44  ;;  %v1331_v48 = vmax.f32 %v1311_v15, 0.0  ;;  %1357 = vmax.xlane.f32.xlu0 %v1327_v16 }
 0x4ae   : > { %v1395_v14 = vpack.c.bf16 %v1338_v42, %v1334_v12  ;;  %v1332_v45 = vmax.f32 %v1313_v47, 0.0 }
 0x4af   : > { %v1392_v49 = vpack.c.bf16 %v1331_v48, %v1327_v16  ;;  %1359 = vmax.xlane.f32.xlu1 %v1331_v48 }
 0x4b0   : > { %v1393_v51 = vpack.c.bf16 %v1332_v45, %v1328_v52  ;;  %v1316_v33 = vpop.f32.mrb[24].mxu0  ;;  %1441 = vmatprep.subr.bf16.mxu1 %v1395_v14 }
 0x4b1   : > { %v1317_v30 = vadd.f32 %v1316_v33, %v1196_v35  ;;  %v1318_v31 = vpop.f32.mrb[25].mxu0  ;;  %1349 = vmax.xlane.f32.xlu0 %v1326_v27  ;;  %1442 = vmatpush1.bf16.msra.mxu1 %v1394_v43  ;;  %v3545_v27 = vld [vmem:[%s4809_s7 + $0x38] sm:$0xff] }
 0x4b2   : > { %v1319_v7 = vadd.f32 %v1318_v31, %v1196_v35  ;;  %v1320_v11 = vpop.f32.mrb[26].mxu0  ;;  %1492 = vmatprep.subr.bf16.mxu0 %v1393_v51  ;;  %v3544_v35 = vld [vmem:[%s4809_s7 + $0x30] sm:$0xff]  ;;  %v3860_v51 = vld [vmem:[%s4808_s6 + $0x18] sm:$0xff]  }
 0x4b3   : > { %v1321_v56 = vadd.f32 %v1320_v11, %v1201_v55  ;;  %v1322_v10 = vpop.f32.mrb[27].mxu0  ;;  %1493 = vmatpush1.bf16.msra.mxu0 %v1392_v49  ;;  %1351 = vmax.xlane.f32.xlu1 %v1330_v38  ;;  %v1335_v24 = vmax.f32 %v1317_v30, 0.0  ;;  %v3859_v38 = vld [vmem:[%s4808_s6 + $0x10] sm:$0xff]  }
 0x4b4   : > { %v1323_v23 = vadd.f32 %v1322_v10, %v1201_v55  ;;  %3548 = vmatmul.mubr.msk.bf16.vlgmr.msra.gmra.mrb[24].mxu1 %vm656_vm0, %v3857_v34  ;;  %v1336_v19 = vmax.f32 %v1319_v7, 0.0 }
 0x4b5   : > { %v1339_v20 = vmax.f32 %v1321_v56, 0.0  ;;  %1365 = vmax.xlane.f32.xlu0 %v1328_v52  ;;  %1481 = vmatprep.mubr.bf16.mxu1 %v3891_v5 }
 0x4b6   : > { %v1340_v25 = vmax.f32 %v1323_v23, 0.0 }
 0x4b7   : > { %v1396_v6 = vpack.c.bf16 %v1339_v20, %v1335_v24  ;;  %1367 = vmax.xlane.f32.xlu1 %v1332_v45 }
 0x4b8   : > { %v1397_v8 = vpack.c.bf16 %v1340_v25, %v1336_v19 }
 0x4b9   : > { %1343 = vmax.xlane.f32.xlu0 %v1329_v28  ;;  %v3542_v28 = vld [vmem:[%s4809_s7 + $0x20] sm:$0xff] }
 0x4ba   : > { %1494 = vmatprep.subr.bf16.mxu0 %v1397_v8 }
 0x4bb   : > { %1495 = vmatpush1.bf16.msra.mxu0 %v1396_v6  ;;  %1347 = vmax.xlane.f32.xlu1 %v1337_v57 }
 0x4bc   : > { %3549 = vmatmul.mubr.msk.bf16.gmra.mrb[28].mxu1 %vm656_vm0, %v3858_v21 }
 0x4bd   : > { %1345 = vmax.xlane.f32.xlu0 %v1333_v44  ;;  %3699 = vmatprep.mubr.msk.bf16.mxu1 %vm656_vm0, %v3859_v38 }
 0x4be   : > { %3550 = vmatmul.mubr.msk.bf16.vlgmr.msra.gmra.mrb[28].mxu0 %vm656_vm0, %v3857_v34 }
 0x4bf   : > { %1363 = vmax.xlane.f32.xlu1 %v1339_v20  ;;  %1534 = vmatprep.mubr.bf16.mxu0 %v3891_v5 }
 0x4c1   : > { %1361 = vmax.xlane.f32.xlu0 %v1335_v24 }
 0x4c3   : > { %1355 = vmax.xlane.f32.xlu1 %v1338_v42 }
 0x4c5   : > { %1353 = vmax.xlane.f32.xlu0 %v1334_v12 }
 0x4c6   : > { %3551 = vmatmul.mubr.msk.bf16.gmra.mrb[32].mxu0 %vm656_vm0, %v3858_v21 }
 0x4c7   : > { %1371 = vmax.xlane.f32.xlu1 %v1340_v25  ;;  %1778 = vmatprep.mubr.bf16.mxu0 %v3891_v5 }
 0x4c9   : > { %1369 = vmax.xlane.f32.xlu0 %v1336_v19 }
 0x4d8   : > { %1410 = vperm.xlu1 %3801, %v3543_v26  }
 0x4dc   : > { %1420 = vperm.xlu1 %3801, %v3545_v27  }
 0x4df   : > { %1405 = vperm.xlu0 %3800, %v3542_v28  }
 0x4e3   : > { %1415 = vperm.xlu0 %3800, %v3544_v35   ;;  %v3580_v35 = vld [vmem:[%s4806_s4 + $0x40] sm:$0xff] }
 0x4e7   : > { %3802 = vset.pattern.permute.xlu0 %v3890_v2 }
 0x530   : > { %v1342_v46 = vpop.xlane.xlu1 %1341 }
 0x53a   : > { %v1358_v37 = vpop.xlane.xlu0 %1357 }
 0x53c   : > { %v1360_v29 = vpop.xlane.xlu1 %1359 }
 0x53e   : > { %v1350_v55 = vpop.xlane.xlu0 %1349 }
 0x53f   : > { %v1373_v53 = vsel %vm817_vm1, %v1342_v46, %v1350_v55  ;;  %v3581_v46 = vld [vmem:[%s4806_s4 + $0x48] sm:$0xff] }
 0x540   : > { %v1352_v58 = vpop.xlane.xlu1 %1351  ;;  %v1377_v4 = vsel %vm822_vm2, %v1373_v53, %v1358_v37  ;;  %v3582_v37 = vld [vmem:[%s4806_s4 + $0x50] sm:$0xff] }
 0x542   : > { %v1366_v59 = vpop.xlane.xlu0 %1365 }
 0x543   : > { %v1381_v9 = vsel %vm827_vm3, %v1377_v4, %v1366_v59 }
 0x544   : > { %v1368_v61 = vpop.xlane.xlu1 %1367 }
 0x546   : > { %v1344_v62 = vpop.xlane.xlu0 %1343 }
 0x547   : > { %v1374_v63 = vsel %vm817_vm1, %v1344_v62, %v1352_v58 }
 0x548   : > { %v1378_v44 = vsel %vm822_vm2, %v1374_v63, %v1360_v29  ;;  %v1348_v32 = vpop.xlane.xlu1 %1347  ;;  %v3583_v29 = vld [vmem:[%s4806_s4 + $0x58] sm:$0xff] }
 0x549   : > { %v1382_v0 = vsel %vm827_vm3, %v1378_v44, %v1368_v61 }
 0x54a   : > { %v1346_v12 = vpop.xlane.xlu0 %1345  ;;  %v1550_v13 = vpack.c.bf16 %v1382_v0, %v1381_v9 }
 0x54c   : > { %v1364_v40 = vpop.xlane.xlu1 %1363  ;;  %3695 = vmatprep.subr.bf16.mxu1 %v1550_v13 }
 0x54d   : > { %3696 = vmatpush3.bf16.msra.mxu1 %v1550_v13 }
 0x54e   : > { %v1362_v16 = vpop.xlane.xlu0 %1361 }
 0x550   : > { %v1356_v57 = vpop.xlane.xlu1 %1355 }
 0x551   : > { %v1376_v17 = vsel %vm817_vm1, %v1348_v32, %v1356_v57 }
 0x552   : > { %v1354_v15 = vpop.xlane.xlu0 %1353  ;;  %v1380_v43 = vsel %vm822_vm2, %v1376_v17, %v1364_v40 }
 0x553   : > { %v1375_v42 = vsel %vm817_vm1, %v1346_v12, %v1354_v15 }
 0x554   : > { %v1372_v47 = vpop.xlane.xlu1 %1371  ;;  %v1379_v48 = vsel %vm822_vm2, %v1375_v42, %v1362_v16 }
 0x555   : > { %v1384_v52 = vsel %vm827_vm3, %v1380_v43, %v1372_v47 }
 0x556   : > { %v1370_v14 = vpop.xlane.xlu0 %1369 }
 0x557   : > { %v1383_v45 = vsel %vm827_vm3, %v1379_v48, %v1370_v14 }
 0x558   : > { %v1551_v49 = vpack.c.bf16 %v1384_v52, %v1383_v45  ;;  %v1411_v55 = vpop.permute.xlu1 %1410 }
 0x55a   : > { %3697 = vmatprep.subr.bf16.mxu1 %v1551_v49 }
 0x55b   : > { %3698 = vmatpush3.bf16.msra.mxu1 %v1551_v49 }
 0x55c   : > { %v4383_v59 = vpop.permute.xlu1 %1420 }
 0x55e   : > { %3700 = vmatmul.mubr.msk.bf16.vlgmr.msra.gmra.mrb[32].mxu1 %vm656_vm0, %v3860_v51  ;;  %v1406_v58 = vpop.permute.xlu0 %1405 }
 0x55f   : > { %1831 = vmatprep.mubr.bf16.mxu1 %v3891_v5 }
 0x562   : > { %v4385_v61 = vpop.permute.xlu0 %1415 }
 0x587   : > { %v4328_v33 = vpop.f32.mrb[24].mxu1 }
 0x588   : > { %v4330_v34 = vpop.f32.mrb[25].mxu1 }
 0x589   : > { %v4332_v30 = vpop.f32.mrb[26].mxu1  ;;  %v1476_v40 = vadd.f32 %v4330_v34, %v1406_v58 }
 0x58a   : > { %v4334_v31 = vpop.f32.mrb[27].mxu1 }
 0x58b   : > { %v1480_v16 = vadd.f32 %v4334_v31, %v1411_v55 }
 0x58f   : > { %v1483_v7 = vpop.f32.mrb[28].mxu1 }
 0x590   : > { %v4336_v11 = vpop.f32.mrb[29].mxu1  ;;  %v1484_v63 = vadd.f32 %v1483_v7, %v4385_v61 }
 0x591   : > { %v1487_v56 = vpop.f32.mrb[30].mxu1  ;;  %v4338_v10 = vpop.f32.mrb[28].mxu0 }
 0x592   : > { %v4340_v23 = vpop.f32.mrb[31].mxu1  ;;  %v4342_v24 = vpop.f32.mrb[29].mxu0  ;;  %v1488_v4 = vadd.f32 %v1487_v56, %v4383_v59 }
 0x593   : > { %v4344_v20 = vpop.f32.mrb[30].mxu0  ;;  %v1529_v51 = vadd.f32 %v4342_v24, %v1406_v58 }
 0x594   : > { %v4346_v19 = vpop.f32.mrb[31].mxu0 }
 0x595   : > { %v1533_v49 = vadd.f32 %v4346_v19, %v1411_v55  ;;  %v1490_v19 = vadd.f32 %v4340_v23, %v4383_v59  ;;  %v1478_v23 = vadd.f32 %v4332_v30, %v1411_v55 }
 0x599   : > { %v4348_v25 = vpop.f32.mrb[32].mxu0 }
 0x59a   : > { %v4350_v6 = vpop.f32.mrb[33].mxu0 }
 0x59b   : > { %v4352_v8 = vpop.f32.mrb[34].mxu0  ;;  %v1539_v24 = vadd.f32 %v4350_v6, %v4385_v61  ;;  %v1527_v6 = vadd.f32 %v4338_v10, %v1406_v58 }
 0x59c   : > { %v4354_v21 = vpop.f32.mrb[35].mxu0  ;;  %v1541_v30 = vadd.f32 %v4352_v8, %v4383_v59 }
 0x631   : > { %v3701_v26 = vpop.f32.mrb[32].mxu1 }
 0x632   : > { %1629 = vperm.xlu1 %3801, %v3701_v26   ;;  %1654 = vperm.xlu0 %3802, %v3701_v26   ;;  %v1602_v27 = vpop.f32.mrb[33].mxu1 }
 0x633   : > { %v3702_v28 = vpop.f32.mrb[34].mxu1 }
 0x634   : > { %v1605_v38 = vpop.f32.mrb[35].mxu1 }
 0x636   : > { %3803 = vset.pattern.permute.xlu1 %v3892_v3  ;;  %3809 = vset.pattern.permute.xlu0 %v3891_v5 }
 0x637   : > { %1702 = vperm.xlu1 %3803, %v3701_v26   ;;  %1634 = vperm.xlu0 %3809, %v3702_v28  }
 0x63b   : > { %3804 = vset.pattern.permute.xlu1 %v3890_v2  ;;  %3811 = vset.pattern.permute.xlu0 %v3890_v2 }
 0x63c   : > { %1646 = vperm.xlu1 %3804, %v1602_v27   ;;  %1650 = vperm.xlu0 %3811, %v1605_v38  }
 0x640   : > { %3805 = vset.pattern.permute.xlu1 %v3891_v5  ;;  %3813 = vset.pattern.permute.xlu0 %v3892_v3 }
 0x641   : > { %1619 = vperm.xlu1 %3805, %v1602_v27   ;;  %1698 = vperm.xlu0 %3813, %v1605_v38  }
 0x645   : > { %3806 = vset.pattern.permute.xlu1 %v3892_v3  ;;  %3814 = vset.pattern.permute.xlu0 %v3889_v1 }
 0x646   : > { %1694 = vperm.xlu1 %3806, %v1602_v27   ;;  %1678 = vperm.xlu0 %3814, %v3701_v26  }
 0x64a   : > { %3807 = vset.pattern.permute.xlu1 %v3889_v1  ;;  %3817 = vset.pattern.permute.xlu0 %v3891_v5 }
 0x64b   : > { %1670 = vperm.xlu1 %3807, %v1602_v27   ;;  %1991 = vperm.xlu0 %3817, %v3581_v46  }
 0x64f   : > { %3808 = vset.pattern.permute.xlu1 %v3890_v2 }
 0x650   : > { %1658 = vperm.xlu1 %3808, %v3702_v28  }
 0x654   : > { %3810 = vset.pattern.permute.xlu1 %v3892_v3 }
 0x655   : > { %1706 = vperm.xlu1 %3810, %v3702_v28  }
 0x659   : > { %3812 = vset.pattern.permute.xlu1 %v3891_v5 }
 0x65a   : > { %1624 = vperm.xlu1 %3812, %v1605_v38  }
 0x65e   : > { %3815 = vset.pattern.permute.xlu1 %v3889_v1 }
 0x65f   : > { %1674 = vperm.xlu1 %3815, %v1605_v38   ;;  %v1486_v38 = vadd.f32 %v4336_v11, %v4385_v61 }
 0x663   : > { %1682 = vperm.xlu1 %3815, %v3702_v28  }
 0x667   : > { %3816 = vset.pattern.permute.xlu1 %v3891_v5 }
 0x668   : > { %1986 = vperm.xlu1 %3816, %v3580_v35  }
 0x66c   : > { %1996 = vperm.xlu1 %3816, %v3582_v37  }
 0x670   : > { %2001 = vperm.xlu1 %3816, %v3583_v29  }
 0x6b1   : > { %v1630_v53 = vpop.permute.xlu1 %1629  ;;  %v1655_v62 = vpop.permute.xlu0 %1654 }
 0x6b2   : > { %v1639_v44 = vadd.f32 %v1630_v53, %v1484_v63  ;;  %v1663_v35 = vadd.f32 %v1655_v62, %v1486_v38  ;;  %v1543_v63 = vadd.f32 %v4354_v21, %v4383_v59  ;;  %v1531_v21 = vadd.f32 %v4344_v20, %v1411_v55  ;;  %v3861_v20 = vld [vmem:[%s4810_s8 + $0x10] sm:$0xff]   ;;  %v3862_v59 = vld [vmem:[%s4810_s8 + $0x18] sm:$0xff]  }
 0x6b4   : > { %v1643_v12 = vmax.f32 %v1639_v44, 0.0  ;;  %v1667_v29 = vmax.f32 %v1663_v35, 0.0 }
 0x6b6   : > { %v1703_v32 = vpop.permute.xlu1 %1702  ;;  %v1635_v9 = vpop.permute.xlu0 %1634 }
 0x6b7   : > { %v1640_v0 = vadd.f32 %v1635_v9, %v1488_v4  ;;  %v1711_v4 = vadd.f32 %v1703_v32, %v1539_v24 }
 0x6b9   : > { %v1644_v13 = vmax.f32 %v1640_v0, 0.0  ;;  %v1474_v0 = vadd.f32 %v4328_v33, %v1406_v58  ;;  %v1537_v33 = vadd.f32 %v4348_v25, %v4385_v61 }
 0x6bb   : > { %v4391_v57 = vpack.c.bf16 %v1644_v13, %v1643_v12  ;;  %v1647_v15 = vpop.permute.xlu1 %1646  ;;  %v1651_v17 = vpop.permute.xlu0 %1650  ;;  %v1715_v12 = vmax.f32 %v1711_v4, 0.0 }
 0x6bc   : > { %v1661_v42 = vadd.f32 %v1647_v15, %v1476_v40  ;;  %v1662_v47 = vadd.f32 %v1651_v17, %v1480_v16 }
 0x6be   : > { %v1665_v43 = vmax.f32 %v1661_v42, 0.0  ;;  %v1666_v48 = vmax.f32 %v1662_v47, 0.0 }
 0x6c0   : > { %v4393_v14 = vpack.c.bf16 %v1666_v48, %v1665_v43  ;;  %v1620_v52 = vpop.permute.xlu1 %1619  ;;  %v1699_v45 = vpop.permute.xlu0 %1698 }
 0x6c1   : > { %v1710_v34 = vadd.f32 %v1699_v45, %v1533_v49  ;;  %v1637_v62 = vadd.f32 %v1620_v52, %v1474_v0 }
 0x6c2   : > { %1746 = vmatprep.subr.bf16.mxu0 %v4393_v14 }
 0x6c3   : > { %v1714_v56 = vmax.f32 %v1710_v34, 0.0  ;;  %v1641_v17 = vmax.f32 %v1637_v62, 0.0 }
 0x6c5   : > { %v1695_v31 = vpop.permute.xlu1 %1694  ;;  %v1679_v47 = vpop.permute.xlu0 %1678 }
 0x6c6   : > { %v1709_v7 = vadd.f32 %v1695_v31, %v1529_v51  ;;  %v1687_v52 = vadd.f32 %v1679_v47, %v1537_v33 }
 0x6c8   : > { %v1713_v26 = vmax.f32 %v1709_v7, 0.0  ;;  %v1691_v55 = vmax.f32 %v1687_v52, 0.0 }
 0x6ca   : > { %v1671_v27 = vpop.permute.xlu1 %1670  ;;  %v4398_v28 = vpack.c.bf16 %v1714_v56, %v1713_v26 }
 0x6cb   : > { %v1685_v32 = vadd.f32 %v1671_v27, %v1527_v6 }
 0x6cc   : > { %1799 = vmatprep.subr.bf16.mxu1 %v4398_v28 }
 0x6cd   : > { %v1689_v49 = vmax.f32 %v1685_v32, 0.0 }
 0x6cf   : > { %v1659_v46 = vpop.permute.xlu1 %1658 }
 0x6d0   : > { %v1664_v37 = vadd.f32 %v1659_v46, %v1490_v19 }
 0x6d2   : > { %v1668_v53 = vmax.f32 %v1664_v37, 0.0 }
 0x6d4   : > { %v1707_v44 = vpop.permute.xlu1 %1706  ;;  %v1727_v9 = vpack.c.bf16 %v1668_v53, %v1667_v29 }
 0x6d5   : > { %v1712_v11 = vadd.f32 %v1707_v44, %v1543_v63 }
 0x6d7   : > { %v1716_v13 = vmax.f32 %v1712_v11, 0.0 }
 0x6d9   : > { %v1625_v40 = vpop.permute.xlu1 %1624  ;;  %v1729_v16 = vpack.c.bf16 %v1716_v13, %v1715_v12 }
 0x6da   : > { %v1638_v15 = vadd.f32 %v1625_v40, %v1478_v23 }
 0x6dc   : > { %v1642_v42 = vmax.f32 %v1638_v15, 0.0 }
 0x6de   : > { %v1722_v43 = vpack.c.bf16 %v1642_v42, %v1641_v17  ;;  %v1675_v48 = vpop.permute.xlu1 %1674 }
 0x6df   : > { %v1686_v45 = vadd.f32 %v1675_v48, %v1531_v21 }
 0x6e0   : > { %1747 = vmatpush1.bf16.msra.mxu0 %v1722_v43 }
 0x6e1   : > { %v1690_v51 = vmax.f32 %v1686_v45, 0.0  ;;  %1748 = vmatprep.subr.bf16.mxu0 %v1727_v9 }
 0x6e2   : > { %v1683_v10 = vpop.permute.xlu1 %1682 }
 0x6e3   : > { %v1724_v58 = vpack.c.bf16 %v1690_v51, %v1689_v49  ;;  %v1688_v34 = vadd.f32 %v1683_v10, %v1541_v30 }
 0x6e4   : > { %1749 = vmatpush1.bf16.msra.mxu0 %v4391_v57 }
 0x6e5   : > { %v1692_v25 = vmax.f32 %v1688_v34, 0.0  ;;  %1800 = vmatpush1.bf16.msra.mxu1 %v1724_v58  ;;  %1868 = vmatprep.subr.bf16.mxu0 %v4235_v39 }
 0x6e6   : > { %1801 = vmatprep.subr.bf16.mxu1 %v1729_v16 }
 0x6e7   : > { %v1728_v8 = vpack.c.bf16 %v1692_v25, %v1691_v55  ;;  %3566 = vmatmul.mubr.msk.bf16.vlgmr.msra.gmra.mrb[36].mxu0 %vm656_vm0, %v3861_v20  ;;  %v1987_v39 = vpop.permute.xlu1 %1986 }
 0x6e8   : > { %1869 = vmatpush1.bf16.msra.mxu0 %v4240_v22  ;;  %1788 = vmatprep.mubr.bf16.mxu0 %v3891_v5 }
 0x6e9   : > { %1802 = vmatpush1.bf16.msra.mxu1 %v1728_v8  ;;  %1870 = vmatprep.subr.bf16.mxu0 %v4227_v54  ;;  %v3863_v54 = vld [vmem:[%s4810_s8] sm:$0xff]  }
 0x6ea   : > { %1921 = vmatprep.subr.bf16.mxu1 %v4244_v60  ;;  %v1992_v60 = vpop.permute.xlu0 %1991 }
 0x6eb   : > { %v1997_v26 = vpop.permute.xlu1 %1996 }
 0x6ec   : > { %3568 = vmatmul.mubr.msk.bf16.vlgmr.msra.gmra.mrb[36].mxu1 %vm656_vm0, %v3861_v20  ;;  %1871 = vmatpush1.bf16.msra.mxu0 %v4231_v50  ;;  %v3866_v50 = vld [vmem:[%s4805_s3 + $0x28] sm:$0xff]  }
 0x6ed   : > { %1922 = vmatpush1.bf16.msra.mxu1 %v4219_v36  ;;  %2020 = vmatprep.subr.bf16.mxu0 %v4393_v14  ;;  %v3864_v36 = vld [vmem:[%s4810_s8 + $0x8] sm:$0xff]  }
 0x6ee   : > { %1923 = vmatprep.subr.bf16.mxu1 %v4225_v41  ;;  %1841 = vmatprep.mubr.bf16.mxu1 %v3891_v5  ;;  %v3865_v41 = vld [vmem:[%s4805_s3 + $0x20] sm:$0xff]  }
 0x6ef   : > { %3567 = vmatmul.mubr.msk.bf16.gmra.mrb[40].mxu0 %vm656_vm0, %v3862_v59  ;;  %v2002_v23 = vpop.permute.xlu1 %2001 }
 0x6f0   : > { %1900 = vmatprep.mubr.bf16.mxu0 %v3891_v5 }
 0x6f1   : > { %1924 = vmatpush1.bf16.msra.mxu1 %v4262_v18 }
 0x6f2   : > { %2073 = vmatprep.subr.bf16.mxu1 %v4398_v28 }
 0x6f4   : > { %3569 = vmatmul.mubr.msk.bf16.gmra.mrb[40].mxu1 %vm656_vm0, %v3862_v59 }
 0x6f5   : > { %1953 = vmatprep.mubr.bf16.mxu1 %v3891_v5 }
 0x6f7   : > { %3572 = vmatmul.mubr.msk.bf16.vlgmr.msra.gmra.mrb[36].mxu0 %vm656_vm0, %v3863_v54 }
 0x6f8   : > { %2021 = vmatpush1.bf16.msra.mxu0 %v1722_v43  ;;  %1910 = vmatprep.mubr.bf16.mxu0 %v3891_v5 }
 0x6f9   : > { %2022 = vmatprep.subr.bf16.mxu0 %v1727_v9 }
 0x6fc   : > { %2023 = vmatpush1.bf16.msra.mxu0 %v4391_v57  ;;  %3574 = vmatmul.mubr.msk.bf16.vlgmr.msra.gmra.mrb[36].mxu1 %vm656_vm0, %v3863_v54  ;;  %v3867_v54 = vld [vmem:[%s4807_s5 + $0x20] sm:$0xff]  }
 0x6fd   : > { %2074 = vmatpush1.bf16.msra.mxu1 %v1724_v58  ;;  %1963 = vmatprep.mubr.bf16.mxu1 %v3891_v5 }
 0x6fe   : > { %2075 = vmatprep.subr.bf16.mxu1 %v1729_v16 }
 0x6ff   : > { %3573 = vmatmul.mubr.msk.bf16.gmra.mrb[40].mxu0 %vm656_vm0, %v3864_v36 }
 0x700   : > { %2052 = vmatprep.mubr.bf16.mxu0 %v3891_v5 }
 0x701   : > { %2076 = vmatpush1.bf16.msra.mxu1 %v1728_v8 }
 0x704   : > { %3575 = vmatmul.mubr.msk.bf16.gmra.mrb[40].mxu1 %vm656_vm0, %v3864_v36 }
 0x705   : > { %2105 = vmatprep.mubr.bf16.mxu1 %v3891_v5 }
 0x707   : > { %3586 = vmatmul.mubr.msk.bf16.vlgmr.msra.gmra.mrb[44].mxu0 %vm656_vm0, %v3865_v41 }
 0x708   : > { %2062 = vmatprep.mubr.bf16.mxu0 %v3891_v5 }
 0x70c   : > { %3588 = vmatmul.mubr.msk.bf16.vlgmr.msra.gmra.mrb[44].mxu1 %vm656_vm0, %v3865_v41 }
 0x70d   : > { %2115 = vmatprep.mubr.bf16.mxu1 %v3891_v5 }
 0x70f   : > { %3587 = vmatmul.mubr.msk.bf16.gmra.mrb[48].mxu0 %vm656_vm0, %v3866_v50 }
 0x710   : > { %2272 = vmatprep.mubr.bf16.mxu0 %v3891_v5 }
 0x714   : > { %3589 = vmatmul.mubr.msk.bf16.gmra.mrb[48].mxu1 %vm656_vm0, %v3866_v50 }
 0x715   : > { %2325 = vmatprep.mubr.bf16.mxu1 %v3891_v5 }
 0x7da   : > { %v2054_v22 = vpop.f32.mrb[44].mxu0 }
 0x7db   : > { %v2055_v18 = vadd.f32 %v2054_v22, %v1987_v39  ;;  %v2056_v61 = vpop.f32.mrb[45].mxu0  ;;  %v3868_v22 = vld [vmem:[%s4807_s5 + $0x28] sm:$0xff]  }
 0x7dc   : > { %v2057_v57 = vadd.f32 %v2056_v61, %v1987_v39  ;;  %v2058_v14 = vpop.f32.mrb[46].mxu0  ;;  %v3869_v61 = vld [vmem:[%s4808_s6 + $0x20] sm:$0xff]  }
 0x7dd   : > { %v2126_v31 = vmax.f32 %v2055_v18, 0.0  ;;  %v2059_v7 = vadd.f32 %v2058_v14, %v1992_v60  ;;  %v2060_v56 = vpop.f32.mrb[47].mxu0  ;;  %v3596_v18 = vld [vmem:[%s4809_s7 + $0x50] sm:$0xff]  ;;  %v3597_v14 = vld [vmem:[%s4809_s7 + $0x58] sm:$0xff] }
 0x7de   : > { %v2061_v27 = vadd.f32 %v2060_v56, %v1992_v60  ;;  %v2127_v19 = vmax.f32 %v2057_v57, 0.0  ;;  %v3595_v57 = vld [vmem:[%s4809_s7 + $0x48] sm:$0xff] }
 0x7df   : > { %v2130_v28 = vmax.f32 %v2059_v7, 0.0  ;;  %v2107_v38 = vpop.f32.mrb[44].mxu1  ;;  %2142 = vmax.xlane.f32.xlu0 %v2126_v31 }
 0x7e0   : > { %v2131_v35 = vmax.f32 %v2061_v27, 0.0  ;;  %v2108_v46 = vadd.f32 %v2107_v38, %v1987_v39  ;;  %v2109_v37 = vpop.f32.mrb[45].mxu1 }
 0x7e1   : > { %v2110_v24 = vadd.f32 %v2109_v37, %v1987_v39  ;;  %v2111_v29 = vpop.f32.mrb[46].mxu1  ;;  %v2191_v53 = vpack.c.bf16 %v2130_v28, %v2126_v31 }
 0x7e2   : > { %v2192_v63 = vpack.c.bf16 %v2131_v35, %v2127_v19  ;;  %v2128_v4 = vmax.f32 %v2108_v46, 0.0  ;;  %v2112_v44 = vadd.f32 %v2111_v29, %v1992_v60  ;;  %v2064_v9 = vpop.f32.mrb[48].mxu0  ;;  %v2113_v11 = vpop.f32.mrb[47].mxu1 }
 0x7e3   : > { %v2065_v0 = vadd.f32 %v2064_v9, %v1997_v26  ;;  %v2114_v12 = vadd.f32 %v2113_v11, %v1992_v60  ;;  %v2066_v13 = vpop.f32.mrb[49].mxu0  ;;  %2150 = vmax.xlane.f32.xlu0 %v2127_v19  ;;  %v2129_v15 = vmax.f32 %v2110_v24, 0.0  ;;  %v3594_v60 = vld [vmem:[%s4809_s7 + $0x40] sm:$0xff] }
 0x7e4   : > { %v2132_v62 = vmax.f32 %v2112_v44, 0.0  ;;  %v2067_v40 = vadd.f32 %v2066_v13, %v1997_v26  ;;  %2158 = vmax.xlane.f32.xlu1 %v2128_v4  ;;  %v2068_v16 = vpop.f32.mrb[50].mxu0  ;;  %2240 = vmatprep.subr.bf16.mxu0 %v2192_v63 }
 0x7e5   : > { %v2133_v6 = vmax.f32 %v2114_v12, 0.0  ;;  %v2069_v17 = vadd.f32 %v2068_v16, %v2002_v23  ;;  %v2070_v42 = vpop.f32.mrb[51].mxu0  ;;  %2241 = vmatpush1.bf16.msra.mxu0 %v2191_v53  ;;  %v2134_v47 = vmax.f32 %v2065_v0, 0.0 }
 0x7e6   : > { %v2193_v21 = vpack.c.bf16 %v2132_v62, %v2128_v4  ;;  %v2071_v32 = vadd.f32 %v2070_v42, %v2002_v23  ;;  %v2135_v45 = vmax.f32 %v2067_v40, 0.0 }
 0x7e7   : > { %v2194_v43 = vpack.c.bf16 %v2133_v6, %v2129_v15  ;;  %v2138_v48 = vmax.f32 %v2069_v17, 0.0  ;;  %v2117_v33 = vpop.f32.mrb[48].mxu1  ;;  %2160 = vmax.xlane.f32.xlu0 %v2132_v62 }
 0x7e8   : > { %v2139_v30 = vmax.f32 %v2071_v32, 0.0  ;;  %v2118_v52 = vadd.f32 %v2117_v33, %v1997_v26  ;;  %v2119_v49 = vpop.f32.mrb[49].mxu1  ;;  %2166 = vmax.xlane.f32.xlu1 %v2129_v15 }
 0x7e9   : > { %v2195_v51 = vpack.c.bf16 %v2138_v48, %v2134_v47  ;;  %v2120_v10 = vadd.f32 %v2119_v49, %v1997_v26  ;;  %v2121_v58 = vpop.f32.mrb[50].mxu1  ;;  %2293 = vmatprep.subr.bf16.mxu1 %v2194_v43 }
 0x7ea   : > { %v2196_v34 = vpack.c.bf16 %v2139_v30, %v2135_v45  ;;  %v2122_v20 = vadd.f32 %v2121_v58, %v2002_v23  ;;  %v2123_v55 = vpop.f32.mrb[51].mxu1  ;;  %2294 = vmatpush1.bf16.msra.mxu1 %v2193_v21  ;;  %v2136_v8 = vmax.f32 %v2118_v52, 0.0  ;;  %v3870_v21 = vld [vmem:[%s4808_s6 + $0x28] sm:$0xff]  }
 0x7eb   : > { %v2124_v25 = vadd.f32 %v2123_v55, %v2002_v23  ;;  %2152 = vmax.xlane.f32.xlu0 %v2131_v35  ;;  %v2137_v36 = vmax.f32 %v2120_v10, 0.0 }
 0x7ec   : > { %v2140_v59 = vmax.f32 %v2122_v20, 0.0  ;;  %2144 = vmax.xlane.f32.xlu1 %v2130_v28  ;;  %2242 = vmatprep.subr.bf16.mxu0 %v2196_v34 }
 0x7ed   : > { %v2141_v41 = vmax.f32 %v2124_v25, 0.0  ;;  %2243 = vmatpush1.bf16.msra.mxu0 %v2195_v51 }
 0x7ee   : > { %v2197_v50 = vpack.c.bf16 %v2140_v59, %v2136_v8 }
 0x7ef   : > { %v2198_v39 = vpack.c.bf16 %v2141_v41, %v2137_v36  ;;  %2168 = vmax.xlane.f32.xlu0 %v2133_v6 }
 0x7f0   : > { %2146 = vmax.xlane.f32.xlu1 %v2134_v47  ;;  %3600 = vmatmul.mubr.msk.bf16.vlgmr.msra.gmra.mrb[52].mxu0 %vm656_vm0, %v3867_v54 }
 0x7f1   : > { %2295 = vmatprep.subr.bf16.mxu1 %v2198_v39  ;;  %2282 = vmatprep.mubr.bf16.mxu0 %v3891_v5  ;;  %v3626_v39 = vld [vmem:[%s4806_s4 + $0x60] sm:$0xff] }
 0x7f2   : > { %2296 = vmatpush1.bf16.msra.mxu1 %v2197_v50  ;;  %v3629_v50 = vld [vmem:[%s4806_s4 + $0x78] sm:$0xff] }
 0x7f3   : > { %2148 = vmax.xlane.f32.xlu0 %v2138_v48 }
 0x7f4   : > { %2162 = vmax.xlane.f32.xlu1 %v2136_v8 }
 0x7f5   : > { %3602 = vmatmul.mubr.msk.bf16.vlgmr.msra.gmra.mrb[52].mxu1 %vm656_vm0, %v3867_v54 }
 0x7f6   : > { %2335 = vmatprep.mubr.bf16.mxu1 %v3891_v5 }
 0x7f7   : > { %2164 = vmax.xlane.f32.xlu0 %v2140_v59 }
 0x7f8   : > { %2154 = vmax.xlane.f32.xlu1 %v2135_v45  ;;  %3601 = vmatmul.mubr.msk.bf16.gmra.mrb[56].mxu0 %vm656_vm0, %v3868_v22 }
 0x7f9   : > { %3707 = vmatprep.mubr.msk.bf16.mxu0 %vm656_vm0, %v3869_v61 }
 0x7fb   : > { %2156 = vmax.xlane.f32.xlu0 %v2139_v30 }
 0x7fc   : > { %2170 = vmax.xlane.f32.xlu1 %v2137_v36 }
 0x7fd   : > { %3603 = vmatmul.mubr.msk.bf16.gmra.mrb[56].mxu1 %vm656_vm0, %v3868_v22  ;;  %v3628_v22 = vld [vmem:[%s4806_s4 + $0x70] sm:$0xff] }
 0x7fe   : > { %2632 = vmatprep.mubr.bf16.mxu1 %v3891_v5 }
 0x7ff   : > { %2172 = vmax.xlane.f32.xlu0 %v2141_v41  ;;  %v3627_v41 = vld [vmem:[%s4806_s4 + $0x68] sm:$0xff] }
 0x80d   : > { %2206 = vperm.xlu1 %3816, %v3594_v60  }
 0x811   : > { %2216 = vperm.xlu1 %3816, %v3596_v18  }
 0x815   : > { %2211 = vperm.xlu0 %3817, %v3595_v57   ;;  %3819 = vset.pattern.permute.xlu1 %v3889_v1 }
 0x819   : > { %2221 = vperm.xlu0 %3817, %v3597_v14  }
 0x81d   : > { %3818 = vset.pattern.permute.xlu0 %v3892_v3 }
 0x86c   : > { %v2143_v31 = vpop.xlane.xlu0 %2142 }
 0x870   : > { %v2151_v7 = vpop.xlane.xlu0 %2150 }
 0x871   : > { %v2159_v56 = vpop.xlane.xlu1 %2158  ;;  %v2174_v38 = vsel %vm817_vm1, %v2143_v31, %v2151_v7 }
 0x872   : > { %v2178_v37 = vsel %vm822_vm2, %v2174_v38, %v2159_v56 }
 0x874   : > { %v2161_v26 = vpop.xlane.xlu0 %2160 }
 0x875   : > { %v2167_v27 = vpop.xlane.xlu1 %2166 }
 0x876   : > { %v2182_v29 = vsel %vm827_vm3, %v2178_v37, %v2167_v27 }
 0x878   : > { %v2153_v28 = vpop.xlane.xlu0 %2152 }
 0x879   : > { %v2145_v19 = vpop.xlane.xlu1 %2144 }
 0x87a   : > { %v2175_v35 = vsel %vm817_vm1, %v2145_v19, %v2153_v28 }
 0x87b   : > { %v2179_v46 = vsel %vm822_vm2, %v2175_v35, %v2161_v26 }
 0x87c   : > { %v2169_v24 = vpop.xlane.xlu0 %2168 }
 0x87d   : > { %v2183_v53 = vsel %vm827_vm3, %v2179_v46, %v2169_v24  ;;  %v2147_v63 = vpop.xlane.xlu1 %2146 }
 0x87e   : > { %v2351_v4 = vpack.c.bf16 %v2183_v53, %v2182_v29 }
 0x880   : > { %v2149_v44 = vpop.xlane.xlu0 %2148  ;;  %3703 = vmatprep.subr.bf16.mxu0 %v2351_v4 }
 0x881   : > { %v2163_v9 = vpop.xlane.xlu1 %2162  ;;  %3704 = vmatpush3.bf16.msra.mxu0 %v2351_v4 }
 0x884   : > { %v2165_v11 = vpop.xlane.xlu0 %2164 }
 0x885   : > { %v2155_v0 = vpop.xlane.xlu1 %2154 }
 0x886   : > { %v2176_v13 = vsel %vm817_vm1, %v2147_v63, %v2155_v0 }
 0x887   : > { %v2180_v40 = vsel %vm822_vm2, %v2176_v13, %v2163_v9 }
 0x888   : > { %v2157_v12 = vpop.xlane.xlu0 %2156 }
 0x889   : > { %v2177_v23 = vsel %vm817_vm1, %v2149_v44, %v2157_v12  ;;  %v2171_v62 = vpop.xlane.xlu1 %2170 }
 0x88a   : > { %v2181_v16 = vsel %vm822_vm2, %v2177_v23, %v2165_v11  ;;  %v2184_v6 = vsel %vm827_vm3, %v2180_v40, %v2171_v62 }
 0x88c   : > { %v2173_v15 = vpop.xlane.xlu0 %2172 }
 0x88d   : > { %v2185_v17 = vsel %vm827_vm3, %v2181_v16, %v2173_v15  ;;  %v2207_v60 = vpop.permute.xlu1 %2206 }
 0x88e   : > { %v2352_v42 = vpack.c.bf16 %v2185_v17, %v2184_v6 }
 0x890   : > { %3705 = vmatprep.subr.bf16.mxu0 %v2352_v42 }
 0x891   : > { %3706 = vmatpush3.bf16.msra.mxu0 %v2352_v42  ;;  %v4568_v61 = vpop.permute.xlu1 %2216 }
 0x894   : > { %3708 = vmatmul.mubr.msk.bf16.vlgmr.msra.gmra.mrb[60].mxu0 %vm656_vm0, %v3870_v21  ;;  %v2212_v18 = vpop.permute.xlu0 %2211 }
 0x895   : > { %2579 = vmatprep.mubr.bf16.mxu0 %v3891_v5 }
 0x898   : > { %v4570_v57 = vpop.permute.xlu0 %2221 }
 0x8c3   : > { %v4519_v32 = vpop.f32.mrb[52].mxu0 }
 0x8c4   : > { %v4521_v47 = vpop.f32.mrb[53].mxu0 }
 0x8c5   : > { %v4523_v43 = vpop.f32.mrb[54].mxu0 }
 0x8c6   : > { %v4525_v48 = vpop.f32.mrb[55].mxu0 }
 0x8c8   : > { %v4527_v33 = vpop.f32.mrb[52].mxu1 }
 0x8c9   : > { %v4529_v45 = vpop.f32.mrb[53].mxu1 }
 0x8ca   : > { %v4531_v30 = vpop.f32.mrb[54].mxu1  ;;  %v2330_v6 = vadd.f32 %v4529_v45, %v2207_v60  ;;  %v2277_v45 = vadd.f32 %v4521_v47, %v2207_v60 }
 0x8cb   : > { %v4533_v52 = vpop.f32.mrb[56].mxu0  ;;  %v4535_v49 = vpop.f32.mrb[55].mxu1 }
 0x8cc   : > { %v4537_v51 = vpop.f32.mrb[57].mxu0  ;;  %v2334_v21 = vadd.f32 %v4535_v49, %v2212_v18  ;;  %v2281_v49 = vadd.f32 %v4525_v48, %v2212_v18  ;;  %v3871_v48 = vld [vmem:[%s4810_s8 + $0x20] sm:$0xff]  }
 0x8cd   : > { %v4539_v10 = vpop.f32.mrb[58].mxu0  ;;  %v2287_v0 = vadd.f32 %v4537_v51, %v4568_v61 }
 0x8ce   : > { %v4541_v58 = vpop.f32.mrb[59].mxu0 }
 0x8cf   : > { %v2291_v23 = vadd.f32 %v4541_v58, %v4570_v57  ;;  %v2332_v58 = vadd.f32 %v4531_v30, %v2212_v18 }
 0x8d0   : > { %v2337_v34 = vpop.f32.mrb[56].mxu1 }
 0x8d1   : > { %v2339_v20 = vpop.f32.mrb[57].mxu1  ;;  %v2338_v28 = vadd.f32 %v2337_v34, %v4568_v61 }
 0x8d2   : > { %v2341_v55 = vpop.f32.mrb[58].mxu1  ;;  %v2340_v24 = vadd.f32 %v2339_v20, %v4568_v61 }
 0x8d3   : > { %v2343_v25 = vpop.f32.mrb[59].mxu1  ;;  %v2342_v38 = vadd.f32 %v2341_v55, %v4570_v57 }
 0x8d4   : > { %v2344_v63 = vadd.f32 %v2343_v25, %v4570_v57  ;;  %v2328_v25 = vadd.f32 %v4527_v33, %v2207_v60  ;;  %v2275_v33 = vadd.f32 %v4519_v32, %v2207_v60  ;;  %v2289_v32 = vadd.f32 %v4539_v10, %v4570_v57  ;;  %v3872_v10 = vld [vmem:[%s4810_s8 + $0x28] sm:$0xff]   ;;  %v3873_v57 = vld [vmem:[%s4805_s3 + $0x30] sm:$0xff]  }
 0x967   : > { %v3709_v8 = vpop.f32.mrb[60].mxu0 }
 0x968   : > { %2479 = vperm.xlu1 %3819, %v3709_v8   ;;  %2503 = vperm.xlu0 %3818, %v3709_v8   ;;  %v2403_v59 = vpop.f32.mrb[61].mxu0 }
 0x969   : > { %v3710_v54 = vpop.f32.mrb[62].mxu0 }
 0x96a   : > { %v2406_v36 = vpop.f32.mrb[63].mxu0 }
 0x96c   : > { %3820 = vset.pattern.permute.xlu1 %v3890_v2  ;;  %3822 = vset.pattern.permute.xlu0 %v3889_v1 }
 0x96d   : > { %2455 = vperm.xlu1 %3820, %v3709_v8   ;;  %2471 = vperm.xlu0 %3822, %v2403_v59  }
 0x971   : > { %3821 = vset.pattern.permute.xlu1 %v3892_v3  ;;  %3824 = vset.pattern.permute.xlu0 %v3891_v5 }
 0x972   : > { %2420 = vperm.xlu0 %3824, %v2403_v59   ;;  %2495 = vperm.xlu1 %3821, %v2403_v59  }
 0x976   : > { %3826 = vset.pattern.permute.xlu0 %v3889_v1  ;;  %3823 = vset.pattern.permute.xlu1 %v3890_v2 }
 0x977   : > { %2447 = vperm.xlu1 %3823, %v2403_v59   ;;  %2483 = vperm.xlu0 %3826, %v3710_v54  }
 0x97b   : > { %3825 = vset.pattern.permute.xlu1 %v3892_v3  ;;  %3827 = vset.pattern.permute.xlu0 %v3891_v5 }
 0x97c   : > { %2430 = vperm.xlu0 %3827, %v3709_v8   ;;  %2507 = vperm.xlu1 %3825, %v3710_v54  }
 0x980   : > { %3828 = vset.pattern.permute.xlu1 %v3890_v2  ;;  %2686 = vperm.xlu0 %3827, %v3627_v41  }
 0x981   : > { %2459 = vperm.xlu1 %3828, %v3710_v54  }
 0x984   : > { %2696 = vperm.xlu0 %3827, %v3629_v50  }
 0x985   : > { %3829 = vset.pattern.permute.xlu1 %v3892_v3 }
 0x986   : > { %2499 = vperm.xlu1 %3829, %v2406_v36  }
 0x98a   : > { %3830 = vset.pattern.permute.xlu1 %v3889_v1 }
 0x98b   : > { %2475 = vperm.xlu1 %3830, %v2406_v36  }
 0x98f   : > { %3831 = vset.pattern.permute.xlu1 %v3890_v2 }
 0x990   : > { %2451 = vperm.xlu1 %3831, %v2406_v36  }
 0x994   : > { %3832 = vset.pattern.permute.xlu1 %v3891_v5 }
 0x995   : > { %2425 = vperm.xlu1 %3832, %v2406_v36  }
 0x999   : > { %2435 = vperm.xlu1 %3832, %v3710_v54  }
 0x99d   : > { %2681 = vperm.xlu1 %3832, %v3626_v39  }
 0x9a1   : > { %2691 = vperm.xlu1 %3832, %v3628_v22  }
 0x9e7   : > { %v2480_v14 = vpop.permute.xlu1 %2479  ;;  %v2504_v31 = vpop.permute.xlu0 %2503 }
 0x9e8   : > { %v2488_v19 = vadd.f32 %v2480_v14, %v2338_v28  ;;  %v2512_v4 = vadd.f32 %v2504_v31, %v2340_v24 }
 0x9ea   : > { %v2492_v29 = vmax.f32 %v2488_v19, 0.0  ;;  %v2516_v12 = vmax.f32 %v2512_v4, 0.0 }
 0x9ec   : > { %v2456_v7 = vpop.permute.xlu1 %2455  ;;  %v2472_v56 = vpop.permute.xlu0 %2471 }
 0x9ed   : > { %v2464_v62 = vadd.f32 %v2456_v7, %v2287_v0  ;;  %v2486_v54 = vadd.f32 %v2472_v56, %v2328_v25  ;;  %v2279_v56 = vadd.f32 %v4523_v43, %v2212_v18 }
 0x9ef   : > { %v2468_v17 = vmax.f32 %v2464_v62, 0.0  ;;  %v2490_v39 = vmax.f32 %v2486_v54, 0.0 }
 0x9f1   : > { %v2421_v26 = vpop.permute.xlu0 %2420  ;;  %v2496_v27 = vpop.permute.xlu1 %2495 }
 0x9f2   : > { %v2510_v34 = vadd.f32 %v2496_v27, %v2330_v6 }
 0x9f4   : > { %v2514_v8 = vmax.f32 %v2510_v34, 0.0 }
 0x9f6   : > { %v2448_v35 = vpop.permute.xlu1 %2447  ;;  %v2484_v46 = vpop.permute.xlu0 %2483 }
 0x9f7   : > { %v2489_v37 = vadd.f32 %v2484_v46, %v2342_v38  ;;  %v2462_v14 = vadd.f32 %v2448_v35, %v2277_v45  ;;  %v2438_v38 = vadd.f32 %v2421_v26, %v2275_v33  ;;  %v2285_v35 = vadd.f32 %v4533_v52, %v4568_v61 }
 0x9f9   : > { %v2493_v53 = vmax.f32 %v2489_v37, 0.0  ;;  %v2466_v28 = vmax.f32 %v2462_v14, 0.0  ;;  %v2442_v43 = vmax.f32 %v2438_v38, 0.0 }
 0x9fb   : > { %v4576_v44 = vpack.c.bf16 %v2493_v53, %v2492_v29  ;;  %v2508_v9 = vpop.permute.xlu1 %2507  ;;  %v2431_v47 = vpop.permute.xlu0 %2430 }
 0x9fc   : > { %v2513_v11 = vadd.f32 %v2508_v9, %v2344_v63  ;;  %v2440_v60 = vadd.f32 %v2431_v47, %v2285_v35  ;;  %v3874_v63 = vld [vmem:[%s4805_s3 + $0x38] sm:$0xff]  }
 0x9fe   : > { %v2517_v13 = vmax.f32 %v2513_v11, 0.0  ;;  %v2444_v53 = vmax.f32 %v2440_v60, 0.0 }
 0x9ff   : > { %v2687_v0 = vpop.permute.xlu0 %2686 }
 0xa00   : > { %v4582_v40 = vpack.c.bf16 %v2517_v13, %v2516_v12  ;;  %v2460_v16 = vpop.permute.xlu1 %2459 }
 0xa01   : > { %v2465_v15 = vadd.f32 %v2460_v16, %v2291_v23 }
 0xa03   : > { %v2469_v42 = vmax.f32 %v2465_v15, 0.0 }
 0xa05   : > { %v2528_v20 = vpack.c.bf16 %v2469_v42, %v2468_v17  ;;  %v2500_v55 = vpop.permute.xlu1 %2499 }
 0xa06   : > { %v2511_v51 = vadd.f32 %v2500_v55, %v2334_v21  ;;  %v2697_v55 = vpop.permute.xlu0 %2696 }
 0xa08   : > { %v2515_v59 = vmax.f32 %v2511_v51, 0.0 }
 0xa0a   : > { %v2526_v36 = vpack.c.bf16 %v2515_v59, %v2514_v8  ;;  %v2476_v41 = vpop.permute.xlu1 %2475 }
 0xa0b   : > { %v2487_v50 = vadd.f32 %v2476_v41, %v2332_v58 }
 0xa0c   : > { %2600 = vmatprep.subr.bf16.mxu1 %v2526_v36 }
 0xa0d   : > { %v2491_v22 = vmax.f32 %v2487_v50, 0.0 }
 0xa0f   : > { %v2525_v31 = vpack.c.bf16 %v2491_v22, %v2490_v39  ;;  %v2452_v7 = vpop.permute.xlu1 %2451 }
 0xa10   : > { %v2463_v27 = vadd.f32 %v2452_v7, %v2281_v49 }
 0xa11   : > { %2601 = vmatpush1.bf16.msra.mxu1 %v2525_v31 }
 0xa12   : > { %v2467_v30 = vmax.f32 %v2463_v27, 0.0  ;;  %2602 = vmatprep.subr.bf16.mxu1 %v4582_v40 }
 0xa14   : > { %v2524_v19 = vpack.c.bf16 %v2467_v30, %v2466_v28  ;;  %v2426_v46 = vpop.permute.xlu1 %2425 }
 0xa15   : > { %v2439_v37 = vadd.f32 %v2426_v46, %v2279_v56  ;;  %2603 = vmatpush1.bf16.msra.mxu1 %v4576_v44 }
 0xa16   : > { %2547 = vmatprep.subr.bf16.mxu0 %v2524_v19  ;;  %2715 = vmatprep.subr.bf16.mxu1 %v2524_v19 }
 0xa17   : > { %v2443_v18 = vmax.f32 %v2439_v37, 0.0 }
 0xa18   : > { %3620 = vmatmul.mubr.msk.bf16.vlgmr.msra.gmra.mrb[36].mxu1 %vm656_vm0, %v3871_v48  ;;  %v2436_v26 = vpop.permute.xlu1 %2435 }
 0xa19   : > { %v2523_v24 = vpack.c.bf16 %v2443_v18, %v2442_v43  ;;  %v2441_v29 = vadd.f32 %v2436_v26, %v2289_v32  ;;  %2642 = vmatprep.mubr.bf16.mxu1 %v3891_v5  ;;  %v3875_v32 = vld [vmem:[%s4807_s5 + $0x30] sm:$0xff]  }
 0xa1b   : > { %v2445_v52 = vmax.f32 %v2441_v29, 0.0  ;;  %2548 = vmatpush1.bf16.msra.mxu0 %v2523_v24  ;;  %2716 = vmatpush1.bf16.msra.mxu1 %v2523_v24 }
 0xa1c   : > { %2549 = vmatprep.subr.bf16.mxu0 %v2528_v20  ;;  %2717 = vmatprep.subr.bf16.mxu1 %v2528_v20  ;;  %v2682_v4 = vpop.permute.xlu1 %2681 }
 0xa1d   : > { %v2527_v61 = vpack.c.bf16 %v2445_v52, %v2444_v53 }
 0xa1f   : > { %2550 = vmatpush1.bf16.msra.mxu0 %v2527_v61  ;;  %2718 = vmatpush1.bf16.msra.mxu1 %v2527_v61 }
 0xa20   : > { %3621 = vmatmul.mubr.msk.bf16.gmra.mrb[40].mxu1 %vm656_vm0, %v3872_v10  ;;  %2768 = vmatprep.subr.bf16.mxu0 %v2526_v36  ;;  %v2692_v21 = vpop.permute.xlu1 %2691 }
 0xa21   : > { %2747 = vmatprep.mubr.bf16.mxu1 %v3891_v5 }
 0xa22   : > { %3618 = vmatmul.mubr.msk.bf16.vlgmr.msra.gmra.mrb[36].mxu0 %vm656_vm0, %v3871_v48 }
 0xa23   : > { %2769 = vmatpush1.bf16.msra.mxu0 %v2525_v31  ;;  %2589 = vmatprep.mubr.bf16.mxu0 %v3891_v5 }
 0xa24   : > { %2770 = vmatprep.subr.bf16.mxu0 %v4582_v40 }
 0xa27   : > { %2771 = vmatpush1.bf16.msra.mxu0 %v4576_v44 }
 0xa28   : > { %3632 = vmatmul.mubr.msk.bf16.vlgmr.msra.gmra.mrb[60].mxu1 %vm656_vm0, %v3873_v57 }
 0xa29   : > { %2757 = vmatprep.mubr.bf16.mxu1 %v3891_v5 }
 0xa2a   : > { %3619 = vmatmul.mubr.msk.bf16.gmra.mrb[40].mxu0 %vm656_vm0, %v3872_v10 }
 0xa2b   : > { %2800 = vmatprep.mubr.bf16.mxu0 %v3891_v5 }
 0xa30   : > { %3633 = vmatmul.mubr.msk.bf16.gmra.mrb[64].mxu1 %vm656_vm0, %v3874_v63 }
 0xa31   : > { %2967 = vmatprep.mubr.bf16.mxu1 %v3891_v5 }
 0xa32   : > { %3634 = vmatmul.mubr.msk.bf16.vlgmr.msra.gmra.mrb[64].mxu0 %vm656_vm0, %v3873_v57 }
 0xa33   : > { %2810 = vmatprep.mubr.bf16.mxu0 %v3891_v5 }
 0xa3a   : > { %3635 = vmatmul.mubr.msk.bf16.gmra.mrb[68].mxu0 %vm656_vm0, %v3874_v63 }
 0xa3b   : > { %3020 = vmatprep.mubr.bf16.mxu0 %v3891_v5 }
 0xafb   : > { %v2749_v44 = vpop.f32.mrb[60].mxu1 }
 0xafc   : > { %v2750_v9 = vadd.f32 %v2749_v44, %v2682_v4  ;;  %v2751_v11 = vpop.f32.mrb[61].mxu1  ;;  %v3876_v44 = vld [vmem:[%s4807_s5 + $0x38] sm:$0xff]  }
 0xafd   : > { %v2752_v12 = vadd.f32 %v2751_v11, %v2682_v4  ;;  %v2753_v13 = vpop.f32.mrb[62].mxu1  ;;  %v3643_v11 = vld [vmem:[%s4809_s7 + $0x78] sm:$0xff] }
 0xafe   : > { %v2821_v23 = vmax.f32 %v2750_v9, 0.0  ;;  %v4628_v62 = vadd.f32 %v2753_v13, %v2687_v0  ;;  %v2755_v40 = vpop.f32.mrb[63].mxu1  ;;  %v3641_v9 = vld [vmem:[%s4809_s7 + $0x68] sm:$0xff]  ;;  %v3642_v13 = vld [vmem:[%s4809_s7 + $0x70] sm:$0xff] }
 0xaff   : > { %v2756_v16 = vadd.f32 %v2755_v40, %v2687_v0  ;;  %v2822_v6 = vmax.f32 %v2752_v12, 0.0  ;;  %v3877_v12 = vld [vmem:[%s4808_s6 + $0x30] sm:$0xff]  }
 0xb00   : > { %v2825_v15 = vmax.f32 %v4628_v62, 0.0  ;;  %2837 = vmax.xlane.f32.xlu1 %v2821_v23 }
 0xb01   : > { %v2826_v17 = vmax.f32 %v2756_v16, 0.0 }
 0xb02   : > { %v2886_v42 = vpack.c.bf16 %v2825_v15, %v2821_v23 }
 0xb03   : > { %v2887_v34 = vpack.c.bf16 %v2826_v17, %v2822_v6  ;;  %v2759_v20 = vpop.f32.mrb[64].mxu1 }
 0xb04   : > { %v2760_v51 = vadd.f32 %v2759_v20, %v2692_v21  ;;  %v2761_v25 = vpop.f32.mrb[65].mxu1 }
 0xb05   : > { %v4633_v8 = vadd.f32 %v2761_v25, %v2692_v21  ;;  %v2763_v59 = vpop.f32.mrb[66].mxu1  ;;  %v2802_v58 = vpop.f32.mrb[64].mxu0  ;;  %2935 = vmatprep.subr.bf16.mxu1 %v2887_v34 }
 0xb06   : > { %v2764_v54 = vadd.f32 %v2763_v59, %v2697_v55  ;;  %v2803_v36 = vadd.f32 %v2802_v58, %v2682_v4  ;;  %v2765_v41 = vpop.f32.mrb[67].mxu1  ;;  %v2804_v50 = vpop.f32.mrb[65].mxu0  ;;  %2936 = vmatpush1.bf16.msra.mxu1 %v2886_v42  ;;  %v2829_v49 = vmax.f32 %v2760_v51, 0.0 }
 0xb07   : > { %v2766_v45 = vadd.f32 %v2765_v41, %v2697_v55  ;;  %v2805_v39 = vadd.f32 %v2804_v50, %v2682_v4  ;;  %v2806_v22 = vpop.f32.mrb[66].mxu0  ;;  %v2830_v33 = vmax.f32 %v4633_v8, 0.0 }
 0xb08   : > { %v2833_v14 = vmax.f32 %v2764_v54, 0.0  ;;  %v2823_v31 = vmax.f32 %v2803_v36, 0.0  ;;  %v2807_v7 = vadd.f32 %v2806_v22, %v2687_v0  ;;  %v2808_v27 = vpop.f32.mrb[67].mxu0 }
 0xb09   : > { %v2834_v28 = vmax.f32 %v2766_v45, 0.0  ;;  %v2809_v30 = vadd.f32 %v2808_v27, %v2687_v0  ;;  %v2824_v19 = vmax.f32 %v2805_v39, 0.0  ;;  %v3640_v0 = vld [vmem:[%s4809_s7 + $0x60] sm:$0xff] }
 0xb0a   : > { %v2890_v56 = vpack.c.bf16 %v2833_v14, %v2829_v49  ;;  %v2827_v38 = vmax.f32 %v2807_v7, 0.0  ;;  %2853 = vmax.xlane.f32.xlu0 %v2823_v31 }
 0xb0b   : > { %v2891_v47 = vpack.c.bf16 %v2834_v28, %v2830_v33  ;;  %v2828_v46 = vmax.f32 %v2809_v30, 0.0 }
 0xb0c   : > { %v2888_v48 = vpack.c.bf16 %v2827_v38, %v2823_v31  ;;  %2855 = vmax.xlane.f32.xlu1 %v2827_v38 }
 0xb0d   : > { %v2889_v35 = vpack.c.bf16 %v2828_v46, %v2824_v19  ;;  %v2812_v37 = vpop.f32.mrb[68].mxu0  ;;  %2937 = vmatprep.subr.bf16.mxu1 %v2891_v47 }
 0xb0e   : > { %v2813_v43 = vadd.f32 %v2812_v37, %v2692_v21  ;;  %v2814_v60 = vpop.f32.mrb[69].mxu0  ;;  %2938 = vmatpush1.bf16.msra.mxu1 %v2890_v56  ;;  %2845 = vmax.xlane.f32.xlu0 %v2822_v6 }
 0xb0f   : > { %v2815_v18 = vadd.f32 %v2814_v60, %v2692_v21  ;;  %v2816_v26 = vpop.f32.mrb[70].mxu0  ;;  %2988 = vmatprep.subr.bf16.mxu0 %v2889_v35 }
 0xb10   : > { %v2817_v24 = vadd.f32 %v2816_v26, %v2697_v55  ;;  %v2818_v29 = vpop.f32.mrb[71].mxu0  ;;  %2847 = vmax.xlane.f32.xlu1 %v2826_v17  ;;  %2989 = vmatpush1.bf16.msra.mxu0 %v2888_v48  ;;  %v2831_v52 = vmax.f32 %v2813_v43, 0.0 }
 0xb11   : > { %v2819_v53 = vadd.f32 %v2818_v29, %v2697_v55  ;;  %3646 = vmatmul.mubr.msk.bf16.vlgmr.msra.gmra.mrb[68].mxu1 %vm656_vm0, %v3875_v32  ;;  %v2832_v61 = vmax.f32 %v2815_v18, 0.0 }
 0xb12   : > { %v2835_v10 = vmax.f32 %v2817_v24, 0.0  ;;  %2861 = vmax.xlane.f32.xlu0 %v2824_v19  ;;  %2977 = vmatprep.mubr.bf16.mxu1 %v3891_v5 }
 0xb13   : > { %v2836_v57 = vmax.f32 %v2819_v53, 0.0 }
 0xb14   : > { %v2892_v63 = vpack.c.bf16 %v2835_v10, %v2831_v52  ;;  %2863 = vmax.xlane.f32.xlu1 %v2828_v46 }
 0xb15   : > { %v2893_v4 = vpack.c.bf16 %v2836_v57, %v2832_v61 }
 0xb16   : > { %2839 = vmax.xlane.f32.xlu0 %v2825_v15 }
 0xb17   : > { %2990 = vmatprep.subr.bf16.mxu0 %v2893_v4 }
 0xb18   : > { %2843 = vmax.xlane.f32.xlu1 %v2833_v14  ;;  %2991 = vmatpush1.bf16.msra.mxu0 %v2892_v63 }
 0xb19   : > { %3647 = vmatmul.mubr.msk.bf16.gmra.mrb[72].mxu1 %vm656_vm0, %v3876_v44 }
 0xb1a   : > { %2841 = vmax.xlane.f32.xlu0 %v2829_v49  ;;  %3715 = vmatprep.mubr.msk.bf16.mxu1 %vm656_vm0, %v3877_v12 }
 0xb1b   : > { %3648 = vmatmul.mubr.msk.bf16.vlgmr.msra.gmra.mrb[72].mxu0 %vm656_vm0, %v3875_v32 }
 0xb1c   : > { %2859 = vmax.xlane.f32.xlu1 %v2835_v10  ;;  %3030 = vmatprep.mubr.bf16.mxu0 %v3891_v5 }
 0xb1e   : > { %2857 = vmax.xlane.f32.xlu0 %v2831_v52 }
 0xb20   : > { %2851 = vmax.xlane.f32.xlu1 %v2834_v28  ;;  %v3878_v28 = vld [vmem:[%s4808_s6 + $0x38] sm:$0xff]  }
 0xb22   : > { %2849 = vmax.xlane.f32.xlu0 %v2830_v33 }
 0xb23   : > { %3649 = vmatmul.mubr.msk.bf16.gmra.mrb[76].mxu0 %vm656_vm0, %v3876_v44 }
 0xb24   : > { %2867 = vmax.xlane.f32.xlu1 %v2836_v57  ;;  %3274 = vmatprep.mubr.bf16.mxu0 %v3891_v5 }
 0xb26   : > { %2865 = vmax.xlane.f32.xlu0 %v2832_v61 }
 0xb35   : > { %2906 = vperm.xlu1 %3832, %v3641_v9  }
 0xb39   : > { %2916 = vperm.xlu1 %3832, %v3643_v11  }
 0xb3c   : > { %2901 = vperm.xlu0 %3827, %v3640_v0  }
 0xb40   : > { %2911 = vperm.xlu0 %3827, %v3642_v13  }
 0xb44   : > { %3833 = vset.pattern.permute.xlu0 %v3890_v2 }
 0xb8d   : > { %v2838_v23 = vpop.xlane.xlu1 %2837 }
 0xb97   : > { %v2854_v62 = vpop.xlane.xlu0 %2853 }
 0xb99   : > { %v2856_v40 = vpop.xlane.xlu1 %2855 }
 0xb9b   : > { %v2846_v16 = vpop.xlane.xlu0 %2845 }
 0xb9c   : > { %v2869_v42 = vsel %vm817_vm1, %v2838_v23, %v2846_v16 }
 0xb9d   : > { %v2848_v15 = vpop.xlane.xlu1 %2847  ;;  %v2873_v20 = vsel %vm822_vm2, %v2869_v42, %v2854_v62 }
 0xb9f   : > { %v2862_v6 = vpop.xlane.xlu0 %2861 }
 0xba0   : > { %v2877_v25 = vsel %vm827_vm3, %v2873_v20, %v2862_v6 }
 0xba1   : > { %v2864_v17 = vpop.xlane.xlu1 %2863 }
 0xba3   : > { %v2840_v21 = vpop.xlane.xlu0 %2839 }
 0xba4   : > { %v2870_v34 = vsel %vm817_vm1, %v2840_v21, %v2848_v15 }
 0xba5   : > { %v2874_v55 = vsel %vm822_vm2, %v2870_v34, %v2856_v40  ;;  %v2844_v51 = vpop.xlane.xlu1 %2843 }
 0xba6   : > { %v2878_v8 = vsel %vm827_vm3, %v2874_v55, %v2864_v17 }
 0xba7   : > { %v2842_v59 = vpop.xlane.xlu0 %2841  ;;  %v3046_v58 = vpack.c.bf16 %v2878_v8, %v2877_v25 }
 0xba9   : > { %v2860_v54 = vpop.xlane.xlu1 %2859  ;;  %3711 = vmatprep.subr.bf16.mxu1 %v3046_v58 }
 0xbaa   : > { %3712 = vmatpush3.bf16.msra.mxu1 %v3046_v58 }
 0xbab   : > { %v2858_v36 = vpop.xlane.xlu0 %2857 }
 0xbad   : > { %v2852_v41 = vpop.xlane.xlu1 %2851 }
 0xbae   : > { %v2872_v45 = vsel %vm817_vm1, %v2844_v51, %v2852_v41 }
 0xbaf   : > { %v2850_v50 = vpop.xlane.xlu0 %2849  ;;  %v2876_v49 = vsel %vm822_vm2, %v2872_v45, %v2860_v54 }
 0xbb0   : > { %v2871_v39 = vsel %vm817_vm1, %v2842_v59, %v2850_v50 }
 0xbb1   : > { %v2868_v22 = vpop.xlane.xlu1 %2867  ;;  %v2875_v14 = vsel %vm822_vm2, %v2871_v39, %v2858_v36 }
 0xbb2   : > { %v2880_v7 = vsel %vm827_vm3, %v2876_v49, %v2868_v22 }
 0xbb3   : > { %v2866_v31 = vpop.xlane.xlu0 %2865 }
 0xbb4   : > { %v2879_v27 = vsel %vm827_vm3, %v2875_v14, %v2866_v31 }
 0xbb5   : > { %v3047_v33 = vpack.c.bf16 %v2880_v7, %v2879_v27  ;;  %v2907_v57 = vpop.permute.xlu1 %2906 }
 0xbb7   : > { %3713 = vmatprep.subr.bf16.mxu1 %v3047_v33 }
 0xbb8   : > { %3714 = vmatpush3.bf16.msra.mxu1 %v3047_v33 }
 0xbb9   : > { %v4728_v4 = vpop.permute.xlu1 %2916 }
 0xbbb   : > { %3716 = vmatmul.mubr.msk.bf16.vlgmr.msra.gmra.mrb[76].mxu1 %vm656_vm0, %v3878_v28  ;;  %v2902_v63 = vpop.permute.xlu0 %2901 }
 0xbbc   : > { %3327 = vmatprep.mubr.bf16.mxu1 %v3891_v5 }
 0xbbf   : > { %v4730_v44 = vpop.permute.xlu0 %2911 }
 0xbe4   : > { %v4685_v30 = vpop.f32.mrb[68].mxu1 }
 0xbe5   : > { %v4687_v56 = vpop.f32.mrb[69].mxu1 }
 0xbe6   : > { %v4689_v38 = vpop.f32.mrb[70].mxu1  ;;  %v2972_v40 = vadd.f32 %v4687_v56, %v2902_v63 }
 0xbe7   : > { %v4691_v47 = vpop.f32.mrb[71].mxu1 }
 0xbe8   : > { %v2976_v16 = vadd.f32 %v4691_v47, %v2907_v57 }
 0xbec   : > { %v2979_v19 = vpop.f32.mrb[72].mxu1 }
 0xbed   : > { %v4693_v46 = vpop.f32.mrb[73].mxu1 }
 0xbee   : > { %v2983_v48 = vpop.f32.mrb[74].mxu1  ;;  %v4695_v35 = vpop.f32.mrb[72].mxu0  ;;  %v2982_v22 = vadd.f32 %v4693_v46, %v4730_v44  ;;  %v2970_v46 = vadd.f32 %v4685_v30, %v2902_v63 }
 0xbef   : > { %v4697_v37 = vpop.f32.mrb[75].mxu1  ;;  %v4699_v32 = vpop.f32.mrb[73].mxu0  ;;  %v2984_v11 = vadd.f32 %v2983_v48, %v4728_v4 }
 0xbf0   : > { %v4701_v43 = vpop.f32.mrb[74].mxu0  ;;  %v3025_v59 = vadd.f32 %v4699_v32, %v2902_v63  ;;  %v2986_v49 = vadd.f32 %v4697_v37, %v4728_v4  ;;  %v2974_v37 = vadd.f32 %v4689_v38, %v2907_v57 }
 0xbf1   : > { %v4703_v60 = vpop.f32.mrb[75].mxu0 }
 0xbf2   : > { %v3029_v8 = vadd.f32 %v4703_v60, %v2907_v57 }
 0xbf6   : > { %v4705_v18 = vpop.f32.mrb[76].mxu0 }
 0xbf7   : > { %v4707_v26 = vpop.f32.mrb[77].mxu0  ;;  %v3033_v30 = vadd.f32 %v4705_v18, %v4730_v44 }
 0xbf8   : > { %v4709_v24 = vpop.f32.mrb[78].mxu0  ;;  %v3035_v27 = vadd.f32 %v4707_v26, %v4730_v44  ;;  %v3023_v26 = vadd.f32 %v4695_v35, %v2902_v63 }
 0xbf9   : > { %v4711_v29 = vpop.f32.mrb[79].mxu0  ;;  %v3037_v38 = vadd.f32 %v4709_v24, %v4728_v4  ;;  %v3880_v24 = vld [vmem:[%s4810_s8 + $0x38] sm:$0xff]  }
 0xbfa   : > { %v3039_v56 = vadd.f32 %v4711_v29, %v4728_v4  ;;  %v3027_v29 = vadd.f32 %v4701_v43, %v2907_v57  ;;  %v3879_v43 = vld [vmem:[%s4810_s8 + $0x30] sm:$0xff]  }
 0xc8e   : > { %v3717_v53 = vpop.f32.mrb[76].mxu1 }
 0xc8f   : > { %3125 = vperm.xlu1 %3832, %v3717_v53   ;;  %3150 = vperm.xlu0 %3833, %v3717_v53   ;;  %v3098_v52 = vpop.f32.mrb[77].mxu1 }
 0xc90   : > { %v3718_v10 = vpop.f32.mrb[78].mxu1 }
 0xc91   : > { %v3101_v61 = vpop.f32.mrb[79].mxu1 }
 0xc93   : > { %3834 = vset.pattern.permute.xlu1 %v3892_v3  ;;  %3840 = vset.pattern.permute.xlu0 %v3891_v5 }
 0xc94   : > { %3198 = vperm.xlu1 %3834, %v3717_v53   ;;  %3130 = vperm.xlu0 %3840, %v3718_v10  }
 0xc98   : > { %3835 = vset.pattern.permute.xlu1 %v3890_v2  ;;  %3842 = vset.pattern.permute.xlu0 %v3890_v2 }
 0xc99   : > { %3142 = vperm.xlu1 %3835, %v3098_v52   ;;  %3146 = vperm.xlu0 %3842, %v3101_v61  }
 0xc9d   : > { %3836 = vset.pattern.permute.xlu1 %v3891_v5  ;;  %3844 = vset.pattern.permute.xlu0 %v3892_v3 }
 0xc9e   : > { %3115 = vperm.xlu1 %3836, %v3098_v52   ;;  %3194 = vperm.xlu0 %3844, %v3101_v61  }
 0xca2   : > { %3837 = vset.pattern.permute.xlu1 %v3892_v3  ;;  %3845 = vset.pattern.permute.xlu0 %v3889_v1 }
 0xca3   : > { %3190 = vperm.xlu1 %3837, %v3098_v52   ;;  %3174 = vperm.xlu0 %3845, %v3717_v53  }
 0xca7   : > { %3838 = vset.pattern.permute.xlu1 %v3889_v1  ;;  %3847 = vset.pattern.permute.xlu0 %v3891_v5 }
 0xca8   : > { %3166 = vperm.xlu1 %3838, %v3098_v52  }
 0xcac   : > { %3839 = vset.pattern.permute.xlu1 %v3890_v2 }
 0xcad   : > { %3154 = vperm.xlu1 %3839, %v3718_v10  }
 0xcb1   : > { %3841 = vset.pattern.permute.xlu1 %v3892_v3  ;;  %v2980_v3 = vadd.f32 %v2979_v19, %v4730_v44 }
 0xcb2   : > { %3202 = vperm.xlu1 %3841, %v3718_v10  }
 0xcb6   : > { %3843 = vset.pattern.permute.xlu1 %v3891_v5 }
 0xcb7   : > { %3120 = vperm.xlu1 %3843, %v3101_v61  }
 0xcbb   : > { %3846 = vset.pattern.permute.xlu1 %v3889_v1 }
 0xcbc   : > { %3170 = vperm.xlu1 %3846, %v3101_v61  }
 0xcc0   : > { %3178 = vperm.xlu1 %3846, %v3718_v10  }
 0xcc4   : > { %3848 = vset.pattern.permute.xlu1 %v3891_v5 }
 0xd0e   : > { %v3126_v2 = vpop.permute.xlu1 %3125  ;;  %v3151_v9 = vpop.permute.xlu0 %3150 }
 0xd0f   : > { %v3135_v0 = vadd.f32 %v3126_v2, %v2980_v3  ;;  %v3159_v14 = vadd.f32 %v3151_v9, %v2982_v22 }
 0xd11   : > { %v3139_v23 = vmax.f32 %v3135_v0, 0.0  ;;  %v3163_v33 = vmax.f32 %v3159_v14, 0.0 }
 0xd13   : > { %v3199_v12 = vpop.permute.xlu1 %3198  ;;  %v3131_v13 = vpop.permute.xlu0 %3130 }
 0xd14   : > { %v3136_v1 = vadd.f32 %v3131_v13, %v2984_v11  ;;  %v3207_v47 = vadd.f32 %v3199_v12, %v3035_v27 }
 0xd16   : > { %v3140_v62 = vmax.f32 %v3136_v1, 0.0  ;;  %v3211_v60 = vmax.f32 %v3207_v47, 0.0 }
 0xd18   : > { %v3222_v15 = vpack.c.bf16 %v3140_v62, %v3139_v23  ;;  %v3143_v6 = vpop.permute.xlu1 %3142  ;;  %v3147_v17 = vpop.permute.xlu0 %3146 }
 0xd19   : > { %v3157_v42 = vadd.f32 %v3143_v6, %v2972_v40  ;;  %v3158_v21 = vadd.f32 %v3147_v17, %v2976_v16 }
 0xd1b   : > { %v3161_v34 = vmax.f32 %v3157_v42, 0.0  ;;  %v3162_v20 = vmax.f32 %v3158_v21, 0.0 }
 0xd1d   : > { %v3219_v55 = vpack.c.bf16 %v3162_v20, %v3161_v34  ;;  %v3116_v51 = vpop.permute.xlu1 %3115  ;;  %v3195_v25 = vpop.permute.xlu0 %3194 }
 0xd1e   : > { %v3206_v58 = vadd.f32 %v3195_v25, %v3029_v8  ;;  %v3133_v52 = vadd.f32 %v3116_v51, %v2970_v46 }
 0xd1f   : > { %3242 = vmatprep.subr.bf16.mxu0 %v3219_v55 }
 0xd20   : > { %v3210_v41 = vmax.f32 %v3206_v58, 0.0  ;;  %v3137_v9 = vmax.f32 %v3133_v52, 0.0 }
 0xd22   : > { %v3191_v54 = vpop.permute.xlu1 %3190  ;;  %v3175_v0 = vpop.permute.xlu0 %3174 }
 0xd23   : > { %v3205_v36 = vadd.f32 %v3191_v54, %v3025_v59  ;;  %v3183_v23 = vadd.f32 %v3175_v0, %v3033_v30 }
 0xd25   : > { %v3209_v50 = vmax.f32 %v3205_v36, 0.0  ;;  %v3187_v57 = vmax.f32 %v3183_v23, 0.0  ;;  %v3409_v36 = vld [vmem:[%s4811_s9 + $0x8] sm:$0xff] }
 0xd27   : > { %v3221_v45 = vpack.c.bf16 %v3210_v41, %v3209_v50  ;;  %v3167_v39 = vpop.permute.xlu1 %3166  ;;  %v3410_v41 = vld [vmem:[%s4811_s9 + $0x10] sm:$0xff]  ;;  %v3408_v50 = vld [vmem:[%s4811_s9] sm:$0xff] }
 0xd28   : > { %v3181_v11 = vadd.f32 %v3167_v39, %v3023_v26 }
 0xd29   : > { %3295 = vmatprep.subr.bf16.mxu1 %v3221_v45  ;;  %v3411_v45 = vld [vmem:[%s4811_s9 + $0x18] sm:$0xff] }
 0xd2a   : > { %v3185_v62 = vmax.f32 %v3181_v11, 0.0 }
 0xd2c   : > { %v3155_v31 = vpop.permute.xlu1 %3154 }
 0xd2d   : > { %v3160_v7 = vadd.f32 %v3155_v31, %v2986_v49 }
 0xd2f   : > { %v3164_v28 = vmax.f32 %v3160_v7, 0.0 }
 0xd31   : > { %v3223_v19 = vpack.c.bf16 %v3164_v28, %v3163_v33  ;;  %v3203_v48 = vpop.permute.xlu1 %3202 }
 0xd32   : > { %v3208_v32 = vadd.f32 %v3203_v48, %v3039_v56 }
 0xd34   : > { %v3212_v53 = vmax.f32 %v3208_v32, 0.0 }
 0xd36   : > { %v3225_v10 = vpack.c.bf16 %v3212_v53, %v3211_v60  ;;  %v3121_v61 = vpop.permute.xlu1 %3120 }
 0xd37   : > { %v3134_v2 = vadd.f32 %v3121_v61, %v2974_v37 }
 0xd39   : > { %v3138_v3 = vmax.f32 %v3134_v2, 0.0 }
 0xd3b   : > { %v3218_v12 = vpack.c.bf16 %v3138_v3, %v3137_v9  ;;  %v3171_v13 = vpop.permute.xlu1 %3170 }
 0xd3c   : > { %v3182_v1 = vadd.f32 %v3171_v13, %v3027_v29 }
 0xd3d   : > { %3243 = vmatpush1.bf16.msra.mxu0 %v3218_v12 }
 0xd3e   : > { %v3186_v40 = vmax.f32 %v3182_v1, 0.0  ;;  %3244 = vmatprep.subr.bf16.mxu0 %v3223_v19 }
 0xd3f   : > { %v3179_v35 = vpop.permute.xlu1 %3178 }
 0xd40   : > { %v3220_v63 = vpack.c.bf16 %v3186_v40, %v3185_v62  ;;  %v3184_v16 = vadd.f32 %v3179_v35, %v3037_v38 }
 0xd41   : > { %3245 = vmatpush1.bf16.msra.mxu0 %v3222_v15 }
 0xd42   : > { %v3188_v6 = vmax.f32 %v3184_v16, 0.0  ;;  %3296 = vmatpush1.bf16.msra.mxu1 %v3220_v63 }
 0xd43   : > { %3297 = vmatprep.subr.bf16.mxu1 %v3225_v10 }
 0xd44   : > { %v3224_v18 = vpack.c.bf16 %v3188_v6, %v3187_v57  ;;  %3664 = vmatmul.mubr.msk.bf16.vlgmr.msra.gmra.mrb[36].mxu0 %vm656_vm0, %v3879_v43 }
 0xd45   : > { %3284 = vmatprep.mubr.bf16.mxu0 %v3891_v5 }
 0xd46   : > { %3298 = vmatpush1.bf16.msra.mxu1 %v3224_v18 }
 0xd49   : > { %3666 = vmatmul.mubr.msk.bf16.vlgmr.msra.gmra.mrb[36].mxu1 %vm656_vm0, %v3879_v43 }
 0xd4a   : > { %3337 = vmatprep.mubr.bf16.mxu1 %v3891_v5 }
 0xd4c   : > { %3665 = vmatmul.mubr.msk.bf16.gmra.mrb[40].mxu0 %vm656_vm0, %v3880_v24 }
 0xd51   : > { %3667 = vmatmul.mubr.msk.bf16.gmra.mrb[40].mxu1 %vm656_vm0, %v3880_v24 }
 0xe17   : > { %v3276_v4 = vpop.f32.mrb[36].mxu0 }
 0xe18   : > { %3364 = vmax.xlane.f32.xlu1 %v3276_v4  ;;  %v3278_v44 = vpop.f32.mrb[37].mxu0 }
 0xe19   : > { %v3280_v15 = vpop.f32.mrb[38].mxu0 }
 0xe1a   : > { %v3282_v17 = vpop.f32.mrb[39].mxu0 }
 0xe1c   : > { %v3329_v42 = vpop.f32.mrb[36].mxu1 }
 0xe1d   : > { %3380 = vmax.xlane.f32.xlu0 %v3329_v42  ;;  %v3331_v21 = vpop.f32.mrb[37].mxu1 }
 0xe1e   : > { %v3333_v34 = vpop.f32.mrb[38].mxu1 }
 0xe1f   : > { %v3286_v20 = vpop.f32.mrb[40].mxu0  ;;  %3382 = vmax.xlane.f32.xlu1 %v3333_v34  ;;  %v3335_v55 = vpop.f32.mrb[39].mxu1 }
 0xe20   : > { %v3288_v51 = vpop.f32.mrb[41].mxu0 }
 0xe21   : > { %v3290_v25 = vpop.f32.mrb[42].mxu0  ;;  %3372 = vmax.xlane.f32.xlu0 %v3278_v44 }
 0xe22   : > { %v3292_v5 = vpop.f32.mrb[43].mxu0 }
 0xe23   : > { %3374 = vmax.xlane.f32.xlu1 %v3282_v17 }
 0xe24   : > { %v3339_v8 = vpop.f32.mrb[40].mxu1 }
 0xe25   : > { %3388 = vmax.xlane.f32.xlu0 %v3331_v21  ;;  %v3341_v59 = vpop.f32.mrb[41].mxu1 }
 0xe26   : > { %v3343_v58 = vpop.f32.mrb[42].mxu1 }
 0xe27   : > { %3390 = vmax.xlane.f32.xlu1 %v3335_v55  ;;  %v3345_v54 = vpop.f32.mrb[43].mxu1 }
 0xe29   : > { %3366 = vmax.xlane.f32.xlu0 %v3280_v15 }
 0xe2d   : > { %3368 = vmax.xlane.f32.xlu0 %v3286_v20 }
 0xe31   : > { %3384 = vmax.xlane.f32.xlu0 %v3339_v8 }
 0xe35   : > { %3376 = vmax.xlane.f32.xlu0 %v3288_v51 }
 0xe38   : > { %3419 = vperm.xlu1 %3848, %v3409_v36  }
 0xe39   : > { %3392 = vmax.xlane.f32.xlu0 %v3341_v59 }
 0xe3c   : > { %3424 = vperm.xlu1 %3848, %v3410_v41  }
 0xe4f   : > { %3414 = vperm.xlu0 %3847, %v3408_v50  }
 0xe60   : > { %3370 = vmax.xlane.f32.xlu1 %v3290_v25 }
 0xe64   : > { %3386 = vmax.xlane.f32.xlu1 %v3343_v58 }
 0xe68   : > { %3378 = vmax.xlane.f32.xlu1 %v3292_v5 }
 0xe6c   : > { %3394 = vmax.xlane.f32.xlu1 %v3345_v54 }
 0xe7d   : > { %3429 = vperm.xlu1 %3848, %v3411_v45  }
 0xea5   : > { %v3365_v39 = vpop.xlane.xlu1 %3364 }
 0xeaa   : > { %v3381_v22 = vpop.xlane.xlu0 %3380 }
 0xeac   : > { %v3383_v49 = vpop.xlane.xlu1 %3382 }
 0xeae   : > { %v3373_v14 = vpop.xlane.xlu0 %3372 }
 0xeaf   : > { %v3396_v26 = vsel %vm817_vm1, %v3365_v39, %v3373_v14 }
 0xeb0   : > { %v3375_v31 = vpop.xlane.xlu1 %3374  ;;  %v3400_v9 = vsel %vm822_vm2, %v3396_v26, %v3381_v22 }
 0xeb2   : > { %v3389_v7 = vpop.xlane.xlu0 %3388 }
 0xeb3   : > { %v3404_v3 = vsel %vm827_vm3, %v3400_v9, %v3389_v7 }
 0xeb4   : > { %v3391_v27 = vpop.xlane.xlu1 %3390 }
 0xeb6   : > { %v3367_v33 = vpop.xlane.xlu0 %3366 }
 0xeb7   : > { %v3397_v28 = vsel %vm817_vm1, %v3367_v33, %v3375_v31 }
 0xeb8   : > { %v3401_v56 = vsel %vm822_vm2, %v3397_v28, %v3383_v49  ;;  %v3420_v47 = vpop.permute.xlu1 %3419 }
 0xeb9   : > { %v3405_v19 = vsel %vm827_vm3, %v3401_v56, %v3391_v27 }
 0xeba   : > { %v3433_v48 = vadd.f32 %v3420_v47, %v3405_v19  ;;  %v3369_v32 = vpop.xlane.xlu0 %3368 }
 0xebc   : > { %3438 = vst.msk [vmem:[%s361_s11 + $0x8] sm:$0xff] %vm3436_vm4, %v3433_v48  ;;  %v3425_v10 = vpop.permute.xlu1 %3424 }
 0xebe   : > { %v3385_v46 = vpop.xlane.xlu0 %3384 }
 0xec2   : > { %v3377_v60 = vpop.xlane.xlu0 %3376 }
 0xec3   : > { %v3398_v53 = vsel %vm817_vm1, %v3369_v32, %v3377_v60 }
 0xec4   : > { %v3402_v37 = vsel %vm822_vm2, %v3398_v53, %v3385_v46 }
 0xec6   : > { %v3393_v52 = vpop.xlane.xlu0 %3392 }
 0xec7   : > { %v3406_v61 = vsel %vm827_vm3, %v3402_v37, %v3393_v52 }
 0xec8   : > { %v3434_v2 = vadd.f32 %v3425_v10, %v3406_v61 }
 0xeca   : > { %3439 = vst.msk [vmem:[%s361_s11 + $0x10] sm:$0xff] %vm3436_vm4, %v3434_v2 }
 0xece   : > { %v3415_v29 = vpop.permute.xlu0 %3414 }
 0xecf   : > { %v3432_v11 = vadd.f32 %v3415_v29, %v3404_v3 }
 0xed1   : > { %3437 = vst.msk [vmem:[%s361_s11] sm:$0xff] %vm3436_vm4, %v3432_v11 }
 0xeed   : > { %v3371_v0 = vpop.xlane.xlu1 %3370 }
 0xef1   : > { %v3387_v12 = vpop.xlane.xlu1 %3386 }
 0xef5   : > { %v3379_v13 = vpop.xlane.xlu1 %3378 }
 0xef6   : > { %v3399_v30 = vsel %vm817_vm1, %v3371_v0, %v3379_v13 }
 0xef7   : > { %v3403_v38 = vsel %vm822_vm2, %v3399_v30, %v3387_v12 }
 0xef9   : > { %v3395_v1 = vpop.xlane.xlu1 %3394 }
 0xefa   : > { %v3407_v23 = vsel %vm827_vm3, %v3403_v38, %v3395_v1 }
 0xefd   : > { %v3430_v62 = vpop.permute.xlu1 %3429 }
 0xefe   : > { %v3435_v40 = vadd.f32 %v3430_v62, %v3407_v23 }
 0xf00   : > { %3440 = vst.msk [vmem:[%s361_s11 + $0x18] sm:$0xff] %vm3436_vm4, %v3435_v40 }
 0xf01 PF: > { %s20_s13 = sadd.s32 1, %s3887_s13  }
 0xf02   : > { %p17_p5 = scmp.ge.s32.totalorder %s20_s13, 4  }
 0xf04   :  { %19 = sbr.rel (!%p17_p5) target bundleno = 1 (0x1), region = 111 }

</bundles_post_ra>
